<compile_context>
chip_gen: v7x
topology: tpu7x:2x2x1
jax: 0.10.0
libtpu: 0.0.40
codegen_flags: <defaults>
</compile_context>

<pallas_src>
import jax
import jax.numpy as jnp
from jax import lax
from jax.experimental import pallas as pl
from jax.experimental.pallas import tpu as pltpu


def _round_up(x, m):
    return (x + m - 1) // m * m


def _pad_to(x, shape):
    return jnp.pad(x, [(0, t - s) for s, t in zip(x.shape, shape)])


def _pick_tile(total, cap):
    """Tile size: multiple of 8, capped (VMEM), >=2 grid steps when possible."""
    return int(min(cap, max(8, _round_up(pl.cdiv(total, 2), 8))))


# ----------------------------------------------------------------------------
# Pallas kernels
# ----------------------------------------------------------------------------
def _conv1_pool_kernel(p_ref, w_ref, b_ref, o_ref):
    """conv1 (one matmul over all 4 pool positions) + bias + ReLU + 2x2 maxpool.

    p_ref: (4, TM, 75) bf16 im2col patches; axis0 = position inside the 2x2
           pool window, rows = pooled pixels (n, ph, pw), K = (C=3, kh, kw).
    w_ref: (75, 8)  bf16 conv1 weight (OC 6 -> 8 lanes).
    b_ref: (1, 8)   f32 bias.
    o_ref: (TM, 8)  bf16 pooled+ReLU'd activations (narrow writeback).
    """
    tm = p_ref.shape[1]
    k = p_ref.shape[2]
    c = w_ref.shape[1]
    z = jnp.dot(p_ref[...].reshape(4 * tm, k), w_ref[...],
                preferred_element_type=jnp.float32)            # (4*TM, 8) f32
    z = z.reshape(4, tm, c)
    z = jnp.maximum(jnp.maximum(z[0], z[1]), jnp.maximum(z[2], z[3]))  # pool
    # max-pool before bias/ReLU is equivalent (monotonicity).
    o_ref[...] = jnp.maximum(z + b_ref[...], 0.0).astype(o_ref.dtype)


def _conv2_pool_mlp_kernel(p_ref, w2_ref, b2_ref, w1_ref, b1_ref,
                           wf2_ref, bf2_ref, wf3_ref, bf3_ref, o_ref):
    """conv2 + bias + ReLU + 2x2 maxpool + f1/f2/f3 (each ReLU'd, as in the ref).

    p_ref : (4, 25, TB, 150) bf16 conv2 patches; axis0 = pool position, axis1 =
            pooled 5x5 spatial position p = ph*5+pw, axis2 = image, K=(C=6,kh,kw).
    w2_ref: (150, 16) bf16.    b2_ref: (1, 16)  f32.
    w1_ref: (25, 16, 128) bf16 f1 weight split per spatial position
            (w1_ref[p, c, o] = f1_w[o, c*25 + p]).   b1_ref: (1, 128) f32.
    wf2_ref: (128, 128) bf16,  bf2_ref: (1, 128) f32.
    wf3_ref: (128, 16)  bf16,  bf3_ref: (1, 16)  f32.
    o_ref : (TB, 16) f32 ReLU(f3) logits (10 real).
    """
    tb = p_ref.shape[2]
    k = p_ref.shape[3]
    c2 = w2_ref.shape[1]
    # conv2 for 4 pool positions x 25 spatial positions x TB images as ONE dot.
    z = jnp.dot(p_ref[...].reshape(4 * 25 * tb, k), w2_ref[...],
                preferred_element_type=jnp.float32)             # (100*TB, 16)
    z = z.reshape(4, 25 * tb, c2)
    z = jnp.maximum(jnp.maximum(z[0], z[1]), jnp.maximum(z[2], z[3]))  # pool2
    a2 = jnp.maximum(z + b2_ref[...], 0.0).astype(jnp.bfloat16)  # (25*TB, 16)
    a2 = a2.reshape(25, tb, c2)
    # f1 contraction over (p, c) as 25 accumulated dots (same number of MXU RHS
    # loads as a single K=400 dot, without an in-kernel relayout to (TB, 400)).
    h1 = jnp.zeros((tb, 128), jnp.float32)
    for p in range(25):
        h1 = h1 + jnp.dot(a2[p], w1_ref[p], preferred_element_type=jnp.float32)
    h1 = jnp.maximum(h1 + b1_ref[...], 0.0).astype(jnp.bfloat16)         # f1+ReLU
    h2 = jnp.dot(h1, wf2_ref[...], preferred_element_type=jnp.float32)
    h2 = jnp.maximum(h2 + bf2_ref[...], 0.0).astype(jnp.bfloat16)        # f2+ReLU
    h3 = jnp.dot(h2, wf3_ref[...], preferred_element_type=jnp.float32)
    o_ref[...] = jnp.maximum(h3 + bf3_ref[...], 0.0).astype(o_ref.dtype)  # f3+ReLU


# ----------------------------------------------------------------------------
# pallas_call wrappers
# ----------------------------------------------------------------------------
def _stage1_call(patches, w, b, tile_rows):
    # patches: (4, Mp, 75) bf16 -> (Mp, 8) bf16
    mp, k = patches.shape[1], patches.shape[2]
    c = w.shape[1]
    return pl.pallas_call(
        _conv1_pool_kernel,
        out_shape=jax.ShapeDtypeStruct((mp, c), jnp.bfloat16),
        grid=(mp // tile_rows,),
        in_specs=[
            pl.BlockSpec((4, tile_rows, k), lambda i: (0, i, 0)),
            pl.BlockSpec((k, c), lambda i: (0, 0)),      # resident weight
            pl.BlockSpec((1, c), lambda i: (0, 0)),      # resident bias
        ],
        out_specs=pl.BlockSpec((tile_rows, c), lambda i: (i, 0)),
        compiler_params=pltpu.CompilerParams(dimension_semantics=("parallel",)),
    )(patches, w, b)


def _stage2_call(patches, w2, b2, w1, b1, wf2, bf2, wf3, bf3, tile_batch):
    # patches: (4, 25, Np, 150) bf16 -> (Np, 16) f32
    nb, k = patches.shape[2], patches.shape[3]
    c2 = w2.shape[1]
    r2 = lambda i: (0, 0)
    r3 = lambda i: (0, 0, 0)
    return pl.pallas_call(
        _conv2_pool_mlp_kernel,
        out_shape=jax.ShapeDtypeStruct((nb, 16), jnp.float32),
        grid=(nb // tile_batch,),
        in_specs=[
            pl.BlockSpec((4, 25, tile_batch, k), lambda i: (0, 0, i, 0)),
            pl.BlockSpec((k, c2), r2),
            pl.BlockSpec((1, c2), r2),
            pl.BlockSpec((25, c2, 128), r3),
            pl.BlockSpec((1, 128), r2),
            pl.BlockSpec((128, 128), r2),
            pl.BlockSpec((1, 128), r2),
            pl.BlockSpec((128, 16), r2),
            pl.BlockSpec((1, 16), r2),
        ],
        out_specs=pl.BlockSpec((tile_batch, 16), lambda i: (i, 0)),
        compiler_params=pltpu.CompilerParams(dimension_semantics=("parallel",)),
    )(patches, w2, b2, w1, b1, wf2, bf2, wf3, bf3)


# ----------------------------------------------------------------------------
# LeNet forward (layout glue in plain JAX, all compute in Pallas)
# ----------------------------------------------------------------------------
def init_lenet_params(key):
    # PyTorch-convention shapes: conv (OC, C, kh, kw); linear (out, in).
    def u(k, fan_in, shape):
        bound = 1.0 / jnp.sqrt(fan_in)
        return jax.random.uniform(k, shape, jnp.float32, -bound, bound)

    ks = jax.random.split(key, 10)
    return {
        "conv1_w": u(ks[0], 3 * 25, (6, 3, 5, 5)),
        "conv1_b": u(ks[1], 3 * 25, (6,)),
        "conv2_w": u(ks[2], 6 * 25, (16, 6, 5, 5)),
        "conv2_b": u(ks[3], 6 * 25, (16,)),
        "f1_w": u(ks[4], 400, (120, 400)),
        "f1_b": u(ks[5], 400, (120,)),
        "f2_w": u(ks[6], 120, (84, 120)),
        "f2_b": u(ks[7], 120, (84,)),
        "f3_w": u(ks[8], 84, (10, 84)),
        "f3_b": u(ks[9], 84, (10,)),
    }


@jax.jit
def lenet_forward(params, x):
    # x: (N, 3, 32, 32) float32, NCHW (as in the PyTorch module).
    n = x.shape[0]
    cdt = jnp.bfloat16  # compute dtype for patches/weights; accumulation is f32.

    # -------- stage 1: conv1 + ReLU + 2x2 pool --------
    # Patches straight in NHWC (feature order (C, kh, kw) == weight.reshape(6,75)
    # regardless of layout), bf16, K left at 75 (no HBM pad).
    x_nhwc = jnp.transpose(x, (0, 2, 3, 1)).astype(cdt)          # tiny
    p1 = lax.conv_general_dilated_patches(
        x_nhwc, filter_shape=(5, 5), window_strides=(1, 1), padding="VALID",
        dimension_numbers=("NHWC", "HWIO", "NHWC"))              # (N, 28, 28, 75)
    # pool-split: 2x2 window position (a, b) -> leading axis of 4 (single copy).
    p1 = p1.reshape(n, 14, 2, 14, 2, 75).transpose(2, 4, 0, 1, 3, 5)
    p1 = p1.reshape(4, n * 196, 75)
    m1 = n * 196
    tile_rows = _pick_tile(m1, 1024)
    m1p = _round_up(m1, tile_rows)
    p1 = _pad_to(p1, (4, m1p, 75))                               # pad rows only

    w1c = _pad_to(params["conv1_w"].reshape(6, 75).T, (75, 8)).astype(cdt)
    b1c = _pad_to(params["conv1_b"].reshape(1, 6), (1, 8)).astype(jnp.float32)
    a1 = _stage1_call(p1, w1c, b1c, tile_rows)                   # (m1p, 8) bf16
    a1 = a1[:m1].reshape(n, 14, 14, 8)[..., :6]                  # pooled conv1, NHWC

    # -------- stage 2: conv2 + ReLU + pool + f1/f2/f3 (one fused kernel) --------
    p2 = lax.conv_general_dilated_patches(
        a1, filter_shape=(5, 5), window_strides=(1, 1), padding="VALID",
        dimension_numbers=("NHWC", "HWIO", "NHWC"))              # (N, 10, 10, 150)
    p2 = p2.reshape(n, 5, 2, 5, 2, 150).transpose(2, 4, 1, 3, 0, 5)
    p2 = p2.reshape(4, 25, n, 150)
    tile_batch = _pick_tile(_round_up(n, 8), 32)
    n_pad = _round_up(n, tile_batch)
    p2 = _pad_to(p2, (4, 25, n_pad, 150))                        # pad batch only

    w2c = params["conv2_w"].reshape(16, 150).T.astype(cdt)       # (150, 16)
    b2c = params["conv2_b"].reshape(1, 16).astype(jnp.float32)
    # f1 weight split per pooled spatial position p = ph*5 + pw
    # (PyTorch view(-1, 400) flattens NCHW -> feature index c*25 + p).
    w1m = params["f1_w"].reshape(120, 16, 25).transpose(2, 1, 0)  # (25, 16, 120)
    w1m = _pad_to(w1m, (25, 16, 128)).astype(cdt)
    b1m = _pad_to(params["f1_b"].reshape(1, 120), (1, 128)).astype(jnp.float32)
    wf2 = _pad_to(params["f2_w"].T, (128, 128)).astype(cdt)
    bf2 = _pad_to(params["f2_b"].reshape(1, 84), (1, 128)).astype(jnp.float32)
    wf3 = _pad_to(params["f3_w"].T, (128, 16)).astype(cdt)
    bf3 = _pad_to(params["f3_b"].reshape(1, 10), (1, 16)).astype(jnp.float32)

    out = _stage2_call(p2, w2c, b2c, w1m, b1m, wf2, bf2, wf3, bf3, tile_batch)
    return out[:n, :10]   # ReLU'd logits (the reference applies ReLU to f3 too)


if __name__ == "__main__":
    key = jax.random.PRNGKey(0)
    k_params, k_x = jax.random.split(key)
    params = init_lenet_params(k_params)
    # LeNet's view(-1, 16*5*5) fixes the input to 3x32x32.
    x = jax.random.normal(k_x, (2, 3, 32, 32), dtype=jnp.float32)
    pred = lenet_forward(params, x)
    jax.block_until_ready(pred)
    assert pred.shape == (2, 10)
    print("KERNEL_OK")
</pallas_src>

<mosaic_0001>
module attributes {stable_mosaic.version = 11 : i64} {
  func.func @_conv1_pool_kernel(%arg0: i32, %arg1: memref<4x200x75xbf16, #tpu.memory_space<vmem>>, %arg2: memref<75x8xbf16, #tpu.memory_space<vmem>>, %arg3: memref<1x8xf32, #tpu.memory_space<vmem>>, %arg4: memref<200x8xbf16, #tpu.memory_space<vmem>>) attributes {dimension_semantics = [#tpu.dimension_semantics<parallel>], iteration_bounds = array<i64: 2>, scalar_prefetch = 0 : i64, scratch_operands = 0 : i64, tpu.core_type = #tpu.core_type<tc>, window_params = [{transform_indices = @transform_0, window_bounds = array<i64: 4, 200, 75>}, {pipeline_mode = #tpu.pipeline_mode<synchronous>, transform_indices = @transform_1, window_bounds = array<i64: 75, 8>}, {pipeline_mode = #tpu.pipeline_mode<synchronous>, transform_indices = @transform_2, window_bounds = array<i64: 1, 8>}, {transform_indices = @transform_3, window_bounds = array<i64: 200, 8>}]} {
    %c0 = arith.constant 0 : index
    %c0_0 = arith.constant 0 : index
    %c0_1 = arith.constant 0 : index
    %0 = vector.load %arg1[%c0, %c0_0, %c0_1] : memref<4x200x75xbf16, #tpu.memory_space<vmem>>, vector<4x200x75xbf16>
    %1 = vector.shape_cast %0 : vector<4x200x75xbf16> to vector<800x75xbf16>
    %c0_2 = arith.constant 0 : index
    %c0_3 = arith.constant 0 : index
    %2 = vector.load %arg2[%c0_2, %c0_3] : memref<75x8xbf16, #tpu.memory_space<vmem>>, vector<75x8xbf16>
    %cst = arith.constant dense<0.000000e+00> : vector<800x8xf32>
    %3 = tpu.matmul %1, %2, %cst {dimension_numbers = #tpu.dot_dimension_numbers<[1], [0], [0], [1], [0, 0, 1, 1], [], []>} : vector<800x75xbf16>, vector<75x8xbf16>, vector<800x8xf32> -> vector<800x8xf32>
    %4 = vector.shape_cast %3 : vector<800x8xf32> to vector<4x200x8xf32>
    %5 = vector.extract_strided_slice %4 {offsets = [0, 0, 0], sizes = [1, 200, 8], strides = [1, 1, 1]} : vector<4x200x8xf32> to vector<1x200x8xf32>
    %6 = vector.shape_cast %5 : vector<1x200x8xf32> to vector<200x8xf32>
    %7 = vector.extract_strided_slice %4 {offsets = [1, 0, 0], sizes = [1, 200, 8], strides = [1, 1, 1]} : vector<4x200x8xf32> to vector<1x200x8xf32>
    %8 = vector.shape_cast %7 : vector<1x200x8xf32> to vector<200x8xf32>
    %9 = arith.maximumf %6, %8 : vector<200x8xf32>
    %10 = vector.extract_strided_slice %4 {offsets = [2, 0, 0], sizes = [1, 200, 8], strides = [1, 1, 1]} : vector<4x200x8xf32> to vector<1x200x8xf32>
    %11 = vector.shape_cast %10 : vector<1x200x8xf32> to vector<200x8xf32>
    %12 = vector.extract_strided_slice %4 {offsets = [3, 0, 0], sizes = [1, 200, 8], strides = [1, 1, 1]} : vector<4x200x8xf32> to vector<1x200x8xf32>
    %13 = vector.shape_cast %12 : vector<1x200x8xf32> to vector<200x8xf32>
    %14 = arith.maximumf %11, %13 : vector<200x8xf32>
    %15 = arith.maximumf %9, %14 : vector<200x8xf32>
    %c0_4 = arith.constant 0 : index
    %c0_5 = arith.constant 0 : index
    %16 = vector.load %arg3[%c0_4, %c0_5] : memref<1x8xf32, #tpu.memory_space<vmem>>, vector<1x8xf32>
    %17 = vector.broadcast %16 : vector<1x8xf32> to vector<200x8xf32>
    %18 = arith.addf %15, %17 : vector<200x8xf32>
    %cst_6 = arith.constant 0.000000e+00 : f32
    %19 = vector.broadcast %cst_6 : f32 to vector<200x8xf32>
    %20 = arith.maximumf %18, %19 : vector<200x8xf32>
    %21 = arith.truncf %20 : vector<200x8xf32> to vector<200x8xbf16>
    %c0_7 = arith.constant 0 : index
    %c0_8 = arith.constant 0 : index
    %22 = vector.load %arg4[%c0_7, %c0_8] : memref<200x8xbf16, #tpu.memory_space<vmem>>, vector<200x8xbf16>
    tpu.vector_store %arg4[%c0_7, %c0_8], %21 {strides = array<i32>} : memref<200x8xbf16, #tpu.memory_space<vmem>>, vector<200x8xbf16>,
    return
  }
  func.func @transform_0(%arg0: i32) -> (i32, i32, i32) {
    %c0_i32 = arith.constant 0 : i32
    %c0_i32_0 = arith.constant 0 : i32
    %c0_i32_1 = arith.constant 0 : i32
    return %c0_i32, %arg0, %c0_i32_0 : i32, i32, i32
  }
  func.func @transform_1(%arg0: i32) -> (i32, i32) {
    %c0_i32 = arith.constant 0 : i32
    %c0_i32_0 = arith.constant 0 : i32
    %c0_i32_1 = arith.constant 0 : i32
    return %c0_i32, %c0_i32_0 : i32, i32
  }
  func.func @transform_2(%arg0: i32) -> (i32, i32) {
    %c0_i32 = arith.constant 0 : i32
    %c0_i32_0 = arith.constant 0 : i32
    %c0_i32_1 = arith.constant 0 : i32
    return %c0_i32, %c0_i32_0 : i32, i32
  }
  func.func @transform_3(%arg0: i32) -> (i32, i32) {
    %c0_i32 = arith.constant 0 : i32
    %c0_i32_0 = arith.constant 0 : i32
    return %arg0, %c0_i32 : i32, i32
  }
}

module attributes {stable_mosaic.version = 11 : i64} {
  func.func @_conv2_pool_mlp_kernel(%arg0: i32, %arg1: memref<4x25x8x150xbf16, #tpu.memory_space<vmem>>, %arg2: memref<150x16xbf16, #tpu.memory_space<vmem>>, %arg3: memref<1x16xf32, #tpu.memory_space<vmem>>, %arg4: memref<25x16x128xbf16, #tpu.memory_space<vmem>>, %arg5: memref<1x128xf32, #tpu.memory_space<vmem>>, %arg6: memref<128x128xbf16, #tpu.memory_space<vmem>>, %arg7: memref<1x128xf32, #tpu.memory_space<vmem>>, %arg8: memref<128x16xbf16, #tpu.memory_space<vmem>>, %arg9: memref<1x16xf32, #tpu.memory_space<vmem>>, %arg10: memref<8x16xf32, #tpu.memory_space<vmem>>) attributes {dimension_semantics = [#tpu.dimension_semantics<parallel>], iteration_bounds = array<i64: 1>, scalar_prefetch = 0 : i64, scratch_operands = 0 : i64, tpu.core_type = #tpu.core_type<tc>, window_params = [{transform_indices = @transform_0, window_bounds = array<i64: 4, 25, 8, 150>}, {pipeline_mode = #tpu.pipeline_mode<synchronous>, transform_indices = @transform_1, window_bounds = array<i64: 150, 16>}, {pipeline_mode = #tpu.pipeline_mode<synchronous>, transform_indices = @transform_2, window_bounds = array<i64: 1, 16>}, {pipeline_mode = #tpu.pipeline_mode<synchronous>, transform_indices = @transform_3, window_bounds = array<i64: 25, 16, 128>}, {pipeline_mode = #tpu.pipeline_mode<synchronous>, transform_indices = @transform_4, window_bounds = array<i64: 1, 128>}, {pipeline_mode = #tpu.pipeline_mode<synchronous>, transform_indices = @transform_5, window_bounds = array<i64: 128, 128>}, {pipeline_mode = #tpu.pipeline_mode<synchronous>, transform_indices = @transform_6, window_bounds = array<i64: 1, 128>}, {pipeline_mode = #tpu.pipeline_mode<synchronous>, transform_indices = @transform_7, window_bounds = array<i64: 128, 16>}, {pipeline_mode = #tpu.pipeline_mode<synchronous>, transform_indices = @transform_8, window_bounds = array<i64: 1, 16>}, {transform_indices = @transform_9, window_bounds = array<i64: 8, 16>}]} {
    %c0 = arith.constant 0 : index
    %c0_0 = arith.constant 0 : index
    %c0_1 = arith.constant 0 : index
    %c0_2 = arith.constant 0 : index
    %0 = vector.load %arg1[%c0, %c0_0, %c0_1, %c0_2] : memref<4x25x8x150xbf16, #tpu.memory_space<vmem>>, vector<4x25x8x150xbf16>
    %1 = vector.shape_cast %0 : vector<4x25x8x150xbf16> to vector<800x150xbf16>
    %c0_3 = arith.constant 0 : index
    %c0_4 = arith.constant 0 : index
    %2 = vector.load %arg2[%c0_3, %c0_4] : memref<150x16xbf16, #tpu.memory_space<vmem>>, vector<150x16xbf16>
    %cst = arith.constant dense<0.000000e+00> : vector<800x16xf32>
    %3 = tpu.matmul %1, %2, %cst {dimension_numbers = #tpu.dot_dimension_numbers<[1], [0], [0], [1], [0, 0, 1, 1], [], []>} : vector<800x150xbf16>, vector<150x16xbf16>, vector<800x16xf32> -> vector<800x16xf32>
    %4 = vector.shape_cast %3 : vector<800x16xf32> to vector<4x200x16xf32>
    %5 = vector.extract_strided_slice %4 {offsets = [0, 0, 0], sizes = [1, 200, 16], strides = [1, 1, 1]} : vector<4x200x16xf32> to vector<1x200x16xf32>
    %6 = vector.shape_cast %5 : vector<1x200x16xf32> to vector<200x16xf32>
    %7 = vector.extract_strided_slice %4 {offsets = [1, 0, 0], sizes = [1, 200, 16], strides = [1, 1, 1]} : vector<4x200x16xf32> to vector<1x200x16xf32>
    %8 = vector.shape_cast %7 : vector<1x200x16xf32> to vector<200x16xf32>
    %9 = arith.maximumf %6, %8 : vector<200x16xf32>
    %10 = vector.extract_strided_slice %4 {offsets = [2, 0, 0], sizes = [1, 200, 16], strides = [1, 1, 1]} : vector<4x200x16xf32> to vector<1x200x16xf32>
    %11 = vector.shape_cast %10 : vector<1x200x16xf32> to vector<200x16xf32>
    %12 = vector.extract_strided_slice %4 {offsets = [3, 0, 0], sizes = [1, 200, 16], strides = [1, 1, 1]} : vector<4x200x16xf32> to vector<1x200x16xf32>
    %13 = vector.shape_cast %12 : vector<1x200x16xf32> to vector<200x16xf32>
    %14 = arith.maximumf %11, %13 : vector<200x16xf32>
    %15 = arith.maximumf %9, %14 : vector<200x16xf32>
    %c0_5 = arith.constant 0 : index
    %c0_6 = arith.constant 0 : index
    %16 = vector.load %arg3[%c0_5, %c0_6] : memref<1x16xf32, #tpu.memory_space<vmem>>, vector<1x16xf32>
    %17 = vector.broadcast %16 : vector<1x16xf32> to vector<200x16xf32>
    %18 = arith.addf %15, %17 : vector<200x16xf32>
    %cst_7 = arith.constant 0.000000e+00 : f32
    %19 = vector.broadcast %cst_7 : f32 to vector<200x16xf32>
    %20 = arith.maximumf %18, %19 : vector<200x16xf32>
    %21 = arith.truncf %20 : vector<200x16xf32> to vector<200x16xbf16>
    %22 = vector.shape_cast %21 : vector<200x16xbf16> to vector<25x8x16xbf16>
    %cst_8 = arith.constant 0.000000e+00 : f32
    %23 = vector.broadcast %cst_8 : f32 to vector<8x128xf32>
    %24 = vector.extract_strided_slice %22 {offsets = [0, 0, 0], sizes = [1, 8, 16], strides = [1, 1, 1]} : vector<25x8x16xbf16> to vector<1x8x16xbf16>
    %25 = vector.shape_cast %24 : vector<1x8x16xbf16> to vector<8x16xbf16>
    %c0_9 = arith.constant 0 : index
    %c0_10 = arith.constant 0 : index
    %c0_11 = arith.constant 0 : index
    %26 = vector.load %arg4[%c0_9, %c0_10, %c0_11] : memref<25x16x128xbf16, #tpu.memory_space<vmem>>, vector<1x16x128xbf16>
    %27 = vector.shape_cast %26 : vector<1x16x128xbf16> to vector<16x128xbf16>
    %cst_12 = arith.constant dense<0.000000e+00> : vector<8x128xf32>
    %28 = tpu.matmul %25, %27, %cst_12 {dimension_numbers = #tpu.dot_dimension_numbers<[1], [0], [0], [1], [0, 0, 1, 1], [], []>} : vector<8x16xbf16>, vector<16x128xbf16>, vector<8x128xf32> -> vector<8x128xf32>
    %29 = arith.addf %23, %28 : vector<8x128xf32>
    %30 = vector.extract_strided_slice %22 {offsets = [1, 0, 0], sizes = [1, 8, 16], strides = [1, 1, 1]} : vector<25x8x16xbf16> to vector<1x8x16xbf16>
    %31 = vector.shape_cast %30 : vector<1x8x16xbf16> to vector<8x16xbf16>
    %c1 = arith.constant 1 : index
    %c0_13 = arith.constant 0 : index
    %c0_14 = arith.constant 0 : index
    %32 = vector.load %arg4[%c1, %c0_13, %c0_14] : memref<25x16x128xbf16, #tpu.memory_space<vmem>>, vector<1x16x128xbf16>
    %33 = vector.shape_cast %32 : vector<1x16x128xbf16> to vector<16x128xbf16>
    %cst_15 = arith.constant dense<0.000000e+00> : vector<8x128xf32>
    %34 = tpu.matmul %31, %33, %cst_15 {dimension_numbers = #tpu.dot_dimension_numbers<[1], [0], [0], [1], [0, 0, 1, 1], [], []>} : vector<8x16xbf16>, vector<16x128xbf16>, vector<8x128xf32> -> vector<8x128xf32>
    %35 = arith.addf %29, %34 : vector<8x128xf32>
    %36 = vector.extract_strided_slice %22 {offsets = [2, 0, 0], sizes = [1, 8, 16], strides = [1, 1, 1]} : vector<25x8x16xbf16> to vector<1x8x16xbf16>
    %37 = vector.shape_cast %36 : vector<1x8x16xbf16> to vector<8x16xbf16>
    %c2 = arith.constant 2 : index
    %c0_16 = arith.constant 0 : index
    %c0_17 = arith.constant 0 : index
    %38 = vector.load %arg4[%c2, %c0_16, %c0_17] : memref<25x16x128xbf16, #tpu.memory_space<vmem>>, vector<1x16x128xbf16>
    %39 = vector.shape_cast %38 : vector<1x16x128xbf16> to vector<16x128xbf16>
    %cst_18 = arith.constant dense<0.000000e+00> : vector<8x128xf32>
    %40 = tpu.matmul %37, %39, %cst_18 {dimension_numbers = #tpu.dot_dimension_numbers<[1], [0], [0], [1], [0, 0, 1, 1], [], []>} : vector<8x16xbf16>, vector<16x128xbf16>, vector<8x128xf32> -> vector<8x128xf32>
    %41 = arith.addf %35, %40 : vector<8x128xf32>
    %42 = vector.extract_strided_slice %22 {offsets = [3, 0, 0], sizes = [1, 8, 16], strides = [1, 1, 1]} : vector<25x8x16xbf16> to vector<1x8x16xbf16>
    %43 = vector.shape_cast %42 : vector<1x8x16xbf16> to vector<8x16xbf16>
    %c3 = arith.constant 3 : index
    %c0_19 = arith.constant 0 : index
    %c0_20 = arith.constant 0 : index
    %44 = vector.load %arg4[%c3, %c0_19, %c0_20] : memref<25x16x128xbf16, #tpu.memory_space<vmem>>, vector<1x16x128xbf16>
    %45 = vector.shape_cast %44 : vector<1x16x128xbf16> to vector<16x128xbf16>
    %cst_21 = arith.constant dense<0.000000e+00> : vector<8x128xf32>
    %46 = tpu.matmul %43, %45, %cst_21 {dimension_numbers = #tpu.dot_dimension_numbers<[1], [0], [0], [1], [0, 0, 1, 1], [], []>} : vector<8x16xbf16>, vector<16x128xbf16>, vector<8x128xf32> -> vector<8x128xf32>
    %47 = arith.addf %41, %46 : vector<8x128xf32>
    %48 = vector.extract_strided_slice %22 {offsets = [4, 0, 0], sizes = [1, 8, 16], strides = [1, 1, 1]} : vector<25x8x16xbf16> to vector<1x8x16xbf16>
    %49 = vector.shape_cast %48 : vector<1x8x16xbf16> to vector<8x16xbf16>
    %c4 = arith.constant 4 : index
    %c0_22 = arith.constant 0 : index
    %c0_23 = arith.constant 0 : index
    %50 = vector.load %arg4[%c4, %c0_22, %c0_23] : memref<25x16x128xbf16, #tpu.memory_space<vmem>>, vector<1x16x128xbf16>
    %51 = vector.shape_cast %50 : vector<1x16x128xbf16> to vector<16x128xbf16>
    %cst_24 = arith.constant dense<0.000000e+00> : vector<8x128xf32>
    %52 = tpu.matmul %49, %51, %cst_24 {dimension_numbers = #tpu.dot_dimension_numbers<[1], [0], [0], [1], [0, 0, 1, 1], [], []>} : vector<8x16xbf16>, vector<16x128xbf16>, vector<8x128xf32> -> vector<8x128xf32>
    %53 = arith.addf %47, %52 : vector<8x128xf32>
    %54 = vector.extract_strided_slice %22 {offsets = [5, 0, 0], sizes = [1, 8, 16], strides = [1, 1, 1]} : vector<25x8x16xbf16> to vector<1x8x16xbf16>
    %55 = vector.shape_cast %54 : vector<1x8x16xbf16> to vector<8x16xbf16>
    %c5 = arith.constant 5 : index
    %c0_25 = arith.constant 0 : index
    %c0_26 = arith.constant 0 : index
    %56 = vector.load %arg4[%c5, %c0_25, %c0_26] : memref<25x16x128xbf16, #tpu.memory_space<vmem>>, vector<1x16x128xbf16>
    %57 = vector.shape_cast %56 : vector<1x16x128xbf16> to vector<16x128xbf16>
    %cst_27 = arith.constant dense<0.000000e+00> : vector<8x128xf32>
    %58 = tpu.matmul %55, %57, %cst_27 {dimension_numbers = #tpu.dot_dimension_numbers<[1], [0], [0], [1], [0, 0, 1, 1], [], []>} : vector<8x16xbf16>, vector<16x128xbf16>, vector<8x128xf32> -> vector<8x128xf32>
    %59 = arith.addf %53, %58 : vector<8x128xf32>
    %60 = vector.extract_strided_slice %22 {offsets = [6, 0, 0], sizes = [1, 8, 16], strides = [1, 1, 1]} : vector<25x8x16xbf16> to vector<1x8x16xbf16>
    %61 = vector.shape_cast %60 : vector<1x8x16xbf16> to vector<8x16xbf16>
    %c6 = arith.constant 6 : index
    %c0_28 = arith.constant 0 : index
    %c0_29 = arith.constant 0 : index
    %62 = vector.load %arg4[%c6, %c0_28, %c0_29] : memref<25x16x128xbf16, #tpu.memory_space<vmem>>, vector<1x16x128xbf16>
    %63 = vector.shape_cast %62 : vector<1x16x128xbf16> to vector<16x128xbf16>
    %cst_30 = arith.constant dense<0.000000e+00> : vector<8x128xf32>
    %64 = tpu.matmul %61, %63, %cst_30 {dimension_numbers = #tpu.dot_dimension_numbers<[1], [0], [0], [1], [0, 0, 1, 1], [], []>} : vector<8x16xbf16>, vector<16x128xbf16>, vector<8x128xf32> -> vector<8x128xf32>
    %65 = arith.addf %59, %64 : vector<8x128xf32>
    %66 = vector.extract_strided_slice %22 {offsets = [7, 0, 0], sizes = [1, 8, 16], strides = [1, 1, 1]} : vector<25x8x16xbf16> to vector<1x8x16xbf16>
    %67 = vector.shape_cast %66 : vector<1x8x16xbf16> to vector<8x16xbf16>
    %c7 = arith.constant 7 : index
    %c0_31 = arith.constant 0 : index
    %c0_32 = arith.constant 0 : index
    %68 = vector.load %arg4[%c7, %c0_31, %c0_32] : memref<25x16x128xbf16, #tpu.memory_space<vmem>>, vector<1x16x128xbf16>
    %69 = vector.shape_cast %68 : vector<1x16x128xbf16> to vector<16x128xbf16>
    %cst_33 = arith.constant dense<0.000000e+00> : vector<8x128xf32>
    %70 = tpu.matmul %67, %69, %cst_33 {dimension_numbers = #tpu.dot_dimension_numbers<[1], [0], [0], [1], [0, 0, 1, 1], [], []>} : vector<8x16xbf16>, vector<16x128xbf16>, vector<8x128xf32> -> vector<8x128xf32>
    %71 = arith.addf %65, %70 : vector<8x128xf32>
    %72 = vector.extract_strided_slice %22 {offsets = [8, 0, 0], sizes = [1, 8, 16], strides = [1, 1, 1]} : vector<25x8x16xbf16> to vector<1x8x16xbf16>
    %73 = vector.shape_cast %72 : vector<1x8x16xbf16> to vector<8x16xbf16>
    %c8 = arith.constant 8 : index
    %c0_34 = arith.constant 0 : index
    %c0_35 = arith.constant 0 : index
    %74 = vector.load %arg4[%c8, %c0_34, %c0_35] : memref<25x16x128xbf16, #tpu.memory_space<vmem>>, vector<1x16x128xbf16>
    %75 = vector.shape_cast %74 : vector<1x16x128xbf16> to vector<16x128xbf16>
    %cst_36 = arith.constant dense<0.000000e+00> : vector<8x128xf32>
    %76 = tpu.matmul %73, %75, %cst_36 {dimension_numbers = #tpu.dot_dimension_numbers<[1], [0], [0], [1], [0, 0, 1, 1], [], []>} : vector<8x16xbf16>, vector<16x128xbf16>, vector<8x128xf32> -> vector<8x128xf32>
    %77 = arith.addf %71, %76 : vector<8x128xf32>
    %78 = vector.extract_strided_slice %22 {offsets = [9, 0, 0], sizes = [1, 8, 16], strides = [1, 1, 1]} : vector<25x8x16xbf16> to vector<1x8x16xbf16>
    %79 = vector.shape_cast %78 : vector<1x8x16xbf16> to vector<8x16xbf16>
    %c9 = arith.constant 9 : index
    %c0_37 = arith.constant 0 : index
    %c0_38 = arith.constant 0 : index
    %80 = vector.load %arg4[%c9, %c0_37, %c0_38] : memref<25x16x128xbf16, #tpu.memory_space<vmem>>, vector<1x16x128xbf16>
    %81 = vector.shape_cast %80 : vector<1x16x128xbf16> to vector<16x128xbf16>
    %cst_39 = arith.constant dense<0.000000e+00> : vector<8x128xf32>
    %82 = tpu.matmul %79, %81, %cst_39 {dimension_numbers = #tpu.dot_dimension_numbers<[1], [0], [0], [1], [0, 0, 1, 1], [], []>} : vector<8x16xbf16>, vector<16x128xbf16>, vector<8x128xf32> -> vector<8x128xf32>
    %83 = arith.addf %77, %82 : vector<8x128xf32>
    %84 = vector.extract_strided_slice %22 {offsets = [10, 0, 0], sizes = [1, 8, 16], strides = [1, 1, 1]} : vector<25x8x16xbf16> to vector<1x8x16xbf16>
    %85 = vector.shape_cast %84 : vector<1x8x16xbf16> to vector<8x16xbf16>
    %c10 = arith.constant 10 : index
    %c0_40 = arith.constant 0 : index
    %c0_41 = arith.constant 0 : index
    %86 = vector.load %arg4[%c10, %c0_40, %c0_41] : memref<25x16x128xbf16, #tpu.memory_space<vmem>>, vector<1x16x128xbf16>
    %87 = vector.shape_cast %86 : vector<1x16x128xbf16> to vector<16x128xbf16>
    %cst_42 = arith.constant dense<0.000000e+00> : vector<8x128xf32>
    %88 = tpu.matmul %85, %87, %cst_42 {dimension_numbers = #tpu.dot_dimension_numbers<[1], [0], [0], [1], [0, 0, 1, 1], [], []>} : vector<8x16xbf16>, vector<16x128xbf16>, vector<8x128xf32> -> vector<8x128xf32>
    %89 = arith.addf %83, %88 : vector<8x128xf32>
    %90 = vector.extract_strided_slice %22 {offsets = [11, 0, 0], sizes = [1, 8, 16], strides = [1, 1, 1]} : vector<25x8x16xbf16> to vector<1x8x16xbf16>
    %91 = vector.shape_cast %90 : vector<1x8x16xbf16> to vector<8x16xbf16>
    %c11 = arith.constant 11 : index
    %c0_43 = arith.constant 0 : index
    %c0_44 = arith.constant 0 : index
    %92 = vector.load %arg4[%c11, %c0_43, %c0_44] : memref<25x16x128xbf16, #tpu.memory_space<vmem>>, vector<1x16x128xbf16>
    %93 = vector.shape_cast %92 : vector<1x16x128xbf16> to vector<16x128xbf16>
    %cst_45 = arith.constant dense<0.000000e+00> : vector<8x128xf32>
    %94 = tpu.matmul %91, %93, %cst_45 {dimension_numbers = #tpu.dot_dimension_numbers<[1], [0], [0], [1], [0, 0, 1, 1], [], []>} : vector<8x16xbf16>, vector<16x128xbf16>, vector<8x128xf32> -> vector<8x128xf32>
    %95 = arith.addf %89, %94 : vector<8x128xf32>
    %96 = vector.extract_strided_slice %22 {offsets = [12, 0, 0], sizes = [1, 8, 16], strides = [1, 1, 1]} : vector<25x8x16xbf16> to vector<1x8x16xbf16>
    %97 = vector.shape_cast %96 : vector<1x8x16xbf16> to vector<8x16xbf16>
    %c12 = arith.constant 12 : index
    %c0_46 = arith.constant 0 : index
    %c0_47 = arith.constant 0 : index
    %98 = vector.load %arg4[%c12, %c0_46, %c0_47] : memref<25x16x128xbf16, #tpu.memory_space<vmem>>, vector<1x16x128xbf16>
    %99 = vector.shape_cast %98 : vector<1x16x128xbf16> to vector<16x128xbf16>
    %cst_48 = arith.constant dense<0.000000e+00> : vector<8x128xf32>
    %100 = tpu.matmul %97, %99, %cst_48 {dimension_numbers = #tpu.dot_dimension_numbers<[1], [0], [0], [1], [0, 0, 1, 1], [], []>} : vector<8x16xbf16>, vector<16x128xbf16>, vector<8x128xf32> -> vector<8x128xf32>
    %101 = arith.addf %95, %100 : vector<8x128xf32>
    %102 = vector.extract_strided_slice %22 {offsets = [13, 0, 0], sizes = [1, 8, 16], strides = [1, 1, 1]} : vector<25x8x16xbf16> to vector<1x8x16xbf16>
    %103 = vector.shape_cast %102 : vector<1x8x16xbf16> to vector<8x16xbf16>
    %c13 = arith.constant 13 : index
    %c0_49 = arith.constant 0 : index
    %c0_50 = arith.constant 0 : index
    %104 = vector.load %arg4[%c13, %c0_49, %c0_50] : memref<25x16x128xbf16, #tpu.memory_space<vmem>>, vector<1x16x128xbf16>
    %105 = vector.shape_cast %104 : vector<1x16x128xbf16> to vector<16x128xbf16>
    %cst_51 = arith.constant dense<0.000000e+00> : vector<8x128xf32>
    %106 = tpu.matmul %103, %105, %cst_51 {dimension_numbers = #tpu.dot_dimension_numbers<[1], [0], [0], [1], [0, 0, 1, 1], [], []>} : vector<8x16xbf16>, vector<16x128xbf16>, vector<8x128xf32> -> vector<8x128xf32>
    %107 = arith.addf %101, %106 : vector<8x128xf32>
    %108 = vector.extract_strided_slice %22 {offsets = [14, 0, 0], sizes = [1, 8, 16], strides = [1, 1, 1]} : vector<25x8x16xbf16> to vector<1x8x16xbf16>
    %109 = vector.shape_cast %108 : vector<1x8x16xbf16> to vector<8x16xbf16>
    %c14 = arith.constant 14 : index
    %c0_52 = arith.constant 0 : index
    %c0_53 = arith.constant 0 : index
    %110 = vector.load %arg4[%c14, %c0_52, %c0_53] : memref<25x16x128xbf16, #tpu.memory_space<vmem>>, vector<1x16x128xbf16>
    %111 = vector.shape_cast %110 : vector<1x16x128xbf16> to vector<16x128xbf16>
    %cst_54 = arith.constant dense<0.000000e+00> : vector<8x128xf32>
    %112 = tpu.matmul %109, %111, %cst_54 {dimension_numbers = #tpu.dot_dimension_numbers<[1], [0], [0], [1], [0, 0, 1, 1], [], []>} : vector<8x16xbf16>, vector<16x128xbf16>, vector<8x128xf32> -> vector<8x128xf32>
    %113 = arith.addf %107, %112 : vector<8x128xf32>
    %114 = vector.extract_strided_slice %22 {offsets = [15, 0, 0], sizes = [1, 8, 16], strides = [1, 1, 1]} : vector<25x8x16xbf16> to vector<1x8x16xbf16>
    %115 = vector.shape_cast %114 : vector<1x8x16xbf16> to vector<8x16xbf16>
    %c15 = arith.constant 15 : index
    %c0_55 = arith.constant 0 : index
    %c0_56 = arith.constant 0 : index
    %116 = vector.load %arg4[%c15, %c0_55, %c0_56] : memref<25x16x128xbf16, #tpu.memory_space<vmem>>, vector<1x16x128xbf16>
    %117 = vector.shape_cast %116 : vector<1x16x128xbf16> to vector<16x128xbf16>
    %cst_57 = arith.constant dense<0.000000e+00> : vector<8x128xf32>
    %118 = tpu.matmul %115, %117, %cst_57 {dimension_numbers = #tpu.dot_dimension_numbers<[1], [0], [0], [1], [0, 0, 1, 1], [], []>} : vector<8x16xbf16>, vector<16x128xbf16>, vector<8x128xf32> -> vector<8x128xf32>
    %119 = arith.addf %113, %118 : vector<8x128xf32>
    %120 = vector.extract_strided_slice %22 {offsets = [16, 0, 0], sizes = [1, 8, 16], strides = [1, 1, 1]} : vector<25x8x16xbf16> to vector<1x8x16xbf16>
    %121 = vector.shape_cast %120 : vector<1x8x16xbf16> to vector<8x16xbf16>
    %c16 = arith.constant 16 : index
    %c0_58 = arith.constant 0 : index
    %c0_59 = arith.constant 0 : index
    %122 = vector.load %arg4[%c16, %c0_58, %c0_59] : memref<25x16x128xbf16, #tpu.memory_space<vmem>>, vector<1x16x128xbf16>
    %123 = vector.shape_cast %122 : vector<1x16x128xbf16> to vector<16x128xbf16>
    %cst_60 = arith.constant dense<0.000000e+00> : vector<8x128xf32>
    %124 = tpu.matmul %121, %123, %cst_60 {dimension_numbers = #tpu.dot_dimension_numbers<[1], [0], [0], [1], [0, 0, 1, 1], [], []>} : vector<8x16xbf16>, vector<16x128xbf16>, vector<8x128xf32> -> vector<8x128xf32>
    %125 = arith.addf %119, %124 : vector<8x128xf32>
    %126 = vector.extract_strided_slice %22 {offsets = [17, 0, 0], sizes = [1, 8, 16], strides = [1, 1, 1]} : vector<25x8x16xbf16> to vector<1x8x16xbf16>
    %127 = vector.shape_cast %126 : vector<1x8x16xbf16> to vector<8x16xbf16>
    %c17 = arith.constant 17 : index
    %c0_61 = arith.constant 0 : index
    %c0_62 = arith.constant 0 : index
    %128 = vector.load %arg4[%c17, %c0_61, %c0_62] : memref<25x16x128xbf16, #tpu.memory_space<vmem>>, vector<1x16x128xbf16>
    %129 = vector.shape_cast %128 : vector<1x16x128xbf16> to vector<16x128xbf16>
    %cst_63 = arith.constant dense<0.000000e+00> : vector<8x128xf32>
    %130 = tpu.matmul %127, %129, %cst_63 {dimension_numbers = #tpu.dot_dimension_numbers<[1], [0], [0], [1], [0, 0, 1, 1], [], []>} : vector<8x16xbf16>, vector<16x128xbf16>, vector<8x128xf32> -> vector<8x128xf32>
    %131 = arith.addf %125, %130 : vector<8x128xf32>
    %132 = vector.extract_strided_slice %22 {offsets = [18, 0, 0], sizes = [1, 8, 16], strides = [1, 1, 1]} : vector<25x8x16xbf16> to vector<1x8x16xbf16>
    %133 = vector.shape_cast %132 : vector<1x8x16xbf16> to vector<8x16xbf16>
    %c18 = arith.constant 18 : index
    %c0_64 = arith.constant 0 : index
    %c0_65 = arith.constant 0 : index
    %134 = vector.load %arg4[%c18, %c0_64, %c0_65] : memref<25x16x128xbf16, #tpu.memory_space<vmem>>, vector<1x16x128xbf16>
    %135 = vector.shape_cast %134 : vector<1x16x128xbf16> to vector<16x128xbf16>
    %cst_66 = arith.constant dense<0.000000e+00> : vector<8x128xf32>
    %136 = tpu.matmul %133, %135, %cst_66 {dimension_numbers = #tpu.dot_dimension_numbers<[1], [0], [0], [1], [0, 0, 1, 1], [], []>} : vector<8x16xbf16>, vector<16x128xbf16>, vector<8x128xf32> -> vector<8x128xf32>
    %137 = arith.addf %131, %136 : vector<8x128xf32>
    %138 = vector.extract_strided_slice %22 {offsets = [19, 0, 0], sizes = [1, 8, 16], strides = [1, 1, 1]} : vector<25x8x16xbf16> to vector<1x8x16xbf16>
    %139 = vector.shape_cast %138 : vector<1x8x16xbf16> to vector<8x16xbf16>
    %c19 = arith.constant 19 : index
    %c0_67 = arith.constant 0 : index
    %c0_68 = arith.constant 0 : index
    %140 = vector.load %arg4[%c19, %c0_67, %c0_68] : memref<25x16x128xbf16, #tpu.memory_space<vmem>>, vector<1x16x128xbf16>
    %141 = vector.shape_cast %140 : vector<1x16x128xbf16> to vector<16x128xbf16>
    %cst_69 = arith.constant dense<0.000000e+00> : vector<8x128xf32>
    %142 = tpu.matmul %139, %141, %cst_69 {dimension_numbers = #tpu.dot_dimension_numbers<[1], [0], [0], [1], [0, 0, 1, 1], [], []>} : vector<8x16xbf16>, vector<16x128xbf16>, vector<8x128xf32> -> vector<8x128xf32>
    %143 = arith.addf %137, %142 : vector<8x128xf32>
    %144 = vector.extract_strided_slice %22 {offsets = [20, 0, 0], sizes = [1, 8, 16], strides = [1, 1, 1]} : vector<25x8x16xbf16> to vector<1x8x16xbf16>
    %145 = vector.shape_cast %144 : vector<1x8x16xbf16> to vector<8x16xbf16>
    %c20 = arith.constant 20 : index
    %c0_70 = arith.constant 0 : index
    %c0_71 = arith.constant 0 : index
    %146 = vector.load %arg4[%c20, %c0_70, %c0_71] : memref<25x16x128xbf16, #tpu.memory_space<vmem>>, vector<1x16x128xbf16>
    %147 = vector.shape_cast %146 : vector<1x16x128xbf16> to vector<16x128xbf16>
    %cst_72 = arith.constant dense<0.000000e+00> : vector<8x128xf32>
    %148 = tpu.matmul %145, %147, %cst_72 {dimension_numbers = #tpu.dot_dimension_numbers<[1], [0], [0], [1], [0, 0, 1, 1], [], []>} : vector<8x16xbf16>, vector<16x128xbf16>, vector<8x128xf32> -> vector<8x128xf32>
    %149 = arith.addf %143, %148 : vector<8x128xf32>
    %150 = vector.extract_strided_slice %22 {offsets = [21, 0, 0], sizes = [1, 8, 16], strides = [1, 1, 1]} : vector<25x8x16xbf16> to vector<1x8x16xbf16>
    %151 = vector.shape_cast %150 : vector<1x8x16xbf16> to vector<8x16xbf16>
    %c21 = arith.constant 21 : index
    %c0_73 = arith.constant 0 : index
    %c0_74 = arith.constant 0 : index
    %152 = vector.load %arg4[%c21, %c0_73, %c0_74] : memref<25x16x128xbf16, #tpu.memory_space<vmem>>, vector<1x16x128xbf16>
    %153 = vector.shape_cast %152 : vector<1x16x128xbf16> to vector<16x128xbf16>
    %cst_75 = arith.constant dense<0.000000e+00> : vector<8x128xf32>
    %154 = tpu.matmul %151, %153, %cst_75 {dimension_numbers = #tpu.dot_dimension_numbers<[1], [0], [0], [1], [0, 0, 1, 1], [], []>} : vector<8x16xbf16>, vector<16x128xbf16>, vector<8x128xf32> -> vector<8x128xf32>
    %155 = arith.addf %149, %154 : vector<8x128xf32>
    %156 = vector.extract_strided_slice %22 {offsets = [22, 0, 0], sizes = [1, 8, 16], strides = [1, 1, 1]} : vector<25x8x16xbf16> to vector<1x8x16xbf16>
    %157 = vector.shape_cast %156 : vector<1x8x16xbf16> to vector<8x16xbf16>
    %c22 = arith.constant 22 : index
    %c0_76 = arith.constant 0 : index
    %c0_77 = arith.constant 0 : index
    %158 = vector.load %arg4[%c22, %c0_76, %c0_77] : memref<25x16x128xbf16, #tpu.memory_space<vmem>>, vector<1x16x128xbf16>
    %159 = vector.shape_cast %158 : vector<1x16x128xbf16> to vector<16x128xbf16>
    %cst_78 = arith.constant dense<0.000000e+00> : vector<8x128xf32>
    %160 = tpu.matmul %157, %159, %cst_78 {dimension_numbers = #tpu.dot_dimension_numbers<[1], [0], [0], [1], [0, 0, 1, 1], [], []>} : vector<8x16xbf16>, vector<16x128xbf16>, vector<8x128xf32> -> vector<8x128xf32>
    %161 = arith.addf %155, %160 : vector<8x128xf32>
    %162 = vector.extract_strided_slice %22 {offsets = [23, 0, 0], sizes = [1, 8, 16], strides = [1, 1, 1]} : vector<25x8x16xbf16> to vector<1x8x16xbf16>
    %163 = vector.shape_cast %162 : vector<1x8x16xbf16> to vector<8x16xbf16>
    %c23 = arith.constant 23 : index
    %c0_79 = arith.constant 0 : index
    %c0_80 = arith.constant 0 : index
    %164 = vector.load %arg4[%c23, %c0_79, %c0_80] : memref<25x16x128xbf16, #tpu.memory_space<vmem>>, vector<1x16x128xbf16>
    %165 = vector.shape_cast %164 : vector<1x16x128xbf16> to vector<16x128xbf16>
    %cst_81 = arith.constant dense<0.000000e+00> : vector<8x128xf32>
    %166 = tpu.matmul %163, %165, %cst_81 {dimension_numbers = #tpu.dot_dimension_numbers<[1], [0], [0], [1], [0, 0, 1, 1], [], []>} : vector<8x16xbf16>, vector<16x128xbf16>, vector<8x128xf32> -> vector<8x128xf32>
    %167 = arith.addf %161, %166 : vector<8x128xf32>
    %168 = vector.extract_strided_slice %22 {offsets = [24, 0, 0], sizes = [1, 8, 16], strides = [1, 1, 1]} : vector<25x8x16xbf16> to vector<1x8x16xbf16>
    %169 = vector.shape_cast %168 : vector<1x8x16xbf16> to vector<8x16xbf16>
    %c24 = arith.constant 24 : index
    %c0_82 = arith.constant 0 : index
    %c0_83 = arith.constant 0 : index
    %170 = vector.load %arg4[%c24, %c0_82, %c0_83] : memref<25x16x128xbf16, #tpu.memory_space<vmem>>, vector<1x16x128xbf16>
    %171 = vector.shape_cast %170 : vector<1x16x128xbf16> to vector<16x128xbf16>
    %cst_84 = arith.constant dense<0.000000e+00> : vector<8x128xf32>
    %172 = tpu.matmul %169, %171, %cst_84 {dimension_numbers = #tpu.dot_dimension_numbers<[1], [0], [0], [1], [0, 0, 1, 1], [], []>} : vector<8x16xbf16>, vector<16x128xbf16>, vector<8x128xf32> -> vector<8x128xf32>
    %173 = arith.addf %167, %172 : vector<8x128xf32>
    %c0_85 = arith.constant 0 : index
    %c0_86 = arith.constant 0 : index
    %174 = vector.load %arg5[%c0_85, %c0_86] : memref<1x128xf32, #tpu.memory_space<vmem>>, vector<1x128xf32>
    %175 = vector.broadcast %174 : vector<1x128xf32> to vector<8x128xf32>
    %176 = arith.addf %173, %175 : vector<8x128xf32>
    %cst_87 = arith.constant 0.000000e+00 : f32
    %177 = vector.broadcast %cst_87 : f32 to vector<8x128xf32>
    %178 = arith.maximumf %176, %177 : vector<8x128xf32>
    %179 = arith.truncf %178 : vector<8x128xf32> to vector<8x128xbf16>
    %c0_88 = arith.constant 0 : index
    %c0_89 = arith.constant 0 : index
    %180 = vector.load %arg6[%c0_88, %c0_89] : memref<128x128xbf16, #tpu.memory_space<vmem>>, vector<128x128xbf16>
    %cst_90 = arith.constant dense<0.000000e+00> : vector<8x128xf32>
    %181 = tpu.matmul %179, %180, %cst_90 {dimension_numbers = #tpu.dot_dimension_numbers<[1], [0], [0], [1], [0, 0, 1, 1], [], []>} : vector<8x128xbf16>, vector<128x128xbf16>, vector<8x128xf32> -> vector<8x128xf32>
    %c0_91 = arith.constant 0 : index
    %c0_92 = arith.constant 0 : index
    %182 = vector.load %arg7[%c0_91, %c0_92] : memref<1x128xf32, #tpu.memory_space<vmem>>, vector<1x128xf32>
    %183 = vector.broadcast %182 : vector<1x128xf32> to vector<8x128xf32>
    %184 = arith.addf %181, %183 : vector<8x128xf32>
    %cst_93 = arith.constant 0.000000e+00 : f32
    %185 = vector.broadcast %cst_93 : f32 to vector<8x128xf32>
    %186 = arith.maximumf %184, %185 : vector<8x128xf32>
    %187 = arith.truncf %186 : vector<8x128xf32> to vector<8x128xbf16>
    %c0_94 = arith.constant 0 : index
    %c0_95 = arith.constant 0 : index
    %188 = vector.load %arg8[%c0_94, %c0_95] : memref<128x16xbf16, #tpu.memory_space<vmem>>, vector<128x16xbf16>
    %cst_96 = arith.constant dense<0.000000e+00> : vector<8x16xf32>
    %189 = tpu.matmul %187, %188, %cst_96 {dimension_numbers = #tpu.dot_dimension_numbers<[1], [0], [0], [1], [0, 0, 1, 1], [], []>} : vector<8x128xbf16>, vector<128x16xbf16>, vector<8x16xf32> -> vector<8x16xf32>
    %c0_97 = arith.constant 0 : index
    %c0_98 = arith.constant 0 : index
    %190 = vector.load %arg9[%c0_97, %c0_98] : memref<1x16xf32, #tpu.memory_space<vmem>>, vector<1x16xf32>
    %191 = vector.broadcast %190 : vector<1x16xf32> to vector<8x16xf32>
    %192 = arith.addf %189, %191 : vector<8x16xf32>
    %cst_99 = arith.constant 0.000000e+00 : f32
    %193 = vector.broadcast %cst_99 : f32 to vector<8x16xf32>
    %194 = arith.maximumf %192, %193 : vector<8x16xf32>
    %c0_100 = arith.constant 0 : index
    %c0_101 = arith.constant 0 : index
    %195 = vector.load %arg10[%c0_100, %c0_101] : memref<8x16xf32, #tpu.memory_space<vmem>>, vector<8x16xf32>
    tpu.vector_store %arg10[%c0_100, %c0_101], %194 {strides = array<i32>} : memref<8x16xf32, #tpu.memory_space<vmem>>, vector<8x16xf32>,
    return
  }
  func.func @transform_0(%arg0: i32) -> (i32, i32, i32, i32) {
    %c0_i32 = arith.constant 0 : i32
    %c0_i32_0 = arith.constant 0 : i32
    %c0_i32_1 = arith.constant 0 : i32
    %c0_i32_2 = arith.constant 0 : i32
    return %c0_i32, %c0_i32_0, %arg0, %c0_i32_1 : i32, i32, i32, i32
  }
  func.func @transform_1(%arg0: i32) -> (i32, i32) {
    %c0_i32 = arith.constant 0 : i32
    %c0_i32_0 = arith.constant 0 : i32
    %c0_i32_1 = arith.constant 0 : i32
    return %c0_i32, %c0_i32_0 : i32, i32
  }
  func.func @transform_2(%arg0: i32) -> (i32, i32) {
    %c0_i32 = arith.constant 0 : i32
    %c0_i32_0 = arith.constant 0 : i32
    %c0_i32_1 = arith.constant 0 : i32
    return %c0_i32, %c0_i32_0 : i32, i32
  }
  func.func @transform_3(%arg0: i32) -> (i32, i32, i32) {
    %c0_i32 = arith.constant 0 : i32
    %c0_i32_0 = arith.constant 0 : i32
    %c0_i32_1 = arith.constant 0 : i32
    %c0_i32_2 = arith.constant 0 : i32
    return %c0_i32, %c0_i32_0, %c0_i32_1 : i32, i32, i32
  }
  func.func @transform_4(%arg0: i32) -> (i32, i32) {
    %c0_i32 = arith.constant 0 : i32
    %c0_i32_0 = arith.constant 0 : i32
    %c0_i32_1 = arith.constant 0 : i32
    return %c0_i32, %c0_i32_0 : i32, i32
  }
  func.func @transform_5(%arg0: i32) -> (i32, i32) {
    %c0_i32 = arith.constant 0 : i32
    %c0_i32_0 = arith.constant 0 : i32
    %c0_i32_1 = arith.constant 0 : i32
    return %c0_i32, %c0_i32_0 : i32, i32
  }
  func.func @transform_6(%arg0: i32) -> (i32, i32) {
    %c0_i32 = arith.constant 0 : i32
    %c0_i32_0 = arith.constant 0 : i32
    %c0_i32_1 = arith.constant 0 : i32
    return %c0_i32, %c0_i32_0 : i32, i32
  }
  func.func @transform_7(%arg0: i32) -> (i32, i32) {
    %c0_i32 = arith.constant 0 : i32
    %c0_i32_0 = arith.constant 0 : i32
    %c0_i32_1 = arith.constant 0 : i32
    return %c0_i32, %c0_i32_0 : i32, i32
  }
  func.func @transform_8(%arg0: i32) -> (i32, i32) {
    %c0_i32 = arith.constant 0 : i32
    %c0_i32_0 = arith.constant 0 : i32
    %c0_i32_1 = arith.constant 0 : i32
    return %c0_i32, %c0_i32_0 : i32, i32
  }
  func.func @transform_9(%arg0: i32) -> (i32, i32) {
    %c0_i32 = arith.constant 0 : i32
    %c0_i32_0 = arith.constant 0 : i32
    return %arg0, %c0_i32 : i32, i32
  }
}

</mosaic_0001>

<bundles_post_ra>
// kernel: lenet_forward.2
= control target key start
LH: loop header
LB: loop body
LE: loop exit
PB: predicated region body
PF: predicated region fallthrough
CT: control target
= control target key end

     0   :  { %s2381_s12 = smov 0   ;;  %s2383_s13 = smov 0   ;;  %s2902_s0 = inlined_call_operand.vmem [shape: bf16[4,400,75], index: 0, kind: input, shape index: {}]   ;;  %s2903_s1 = inlined_call_operand.vmem [shape: bf16[75,8], index: 1, kind: input, shape index: {}]   ;;  %s2904_s2 = inlined_call_operand.vmem [shape: f32[1,8], index: 2, kind: input, shape index: {}]   ;;  %s2905_s3 = inlined_call_operand.vmem [shape: bf16[400,8], index: 3, kind: output, shape index: {}]  }
   0x1   :  { %s2385_s14 = smov 0  }
   0x2 LB: > { %s1913_s15 = sadd.s32 4294967295, %s2358_s14   ;;  %s2398_s16 = sadd.s32 1, %s2358_s14   ;;  %s2358_s14 = sphi %s2385_s14, %s2918_s14   ;;  %s2354_s13 = sphi %s2383_s13, %s2917_s13   ;;  %s2350_s12 = sphi %s2381_s12, %s2916_s12  }
   0x3   : > { %s17_s17 = ssub.s32 %s2358_s14, %s2398_s16  ;;  %s20_s18 = sadd.s32 1, %s2354_s13 }
   0x4   : > { %p18_p0 = scmp.eq.s32.totalorder %s17_s17, 0  ;;  %p27_p1 = scmp.ne.s32.totalorder %s2354_s13, %s2350_s12 }
   0x5   : > { %p28_p2 = scmp.eq.s32.totalorder %s2358_s14, 0  ;;  %p1916_p4 = scmp.ge.s32.totalorder %s2358_s14, 2 }
   0x6   : > { %s2407_s19 = scalar_select %p18_p0, %s2354_s13, %s20_s18  }
   0x7   : > { %p29_p3 = por %p28_p2, %p27_p1  ;;  %127 = sbr.rel (%p1916_p4) target bundleno = 45 (0x2d), region = 24 }
   0xe   : > { %130 = sbr.rel (!%p29_p3) target bundleno = 45 (0x2d), region = 28  ;;  %s132_s20 = sand.u32 (%p29_p3), 1, %s2354_s13  }
   0xf   : > { %s2053_s21 = smul.u32 (%p29_p3), 100, %s2358_s14 }
  0x10   : > { %s2254_s22 = smul.u32 (%p29_p3), 400, %s132_s20 }
  0x11   : > { %s2415_s25 = scalar_lea.vmem (%p29_p3), %s2902_s0, %s2053_s21 }
  0x12   : > { %v153_v0 = vld [vmem:[%s2415_s25] sm:$0xff] (%p29_p3)   ;;  %v157_v1 = vld [vmem:[%s2415_s25 + $0x8] sm:$0xff] (%p29_p3)   ;;  %v161_v2 = vld [vmem:[%s2415_s25 + $0x10] sm:$0xff] (%p29_p3)   ;;  %s2420_s26 = scalar_lea.vmem (%p29_p3), [#allocation2], %s2254_s22 }
  0x13   : > { %154 = vst [vmem:[%s2420_s26] sm:$0xff] (%p29_p3), %v153_v0   ;;  %158 = vst [vmem:[%s2420_s26 + $0x8] sm:$0xff] (%p29_p3), %v157_v1   ;;  %v165_v3 = vld [vmem:[%s2415_s25 + $0x18] sm:$0xff] (%p29_p3)   ;;  %v169_v4 = vld [vmem:[%s2415_s25 + $0x20] sm:$0xff] (%p29_p3)  }
  0x14   : > { %162 = vst [vmem:[%s2420_s26 + $0x10] sm:$0xff] (%p29_p3), %v161_v2   ;;  %v173_v5 = vld [vmem:[%s2415_s25 + $0x28] sm:$0xff] (%p29_p3)   ;;  %166 = vst [vmem:[%s2420_s26 + $0x18] sm:$0xff] (%p29_p3), %v165_v3   ;;  %v177_v6 = vld [vmem:[%s2415_s25 + $0x30] sm:$0xff] (%p29_p3)  }
  0x15   : > { %170 = vst [vmem:[%s2420_s26 + $0x20] sm:$0xff] %v169_v4   ;;  %174 = vst [vmem:[%s2420_s26 + $0x28] sm:$0xff] %v173_v5   ;;  %v181_v7 = vld [vmem:[%s2415_s25 + $0x38] sm:$0xff]   ;;  %v185_v8 = vld [vmem:[%s2415_s25 + $0x40] sm:$0xff]  }
  0x16   : > { %178 = vst [vmem:[%s2420_s26 + $0x30] sm:$0xff] %v177_v6   ;;  %182 = vst [vmem:[%s2420_s26 + $0x38] sm:$0xff] %v181_v7   ;;  %v189_v9 = vld [vmem:[%s2415_s25 + $0x48] sm:$0xff]   ;;  %v193_v10 = vld [vmem:[%s2415_s25 + $0x50] sm:$0xff]  }
  0x17   : > { %186 = vst [vmem:[%s2420_s26 + $0x40] sm:$0xff] %v185_v8   ;;  %v197_v11 = vld [vmem:[%s2415_s25 + $0x58] sm:$0xff]   ;;  %190 = vst [vmem:[%s2420_s26 + $0x48] sm:$0xff] %v189_v9   ;;  %v201_v12 = vld [vmem:[%s2415_s25 + $0x60] sm:$0xf] }
  0x18   : > { %194 = vst [vmem:[%s2420_s26 + $0x50] sm:$0xff] %v193_v10   ;;  %198 = vst [vmem:[%s2420_s26 + $0x58] sm:$0xff] %v197_v11   ;;  %v203_v13 = vld [vmem:[%s2415_s25 + $0xc8] sm:$0xff]   ;;  %v207_v14 = vld [vmem:[%s2415_s25 + $0xd0] sm:$0xff]  }
  0x19   : > { %202 = vst [vmem:[%s2420_s26 + $0x60] sm:$0xf] %v201_v12  ;;  %204 = vst [vmem:[%s2420_s26 + $0x64] sm:$0xff] %v203_v13   ;;  %v211_v15 = vld [vmem:[%s2415_s25 + $0xd8] sm:$0xff]   ;;  %v215_v16 = vld [vmem:[%s2415_s25 + $0xe0] sm:$0xff]  }
  0x1a   : > { %208 = vst [vmem:[%s2420_s26 + $0x6c] sm:$0xff] %v207_v14   ;;  %v219_v17 = vld [vmem:[%s2415_s25 + $0xe8] sm:$0xff]   ;;  %212 = vst [vmem:[%s2420_s26 + $0x74] sm:$0xff] %v211_v15   ;;  %v223_v18 = vld [vmem:[%s2415_s25 + $0xf0] sm:$0xff]  }
  0x1b   : > { %216 = vst [vmem:[%s2420_s26 + $0x7c] sm:$0xff] %v215_v16   ;;  %220 = vst [vmem:[%s2420_s26 + $0x84] sm:$0xff] %v219_v17   ;;  %v227_v19 = vld [vmem:[%s2415_s25 + $0xf8] sm:$0xff]   ;;  %v231_v20 = vld [vmem:[%s2415_s25 + $0x100] sm:$0xff]  }
  0x1c   : > { %224 = vst [vmem:[%s2420_s26 + $0x8c] sm:$0xff] %v223_v18   ;;  %228 = vst [vmem:[%s2420_s26 + $0x94] sm:$0xff] %v227_v19   ;;  %v235_v21 = vld [vmem:[%s2415_s25 + $0x108] sm:$0xff]   ;;  %v239_v22 = vld [vmem:[%s2415_s25 + $0x110] sm:$0xff]  }
  0x1d   : > { %232 = vst [vmem:[%s2420_s26 + $0x9c] sm:$0xff] %v231_v20   ;;  %v243_v23 = vld [vmem:[%s2415_s25 + $0x118] sm:$0xff]   ;;  %236 = vst [vmem:[%s2420_s26 + $0xa4] sm:$0xff] %v235_v21   ;;  %v247_v24 = vld [vmem:[%s2415_s25 + $0x120] sm:$0xff]  }
  0x1e   : > { %240 = vst [vmem:[%s2420_s26 + $0xac] sm:$0xff] %v239_v22   ;;  %244 = vst [vmem:[%s2420_s26 + $0xb4] sm:$0xff] %v243_v23   ;;  %v251_v25 = vld [vmem:[%s2415_s25 + $0x128] sm:$0xf]  ;;  %v253_v26 = vld [vmem:[%s2415_s25 + $0x190] sm:$0xff]  }
  0x1f   : > { %248 = vst [vmem:[%s2420_s26 + $0xbc] sm:$0xff] %v247_v24   ;;  %252 = vst [vmem:[%s2420_s26 + $0xc4] sm:$0xf] %v251_v25  ;;  %v257_v27 = vld [vmem:[%s2415_s25 + $0x198] sm:$0xff]   ;;  %v261_v28 = vld [vmem:[%s2415_s25 + $0x1a0] sm:$0xff]  }
  0x20   : > { %254 = vst [vmem:[%s2420_s26 + $0xc8] sm:$0xff] %v253_v26   ;;  %v265_v29 = vld [vmem:[%s2415_s25 + $0x1a8] sm:$0xff]   ;;  %258 = vst [vmem:[%s2420_s26 + $0xd0] sm:$0xff] %v257_v27   ;;  %v269_v30 = vld [vmem:[%s2415_s25 + $0x1b0] sm:$0xff]  }
  0x21   : > { %262 = vst [vmem:[%s2420_s26 + $0xd8] sm:$0xff] %v261_v28   ;;  %266 = vst [vmem:[%s2420_s26 + $0xe0] sm:$0xff] %v265_v29   ;;  %v273_v31 = vld [vmem:[%s2415_s25 + $0x1b8] sm:$0xff]   ;;  %v277_v32 = vld [vmem:[%s2415_s25 + $0x1c0] sm:$0xff]  }
  0x22   : > { %270 = vst [vmem:[%s2420_s26 + $0xe8] sm:$0xff] %v269_v30   ;;  %274 = vst [vmem:[%s2420_s26 + $0xf0] sm:$0xff] %v273_v31   ;;  %v281_v33 = vld [vmem:[%s2415_s25 + $0x1c8] sm:$0xff]   ;;  %v285_v34 = vld [vmem:[%s2415_s25 + $0x1d0] sm:$0xff]  }
  0x23   : > { %278 = vst [vmem:[%s2420_s26 + $0xf8] sm:$0xff] %v277_v32   ;;  %v289_v35 = vld [vmem:[%s2415_s25 + $0x1d8] sm:$0xff]   ;;  %282 = vst [vmem:[%s2420_s26 + $0x100] sm:$0xff] %v281_v33   ;;  %v293_v36 = vld [vmem:[%s2415_s25 + $0x1e0] sm:$0xff]  }
  0x24   : > { %286 = vst [vmem:[%s2420_s26 + $0x108] sm:$0xff] %v285_v34   ;;  %290 = vst [vmem:[%s2420_s26 + $0x110] sm:$0xff] %v289_v35   ;;  %v297_v37 = vld [vmem:[%s2415_s25 + $0x1e8] sm:$0xff]   ;;  %v301_v38 = vld [vmem:[%s2415_s25 + $0x1f0] sm:$0xf] }
  0x25   : > { %294 = vst [vmem:[%s2420_s26 + $0x118] sm:$0xff] %v293_v36   ;;  %298 = vst [vmem:[%s2420_s26 + $0x120] sm:$0xff] %v297_v37   ;;  %v303_v39 = vld [vmem:[%s2415_s25 + $0x258] sm:$0xff]   ;;  %v307_v40 = vld [vmem:[%s2415_s25 + $0x260] sm:$0xff]  }
  0x26   : > { %302 = vst [vmem:[%s2420_s26 + $0x128] sm:$0xf] %v301_v38  ;;  %v311_v41 = vld [vmem:[%s2415_s25 + $0x268] sm:$0xff]   ;;  %304 = vst [vmem:[%s2420_s26 + $0x12c] sm:$0xff] %v303_v39   ;;  %v315_v42 = vld [vmem:[%s2415_s25 + $0x270] sm:$0xff]  }
  0x27   : > { %308 = vst [vmem:[%s2420_s26 + $0x134] sm:$0xff] %v307_v40   ;;  %312 = vst [vmem:[%s2420_s26 + $0x13c] sm:$0xff] %v311_v41   ;;  %v319_v43 = vld [vmem:[%s2415_s25 + $0x278] sm:$0xff]   ;;  %v323_v44 = vld [vmem:[%s2415_s25 + $0x280] sm:$0xff]  }
  0x28   : > { %316 = vst [vmem:[%s2420_s26 + $0x144] sm:$0xff] %v315_v42   ;;  %320 = vst [vmem:[%s2420_s26 + $0x14c] sm:$0xff] %v319_v43   ;;  %v327_v45 = vld [vmem:[%s2415_s25 + $0x288] sm:$0xff]   ;;  %v331_v46 = vld [vmem:[%s2415_s25 + $0x290] sm:$0xff]  }
  0x29   : > { %324 = vst [vmem:[%s2420_s26 + $0x154] sm:$0xff] %v323_v44   ;;  %v335_v47 = vld [vmem:[%s2415_s25 + $0x298] sm:$0xff]   ;;  %328 = vst [vmem:[%s2420_s26 + $0x15c] sm:$0xff] %v327_v45   ;;  %v339_v48 = vld [vmem:[%s2415_s25 + $0x2a0] sm:$0xff]  }
  0x2a   : > { %332 = vst [vmem:[%s2420_s26 + $0x164] sm:$0xff] %v331_v46   ;;  %336 = vst [vmem:[%s2420_s26 + $0x16c] sm:$0xff] %v335_v47   ;;  %v343_v49 = vld [vmem:[%s2415_s25 + $0x2a8] sm:$0xff]   ;;  %v347_v50 = vld [vmem:[%s2415_s25 + $0x2b0] sm:$0xff]  }
  0x2b   : > { %340 = vst [vmem:[%s2420_s26 + $0x174] sm:$0xff] %v339_v48   ;;  %344 = vst [vmem:[%s2420_s26 + $0x17c] sm:$0xff] %v343_v49   ;;  %v351_v51 = vld [vmem:[%s2415_s25 + $0x2b8] sm:$0xf] }
  0x2c   : > { %348 = vst [vmem:[%s2420_s26 + $0x184] sm:$0xff] %v347_v50   ;;  %352 = vst [vmem:[%s2420_s26 + $0x18c] sm:$0xf] %v351_v51 }
  0x2d PF: > { %p1918_p5 = scmp.ge.s32.totalorder %s2358_s14, 1  ;;  %p574_p6 = scmp.lt.s32.totalorder %s2358_s14, 3 }
  0x2f   : > { %p575_p7 = pnand %p1918_p5, %p574_p6 }
  0x31   : > { %578 = sbr.rel (%p575_p7) target bundleno = 399 (0x18f), region = 69 }
  0x38   : > { %v2281_v52 = vld [vmem:[%s2903_s1] sm:$0xff]   ;;  %v2282_v53 = vld [vmem:[%s2903_s1 + $0x8] sm:$0xff]   ;;  %vm1152_vm0 = vcmask 1044480   ;;  %v2283_v54 = vld [vmem:[%s2903_s1 + $0x10] sm:$0xff]   ;;  %s581_s6 = sand.u32 1, %s2350_s12   ;;  %vm1153_vm1 = vcmask 1045504  }
  0x39   : > { %2134 = vmatprep.subr.bf16.mxu0 %v2281_v52  ;;  %2244 = vmatprep.subr.bf16.mxu1 %v2281_v52  ;;  %v2360_v55 = vmov 65535   ;;  %s2255_s7 = smul.u32 400, %s581_s6  ;;  %v2284_v57 = vld [vmem:[%s2903_s1 + $0x18] sm:$0xff]   ;;  %v2285_v58 = vld [vmem:[%s2903_s1 + $0x20] sm:$0x3f]   ;;  %vm1001_vm2 = vcmask 613376  }
  0x3a   : > { %2135 = vmatpush3.bf16.msra.mxu0 %v2281_v52  ;;  %2249 = vmatpush3.bf16.msra.mxu1 %v2281_v52  ;;  %v1154_v56 = vsel %vm1152_vm0, 4294967295, %v2360_v55  ;;  %s605_s12 = smul.u32 25, %s1913_s15  ;;  %vm1825_vm3 = vcmask 60416  }
  0x3b   : > { %2136 = vmatprep.subr.bf16.mxu0 %v2282_v53  ;;  %2245 = vmatprep.subr.bf16.mxu1 %v2282_v53  ;;  %v1155_v59 = vsel %vm1153_vm1, %v1154_v56, 0  ;;  %s2541_s17 = scalar_lea.vmem [#allocation2], %s2255_s7 }
  0x3c   : > { %v2286_v60 = vld [vmem:[%s2541_s17] sm:$0xff]   ;;  %v2287_v61 = vld [vmem:[%s2541_s17 + $0xd0] sm:$0xff]   ;;  %v1157_v62 = vand.u32 %v2285_v58, %v1155_v59  ;;  %v2288_v63 = vld [vmem:[%s2541_s17 + $0x8] sm:$0xff]   ;;  %p606_p8 = scmp.lt.s32.totalorder %s605_s12, 49 }
  0x3d   : > { %2144 = vmatprep.mubr.msk.bf16.mxu0 %vm1001_vm2, %v2286_v60  ;;  %2196 = vmatprep.mubr.msk.bf16.mxu1 %vm1001_vm2, %v2287_v61  ;;  %v2289_v0 = vld [vmem:[%s2541_s17 + $0xd8] sm:$0xff]   ;;  %v2290_v1 = vld [vmem:[%s2541_s17 + $0x10] sm:$0xff]   ;;  %v2291_v2 = vld [vmem:[%s2541_s17 + $0xe0] sm:$0xff]  }
  0x3e   : > { %2137 = vmatpush3.bf16.msra.mxu0 %v2282_v53  ;;  %2250 = vmatpush3.bf16.msra.mxu1 %v2282_v53  ;;  %v2292_v3 = vld [vmem:[%s2541_s17 + $0x18] sm:$0xff]   ;;  %v2293_v4 = vld [vmem:[%s2541_s17 + $0xe8] sm:$0xff]   ;;  %v2294_v5 = vld [vmem:[%s2541_s17 + $0x20] sm:$0xff]   ;;  %s2920_s12 = smov (!%p606_p8, %s605_s12), 49 }
  0x3f   : > { %2138 = vmatprep.subr.bf16.mxu0 %v2283_v54  ;;  %2246 = vmatprep.subr.bf16.mxu1 %v2283_v54  ;;  %v2295_v6 = vld [vmem:[%s2541_s17 + $0xf0] sm:$0xff]   ;;  %v2296_v7 = vld [vmem:[%s2541_s17 + $0x28] sm:$0xff]   ;;  %v2297_v8 = vld [vmem:[%s2541_s17 + $0xf8] sm:$0xff]   ;;  %s1919_s18 = sshll.u32 %s2920_s12, 2 }
  0x40   : > { %v2298_v9 = vld [vmem:[%s2541_s17 + $0x30] sm:$0xff]   ;;  %v2299_v10 = vld [vmem:[%s2541_s17 + $0x100] sm:$0xff]   ;;  %v2300_v11 = vld [vmem:[%s2541_s17 + $0x38] sm:$0xff]   ;;  %s2770_s22 = scalar_lea.vmem %s2905_s3, %s1919_s18 }
  0x41   : > { %v2301_v12 = vld [vmem:[%s2541_s17 + $0x108] sm:$0xff]   ;;  %v2302_v13 = vld [vmem:[%s2541_s17 + $0x40] sm:$0xff]   ;;  %v2303_v14 = vld [vmem:[%s2541_s17 + $0x110] sm:$0xff]  }
  0x42   : > { %2139 = vmatpush3.bf16.msra.mxu0 %v2283_v54  ;;  %2251 = vmatpush3.bf16.msra.mxu1 %v2283_v54  ;;  %v2304_v15 = vld [vmem:[%s2541_s17 + $0x48] sm:$0xff]   ;;  %v2305_v16 = vld [vmem:[%s2541_s17 + $0x118] sm:$0xff]   ;;  %v2306_v17 = vld [vmem:[%s2541_s17 + $0x50] sm:$0xff]  }
  0x43   : > { %2140 = vmatprep.subr.bf16.mxu0 %v2284_v57  ;;  %2247 = vmatprep.subr.bf16.mxu1 %v2284_v57  ;;  %v2307_v18 = vld [vmem:[%s2541_s17 + $0x120] sm:$0xff]   ;;  %v2308_v19 = vld [vmem:[%s2541_s17 + $0x58] sm:$0xff]   ;;  %v2309_v20 = vld [vmem:[%s2541_s17 + $0x128] sm:$0xff]  }
  0x44   : > { %v2310_v21 = vld [vmem:[%s2541_s17 + $0x60] sm:$0xff]   ;;  %v2311_v22 = vld [vmem:[%s2541_s17 + $0x130] sm:$0xff]   ;;  %v2312_v23 = vld [vmem:[%s2541_s17 + $0x68] sm:$0xff]  }
  0x45   : > { %v2313_v24 = vld [vmem:[%s2541_s17 + $0x138] sm:$0xff]   ;;  %v2314_v25 = vld [vmem:[%s2541_s17 + $0x70] sm:$0xff]   ;;  %v2315_v26 = vld [vmem:[%s2541_s17 + $0x140] sm:$0xff]  }
  0x46   : > { %2141 = vmatpush3.bf16.msra.mxu0 %v2284_v57  ;;  %2252 = vmatpush3.bf16.msra.mxu1 %v2284_v57  ;;  %v2316_v27 = vld [vmem:[%s2541_s17 + $0x78] sm:$0xff]   ;;  %v2317_v28 = vld [vmem:[%s2541_s17 + $0x148] sm:$0xff]   ;;  %v2318_v29 = vld [vmem:[%s2541_s17 + $0x80] sm:$0xff]  }
  0x47   : > { %2142 = vmatprep.subr.bf16.mxu0 %v1157_v62  ;;  %2248 = vmatprep.subr.bf16.mxu1 %v1157_v62  ;;  %v2319_v30 = vld [vmem:[%s2541_s17 + $0x150] sm:$0xff]   ;;  %v2320_v31 = vld [vmem:[%s2541_s17 + $0x88] sm:$0xff]   ;;  %v2321_v32 = vld [vmem:[%s2541_s17 + $0x158] sm:$0xff]  }
  0x48   : > { %v2322_v33 = vld [vmem:[%s2541_s17 + $0x90] sm:$0xff]   ;;  %v2323_v34 = vld [vmem:[%s2541_s17 + $0x160] sm:$0xff]   ;;  %v2324_v35 = vld [vmem:[%s2541_s17 + $0x98] sm:$0xff]  }
  0x49   : > { %v2325_v36 = vld [vmem:[%s2541_s17 + $0x168] sm:$0xff]   ;;  %v2326_v37 = vld [vmem:[%s2541_s17 + $0xa0] sm:$0xff]   ;;  %v2327_v38 = vld [vmem:[%s2541_s17 + $0x170] sm:$0xff]  }
  0x4a   : > { %2143 = vmatpush3.bf16.msra.mxu0 %v1157_v62  ;;  %2253 = vmatpush3.bf16.msra.mxu1 %v1157_v62  ;;  %v2328_v39 = vld [vmem:[%s2541_s17 + $0xa8] sm:$0xff]   ;;  %v2329_v40 = vld [vmem:[%s2541_s17 + $0x178] sm:$0xff]   ;;  %v2330_v41 = vld [vmem:[%s2541_s17 + $0xb0] sm:$0xff]  }
  0x4b   : > { %v2331_v42 = vld [vmem:[%s2541_s17 + $0x180] sm:$0xff]   ;;  %v2332_v43 = vld [vmem:[%s2541_s17 + $0xb8] sm:$0xff]   ;;  %v2333_v44 = vld [vmem:[%s2541_s17 + $0x188] sm:$0xff]  }
  0x4c   : > { %v2334_v45 = vld [vmem:[%s2541_s17 + $0xc0] sm:$0xff]   ;;  %v2335_v46 = vld [vmem:[%s2541_s17 + $0xc8] sm:$0xff]  }
  0x4d   : > { %2145 = vmatmul.mubr.msk.bf16.vlgmr.msra.gmra.mrb[0].mxu0 %vm1001_vm2, %v2288_v63  ;;  %2197 = vmatmul.mubr.msk.bf16.vlgmr.msra.gmra.mrb[0].mxu1 %vm1001_vm2, %v2289_v0 }
  0x4e   : > { %2148 = vmatprep.mubr.msk.bf16.mxu0 %vm1001_vm2, %v2290_v1  ;;  %2200 = vmatprep.mubr.msk.bf16.mxu1 %vm1001_vm2, %v2291_v2 }
  0x55   : > { %2149 = vmatmul.mubr.msk.bf16.gmra.mrb[4].mxu0 %vm1001_vm2, %v2292_v3  ;;  %2201 = vmatmul.mubr.msk.bf16.gmra.mrb[4].mxu1 %vm1001_vm2, %v2293_v4 }
  0x56   : > { %2152 = vmatprep.mubr.msk.bf16.mxu0 %vm1001_vm2, %v2294_v5  ;;  %2204 = vmatprep.mubr.msk.bf16.mxu1 %vm1001_vm2, %v2295_v6 }
  0x5d   : > { %2153 = vmatmul.mubr.msk.bf16.gmra.mrb[8].mxu0 %vm1001_vm2, %v2296_v7  ;;  %2205 = vmatmul.mubr.msk.bf16.gmra.mrb[8].mxu1 %vm1001_vm2, %v2297_v8 }
  0x5e   : > { %2156 = vmatprep.mubr.msk.bf16.mxu0 %vm1001_vm2, %v2298_v9  ;;  %2208 = vmatprep.mubr.msk.bf16.mxu1 %vm1001_vm2, %v2299_v10 }
  0x65   : > { %2157 = vmatmul.mubr.msk.bf16.gmra.mrb[12].mxu0 %vm1001_vm2, %v2300_v11  ;;  %2209 = vmatmul.mubr.msk.bf16.gmra.mrb[12].mxu1 %vm1001_vm2, %v2301_v12 }
  0x66   : > { %2160 = vmatprep.mubr.msk.bf16.mxu0 %vm1001_vm2, %v2302_v13  ;;  %2212 = vmatprep.mubr.msk.bf16.mxu1 %vm1001_vm2, %v2303_v14 }
  0x6d   : > { %2161 = vmatmul.mubr.msk.bf16.gmra.mrb[16].mxu0 %vm1001_vm2, %v2304_v15  ;;  %2213 = vmatmul.mubr.msk.bf16.gmra.mrb[16].mxu1 %vm1001_vm2, %v2305_v16 }
  0x6e   : > { %2164 = vmatprep.mubr.msk.bf16.mxu0 %vm1001_vm2, %v2306_v17  ;;  %2216 = vmatprep.mubr.msk.bf16.mxu1 %vm1001_vm2, %v2307_v18 }
  0x75   : > { %2165 = vmatmul.mubr.msk.bf16.gmra.mrb[20].mxu0 %vm1001_vm2, %v2308_v19  ;;  %2217 = vmatmul.mubr.msk.bf16.gmra.mrb[20].mxu1 %vm1001_vm2, %v2309_v20 }
  0x76   : > { %2168 = vmatprep.mubr.msk.bf16.mxu0 %vm1001_vm2, %v2310_v21  ;;  %2220 = vmatprep.mubr.msk.bf16.mxu1 %vm1001_vm2, %v2311_v22 }
  0x7d   : > { %2169 = vmatmul.mubr.msk.bf16.gmra.mrb[24].mxu0 %vm1001_vm2, %v2312_v23  ;;  %2221 = vmatmul.mubr.msk.bf16.gmra.mrb[24].mxu1 %vm1001_vm2, %v2313_v24 }
  0x7e   : > { %2172 = vmatprep.mubr.msk.bf16.mxu0 %vm1001_vm2, %v2314_v25  ;;  %2224 = vmatprep.mubr.msk.bf16.mxu1 %vm1001_vm2, %v2315_v26 }
  0x85   : > { %2173 = vmatmul.mubr.msk.bf16.gmra.mrb[28].mxu0 %vm1001_vm2, %v2316_v27  ;;  %2225 = vmatmul.mubr.msk.bf16.gmra.mrb[28].mxu1 %vm1001_vm2, %v2317_v28 }
  0x86   : > { %2176 = vmatprep.mubr.msk.bf16.mxu0 %vm1001_vm2, %v2318_v29  ;;  %2228 = vmatprep.mubr.msk.bf16.mxu1 %vm1001_vm2, %v2319_v30 }
  0x8d   : > { %2177 = vmatmul.mubr.msk.bf16.gmra.mrb[32].mxu0 %vm1001_vm2, %v2320_v31  ;;  %2229 = vmatmul.mubr.msk.bf16.gmra.mrb[32].mxu1 %vm1001_vm2, %v2321_v32 }
  0x8e   : > { %2180 = vmatprep.mubr.msk.bf16.mxu0 %vm1001_vm2, %v2322_v33  ;;  %2232 = vmatprep.mubr.msk.bf16.mxu1 %vm1001_vm2, %v2323_v34 }
  0x95   : > { %2181 = vmatmul.mubr.msk.bf16.gmra.mrb[36].mxu0 %vm1001_vm2, %v2324_v35  ;;  %2233 = vmatmul.mubr.msk.bf16.gmra.mrb[36].mxu1 %vm1001_vm2, %v2325_v36 }
  0x96   : > { %2184 = vmatprep.mubr.msk.bf16.mxu0 %vm1001_vm2, %v2326_v37  ;;  %2236 = vmatprep.mubr.msk.bf16.mxu1 %vm1001_vm2, %v2327_v38 }
  0x9d   : > { %2185 = vmatmul.mubr.msk.bf16.gmra.mrb[40].mxu0 %vm1001_vm2, %v2328_v39  ;;  %2237 = vmatmul.mubr.msk.bf16.gmra.mrb[40].mxu1 %vm1001_vm2, %v2329_v40 }
  0x9e   : > { %2188 = vmatprep.mubr.msk.bf16.mxu0 %vm1001_vm2, %v2330_v41  ;;  %2240 = vmatprep.mubr.msk.bf16.mxu1 %vm1001_vm2, %v2331_v42 }
  0xa5   : > { %2189 = vmatmul.mubr.msk.bf16.gmra.mrb[44].mxu0 %vm1001_vm2, %v2332_v43  ;;  %2241 = vmatmul.mubr.msk.bf16.gmra.mrb[44].mxu1 %vm1001_vm2, %v2333_v44 }
  0xa6   : > { %2192 = vmatprep.mubr.msk.bf16.mxu0 %vm1001_vm2, %v2334_v45  ;;  %v2760_v45 = vld [vmem:[%s2904_s2] ss:$0 sm:$0xff] }
  0xad   : > { %2193 = vmatmul.mubr.msk.bf16.gmra.mrb[48].mxu0 %vm1001_vm2, %v2335_v46 }
 0x120   : > { %v2643_v47 = vpop.f32.mrb[0].mxu0  ;;  %v2645_v48 = vpop.f32.mrb[0].mxu1 }
 0x121   : > { %v2647_v49 = vpop.f32.mrb[1].mxu0  ;;  %v2649_v50 = vpop.f32.mrb[1].mxu1 }
 0x122   : > { %v2651_v51 = vpop.f32.mrb[2].mxu0  ;;  %v2653_v52 = vpop.f32.mrb[2].mxu1 }
 0x123   : > { %v2655_v53 = vpop.f32.mrb[3].mxu0  ;;  %v2657_v54 = vpop.f32.mrb[3].mxu1 }
 0x124   : > { %2908 = vst [vmem:[#allocation3_spill] sm:$0xff] %v2655_v53 }
 0x128   : > { %v2659_v55 = vpop.f32.mrb[4].mxu0  ;;  %v2661_v56 = vpop.f32.mrb[4].mxu1 }
 0x129   : > { %v2663_v57 = vpop.f32.mrb[5].mxu0  ;;  %v2665_v58 = vpop.f32.mrb[5].mxu1 }
 0x12a   : > { %v2667_v59 = vpop.f32.mrb[6].mxu0  ;;  %v2669_v60 = vpop.f32.mrb[6].mxu1 }
 0x12b   : > { %v2671_v61 = vpop.f32.mrb[7].mxu0  ;;  %v2673_v62 = vpop.f32.mrb[7].mxu1 }
 0x130   : > { %v2675_v63 = vpop.f32.mrb[8].mxu0  ;;  %v2677_v0 = vpop.f32.mrb[8].mxu1 }
 0x131   : > { %v2679_v1 = vpop.f32.mrb[9].mxu0  ;;  %v2681_v2 = vpop.f32.mrb[9].mxu1 }
 0x132   : > { %v2683_v3 = vpop.f32.mrb[10].mxu0  ;;  %v2685_v4 = vpop.f32.mrb[10].mxu1 }
 0x133   : > { %v2687_v5 = vpop.f32.mrb[11].mxu0  ;;  %v2689_v6 = vpop.f32.mrb[11].mxu1 }
 0x138   : > { %v2691_v7 = vpop.f32.mrb[12].mxu0  ;;  %v2693_v8 = vpop.f32.mrb[12].mxu1 }
 0x139   : > { %v2695_v9 = vpop.f32.mrb[13].mxu0  ;;  %v2697_v10 = vpop.f32.mrb[13].mxu1 }
 0x13a   : > { %v2699_v11 = vpop.f32.mrb[14].mxu0  ;;  %v2701_v12 = vpop.f32.mrb[14].mxu1 }
 0x13b   : > { %v2703_v13 = vpop.f32.mrb[15].mxu0  ;;  %v2705_v14 = vpop.f32.mrb[15].mxu1 }
 0x140   : > { %v2707_v15 = vpop.f32.mrb[16].mxu0  ;;  %v2709_v16 = vpop.f32.mrb[16].mxu1 }
 0x141   : > { %v2711_v17 = vpop.f32.mrb[17].mxu0  ;;  %v2713_v18 = vpop.f32.mrb[17].mxu1 }
 0x142   : > { %v2715_v19 = vpop.f32.mrb[18].mxu0  ;;  %v2717_v20 = vpop.f32.mrb[18].mxu1 }
 0x143   : > { %v2719_v21 = vpop.f32.mrb[19].mxu0  ;;  %v2721_v22 = vpop.f32.mrb[19].mxu1 }
 0x148   : > { %v2723_v23 = vpop.f32.mrb[20].mxu0  ;;  %v2725_v24 = vpop.f32.mrb[20].mxu1 }
 0x149   : > { %v2727_v25 = vpop.f32.mrb[21].mxu0  ;;  %v2729_v26 = vpop.f32.mrb[21].mxu1 }
 0x14a   : > { %v2731_v27 = vpop.f32.mrb[22].mxu0  ;;  %v2733_v28 = vpop.f32.mrb[22].mxu1 }
 0x14b   : > { %v2735_v29 = vpop.f32.mrb[23].mxu0  ;;  %v2737_v30 = vpop.f32.mrb[23].mxu1 }
 0x150   : > { %v2741_v31 = vpop.f32.mrb[24].mxu0  ;;  %v2222_v32 = vpop.f32.mrb[24].mxu1 }
 0x151   : > { %2909 = vst [vmem:[#allocation4_spill] sm:$0xff] %v2741_v31  ;;  %v1620_v34 = vmax.f32 %v2657_v54, %v2222_v32  ;;  %v2746_v35 = vpop.f32.mrb[25].mxu0  ;;  %v2748_v36 = vpop.f32.mrb[25].mxu1 }
 0x152   : > { %2910 = vst [vmem:[#allocation5_spill] sm:$0xff] %v2746_v35  ;;  %v2171_v37 = vpop.f32.mrb[26].mxu0  ;;  %v2223_v38 = vpop.f32.mrb[26].mxu1 }
 0x153   : > { %v1594_v39 = vmax.f32 %v2643_v47, %v2171_v37  ;;  %v1621_v40 = vmax.f32 %v2645_v48, %v2223_v38  ;;  %v2752_v41 = vpop.f32.mrb[27].mxu0  ;;  %v1500_v42 = vpop.f32.mrb[27].mxu1 }
 0x154   : > { %v1619_v44 = vmax.f32 %v2649_v50, %v1500_v42 }
 0x156   : > { %v1644_v46 = vmax.f32 %v1594_v39, %v1619_v44 }
 0x158   : > { %v1676_v47 = vadd.f32 %v2760_v45, %v1644_v46  ;;  %v2174_v54 = vpop.f32.mrb[28].mxu0  ;;  %v2226_v48 = vpop.f32.mrb[28].mxu1 }
 0x159   : > { %v1597_v32 = vmax.f32 %v2671_v61, %v2174_v54  ;;  %v1624_v37 = vmax.f32 %v2673_v62, %v2226_v48  ;;  %v1305_v38 = vpop.f32.mrb[29].mxu0  ;;  %v1513_v33 = vpop.f32.mrb[29].mxu1 }
 0x15a   : > { %v1701_v43 = vmax.f32 %v1676_v47, 0.0  ;;  %v1595_v50 = vmax.f32 %v2651_v51, %v1305_v38  ;;  %v1622_v42 = vmax.f32 %v2653_v52, %v1513_v33  ;;  %v2175_v31 = vpop.f32.mrb[30].mxu0  ;;  %v2227_v53 = vpop.f32.mrb[30].mxu1 }
 0x15b   : > { %v1598_v61 = vmax.f32 %v2659_v55, %v2175_v31  ;;  %v1625_v62 = vmax.f32 %v2661_v56, %v2227_v53  ;;  %v1308_v39 = vpop.f32.mrb[31].mxu0  ;;  %v1516_v44 = vpop.f32.mrb[31].mxu1 }
 0x15c   : > { %v2056_v46 = vpack.c.bf16 %v1701_v43, %v1701_v43  ;;  %v1645_v47 = vmax.f32 %v1595_v50, %v1620_v34  ;;  %v1647_v51 = vmax.f32 %v1597_v32, %v1622_v42  ;;  %v1596_v52 = vmax.f32 %v2663_v57, %v1308_v39 }
 0x15d   : > { %v1623_v33 = vmax.f32 %v2665_v58, %v1516_v44 }
 0x15e   : > { %1828 = vst.msk [vmem:[%s2770_s22 + $0x8] sm:$0xf] %vm1825_vm3, %v2056_v46  ;;  %v1677_v54 = vadd.f32 %v2760_v45, %v1645_v47  ;;  %v1679_v48 = vadd.f32 %v2760_v45, %v1647_v51  ;;  %v1646_v38 = vmax.f32 %v1596_v52, %v1621_v40 }
 0x15f   : > { %v1648_v35 = vmax.f32 %v1598_v61, %v1623_v33 }
 0x160   : > { %v1702_v55 = vmax.f32 %v1677_v54, 0.0  ;;  %v1704_v31 = vmax.f32 %v1679_v48, 0.0  ;;  %v1678_v53 = vadd.f32 %v2760_v45, %v1646_v38  ;;  %v2178_v56 = vpop.f32.mrb[32].mxu0  ;;  %v2230_v43 = vpop.f32.mrb[32].mxu1 }
 0x161   : > { %v1680_v34 = vadd.f32 %v2760_v45, %v1648_v35  ;;  %v1601_v57 = vmax.f32 %v2687_v5, %v2178_v56  ;;  %v1628_v58 = vmax.f32 %v2689_v6, %v2230_v43  ;;  %v1321_v32 = vpop.f32.mrb[33].mxu0  ;;  %v1529_v50 = vpop.f32.mrb[33].mxu1 }
 0x162   : > { %v2057_v42 = vpack.c.bf16 %v1702_v55, %v1702_v55  ;;  %v2059_v39 = vpack.c.bf16 %v1704_v31, %v1704_v31  ;;  %v1703_v40 = vmax.f32 %v1678_v53, 0.0  ;;  %v1599_v61 = vmax.f32 %v2667_v59, %v1321_v32  ;;  %v2179_v44 = vpop.f32.mrb[34].mxu0  ;;  %v2231_v46 = vpop.f32.mrb[34].mxu1 }
 0x163   : > { %v1705_v47 = vmax.f32 %v1680_v34, 0.0  ;;  %v1626_v51 = vmax.f32 %v2669_v60, %v1529_v50  ;;  %v1602_v35 = vmax.f32 %v2675_v63, %v2179_v44  ;;  %v1629_v5 = vmax.f32 %v2677_v0, %v2231_v46  ;;  %v1324_v6 = vpop.f32.mrb[35].mxu0  ;;  %v1532_v52 = vpop.f32.mrb[35].mxu1 }
 0x164   : > { %1829 = vst.msk [vmem:[%s2770_s22 + $0xc] sm:$0xf] %vm1825_vm3, %v2057_v42  ;;  %1831 = vst.msk [vmem:[%s2770_s22 + $0x14] sm:$0xf] %vm1825_vm3, %v2059_v39  ;;  %v2058_v33 = vpack.c.bf16 %v1703_v40, %v1703_v40  ;;  %v1649_v54 = vmax.f32 %v1599_v61, %v1624_v37  ;;  %v1600_v59 = vmax.f32 %v2679_v1, %v1324_v6 }
 0x165   : > { %v1627_v48 = vmax.f32 %v2681_v2, %v1532_v52  ;;  %v2060_v38 = vpack.c.bf16 %v1705_v47, %v1705_v47  ;;  %v1651_v55 = vmax.f32 %v1601_v57, %v1626_v51 }
 0x166   : > { %1830 = vst.msk [vmem:[%s2770_s22 + $0x10] sm:$0xf] %vm1825_vm3, %v2058_v33  ;;  %v1681_v60 = vadd.f32 %v2760_v45, %v1649_v54  ;;  %v1650_v63 = vmax.f32 %v1600_v59, %v1625_v62 }
 0x167   : > { %v1652_v0 = vmax.f32 %v1602_v35, %v1627_v48  ;;  %1832 = vst.msk [vmem:[%s2770_s22 + $0x18] sm:$0xf] %vm1825_vm3, %v2060_v38  ;;  %v1683_v31 = vadd.f32 %v2760_v45, %v1651_v55 }
 0x168   : > { %v1706_v53 = vmax.f32 %v1681_v60, 0.0  ;;  %v1682_v56 = vadd.f32 %v2760_v45, %v1650_v63  ;;  %v2182_v1 = vpop.f32.mrb[36].mxu0  ;;  %v2234_v43 = vpop.f32.mrb[36].mxu1 }
 0x169   : > { %v1684_v37 = vadd.f32 %v2760_v45, %v1652_v0  ;;  %v1708_v2 = vmax.f32 %v1683_v31, 0.0  ;;  %v1605_v34 = vmax.f32 %v2703_v13, %v2182_v1  ;;  %v1632_v57 = vmax.f32 %v2705_v14, %v2234_v43  ;;  %v1337_v32 = vpop.f32.mrb[37].mxu0  ;;  %v1545_v62 = vpop.f32.mrb[37].mxu1 }
 0x16a   : > { %v2061_v50 = vpack.c.bf16 %v1706_v53, %v1706_v53  ;;  %v1707_v42 = vmax.f32 %v1682_v56, 0.0  ;;  %v1603_v40 = vmax.f32 %v2683_v3, %v1337_v32  ;;  %v2183_v61 = vpop.f32.mrb[38].mxu0  ;;  %v2235_v44 = vpop.f32.mrb[38].mxu1  ;;  %v1630_v47 = vmax.f32 %v2685_v4, %v1545_v62 }
 0x16b   : > { %v1709_v39 = vmax.f32 %v1684_v37, 0.0  ;;  %v2063_v46 = vpack.c.bf16 %v1708_v2, %v1708_v2  ;;  %v1606_v13 = vmax.f32 %v2691_v7, %v2183_v61  ;;  %v1633_v51 = vmax.f32 %v2693_v8, %v2235_v44  ;;  %v1340_v14 = vpop.f32.mrb[39].mxu0  ;;  %v1548_v35 = vpop.f32.mrb[39].mxu1 }
 0x16c   : > { %1833 = vst.msk [vmem:[%s2770_s22 + $0x1c] sm:$0xf] %vm1825_vm3, %v2061_v50  ;;  %v2062_v6 = vpack.c.bf16 %v1707_v42, %v1707_v42  ;;  %v1653_v33 = vmax.f32 %v1603_v40, %v1628_v58  ;;  %v1604_v3 = vmax.f32 %v2695_v9, %v1340_v14  ;;  %v1655_v54 = vmax.f32 %v1605_v34, %v1630_v47 }
 0x16d   : > { %v2064_v52 = vpack.c.bf16 %v1709_v39, %v1709_v39  ;;  %1835 = vst.msk [vmem:[%s2770_s22 + $0x24] sm:$0xf] %vm1825_vm3, %v2063_v46  ;;  %v1631_v59 = vmax.f32 %v2697_v10, %v1548_v35 }
 0x16e   : > { %1834 = vst.msk [vmem:[%s2770_s22 + $0x20] sm:$0xf] %vm1825_vm3, %v2062_v6  ;;  %v1685_v4 = vadd.f32 %v2760_v45, %v1653_v33  ;;  %v1654_v7 = vmax.f32 %v1604_v3, %v1629_v5  ;;  %v1687_v8 = vadd.f32 %v2760_v45, %v1655_v54 }
 0x16f   : > { %1836 = vst.msk [vmem:[%s2770_s22 + $0x28] sm:$0xf] %vm1825_vm3, %v2064_v52  ;;  %v1656_v48 = vmax.f32 %v1606_v13, %v1631_v59 }
 0x170   : > { %v1710_v38 = vmax.f32 %v1685_v4, 0.0  ;;  %v1686_v58 = vadd.f32 %v2760_v45, %v1654_v7  ;;  %v2186_v55 = vpop.f32.mrb[40].mxu0  ;;  %v2238_v9 = vpop.f32.mrb[40].mxu1  ;;  %v1712_v60 = vmax.f32 %v1687_v8, 0.0 }
 0x171   : > { %v1688_v63 = vadd.f32 %v2760_v45, %v1656_v48  ;;  %v1609_v10 = vmax.f32 %v2719_v21, %v2186_v55  ;;  %v1636_v0 = vmax.f32 %v2721_v22, %v2238_v9  ;;  %v1353_v31 = vpop.f32.mrb[41].mxu0  ;;  %v1561_v53 = vpop.f32.mrb[41].mxu1 }
 0x172   : > { %v2065_v56 = vpack.c.bf16 %v1710_v38, %v1710_v38  ;;  %v1711_v5 = vmax.f32 %v1686_v58, 0.0  ;;  %v1607_v37 = vmax.f32 %v2699_v11, %v1353_v31  ;;  %v1634_v1 = vmax.f32 %v2701_v12, %v1561_v53  ;;  %v2187_v43 = vpop.f32.mrb[42].mxu0  ;;  %v2239_v2 = vpop.f32.mrb[42].mxu1 }
 0x173   : > { %v2067_v34 = vpack.c.bf16 %v1712_v60, %v1712_v60  ;;  %v1713_v32 = vmax.f32 %v1688_v63, 0.0  ;;  %v1610_v62 = vmax.f32 %v2707_v15, %v2187_v43  ;;  %v1637_v21 = vmax.f32 %v2709_v16, %v2239_v2  ;;  %v1356_v22 = vpop.f32.mrb[43].mxu0  ;;  %v1564_v50 = vpop.f32.mrb[43].mxu1 }
 0x174   : > { %1837 = vst.msk [vmem:[%s2770_s22 + $0x2c] sm:$0xf] %vm1825_vm3, %v2065_v56  ;;  %v2066_v42 = vpack.c.bf16 %v1711_v5, %v1711_v5  ;;  %v1657_v39 = vmax.f32 %v1607_v37, %v1632_v57  ;;  %v1659_v40 = vmax.f32 %v1609_v10, %v1634_v1  ;;  %v1608_v11 = vmax.f32 %v2711_v17, %v1356_v22 }
 0x175   : > { %1839 = vst.msk [vmem:[%s2770_s22 + $0x34] sm:$0xf] %vm1825_vm3, %v2067_v34  ;;  %v2068_v12 = vpack.c.bf16 %v1713_v32, %v1713_v32  ;;  %v1635_v61 = vmax.f32 %v2713_v18, %v1564_v50 }
 0x176   : > { %1838 = vst.msk [vmem:[%s2770_s22 + $0x30] sm:$0xf] %vm1825_vm3, %v2066_v42  ;;  %v1689_v15 = vadd.f32 %v2760_v45, %v1657_v39  ;;  %v1691_v16 = vadd.f32 %v2760_v45, %v1659_v40  ;;  %v1658_v44 = vmax.f32 %v1608_v11, %v1633_v51  ;;  %v2912_v11 = vld [vmem:[#allocation5_spill] sm:$0xff] }
 0x177   : > { %1840 = vst.msk [vmem:[%s2770_s22 + $0x38] sm:$0xf] %vm1825_vm3, %v2068_v12  ;;  %v1660_v46 = vmax.f32 %v1610_v62, %v1635_v61  ;;  %v2913_v61 = vld [vmem:[#allocation3_spill] sm:$0xff] }
 0x178   : > { %v1714_v47 = vmax.f32 %v1689_v15, 0.0  ;;  %v1716_v57 = vmax.f32 %v1691_v16, 0.0  ;;  %v1690_v13 = vadd.f32 %v2760_v45, %v1658_v44  ;;  %v2190_v17 = vpop.f32.mrb[44].mxu0  ;;  %v2242_v14 = vpop.f32.mrb[44].mxu1  ;;  %v2914_v15 = vld [vmem:[#allocation4_spill] sm:$0xff] }
 0x179   : > { %v1692_v35 = vadd.f32 %v2760_v45, %v1660_v46  ;;  %v1613_v18 = vmax.f32 %v2735_v29, %v2190_v17  ;;  %v1640_v6 = vmax.f32 %v2737_v30, %v2242_v14  ;;  %v1369_v52 = vpop.f32.mrb[45].mxu0  ;;  %v1577_v33 = vpop.f32.mrb[45].mxu1  ;;  %v2915_v16 = vmax.f32 %v2913_v61, %v2914_v15 }
 0x17a   : > { %v2069_v51 = vpack.c.bf16 %v1714_v47, %v1714_v47  ;;  %v2071_v3 = vpack.c.bf16 %v1716_v57, %v1716_v57  ;;  %v1715_v54 = vmax.f32 %v1690_v13, 0.0  ;;  %v1611_v59 = vmax.f32 %v2715_v19, %v1369_v52  ;;  %v2191_v4 = vpop.f32.mrb[46].mxu0  ;;  %v2243_v7 = vpop.f32.mrb[46].mxu1 }
 0x17b   : > { %v1717_v8 = vmax.f32 %v1692_v35, 0.0  ;;  %v1638_v48 = vmax.f32 %v2717_v20, %v1577_v33  ;;  %v1614_v38 = vmax.f32 %v2723_v23, %v2191_v4  ;;  %v1641_v29 = vmax.f32 %v2725_v24, %v2243_v7  ;;  %v1372_v30 = vpop.f32.mrb[47].mxu0  ;;  %v1580_v58 = vpop.f32.mrb[47].mxu1 }
 0x17c   : > { %1841 = vst.msk [vmem:[%s2770_s22 + $0x3c] sm:$0xf] %vm1825_vm3, %v2069_v51  ;;  %1843 = vst.msk [vmem:[%s2770_s22 + $0x44] sm:$0xf] %vm1825_vm3, %v2071_v3  ;;  %v2070_v55 = vpack.c.bf16 %v1715_v54, %v1715_v54  ;;  %v1661_v9 = vmax.f32 %v1611_v59, %v1636_v0  ;;  %v1612_v19 = vmax.f32 %v2727_v25, %v1372_v30 }
 0x17d   : > { %v1639_v60 = vmax.f32 %v2729_v26, %v1580_v58  ;;  %v2072_v63 = vpack.c.bf16 %v1717_v8, %v1717_v8  ;;  %v1663_v10 = vmax.f32 %v1613_v18, %v1638_v48 }
 0x17e   : > { %1842 = vst.msk [vmem:[%s2770_s22 + $0x40] sm:$0xf] %vm1825_vm3, %v2070_v55  ;;  %v1693_v20 = vadd.f32 %v2760_v45, %v1661_v9  ;;  %v1662_v23 = vmax.f32 %v1612_v19, %v1637_v21  ;;  %v2911_v21 = vmax.f32 %v2647_v49, %v2752_v41 }
 0x17f   : > { %v1664_v24 = vmax.f32 %v1614_v38, %v1639_v60  ;;  %1844 = vst.msk [vmem:[%s2770_s22 + $0x48] sm:$0xf] %vm1825_vm3, %v2072_v63  ;;  %v1695_v31 = vadd.f32 %v2760_v45, %v1663_v10 }
 0x180   : > { %v1718_v53 = vmax.f32 %v1693_v20, 0.0  ;;  %v1694_v0 = vadd.f32 %v2760_v45, %v1662_v23  ;;  %v2194_v56 = vpop.f32.mrb[48].mxu0 }
 0x181   : > { %v1696_v25 = vadd.f32 %v2760_v45, %v1664_v24  ;;  %v1720_v26 = vmax.f32 %v1695_v31, 0.0  ;;  %v1617_v5 = vmax.f32 %v2194_v56, %v2733_v28  ;;  %v1385_v37 = vpop.f32.mrb[49].mxu0 }
 0x182   : > { %v2073_v1 = vpack.c.bf16 %v1718_v53, %v1718_v53  ;;  %v1719_v43 = vmax.f32 %v1694_v0, 0.0  ;;  %v1615_v34 = vmax.f32 %v2731_v27, %v1385_v37  ;;  %v2195_v32 = vpop.f32.mrb[50].mxu0 }
 0x183   : > { %v1721_v2 = vmax.f32 %v1696_v25, 0.0  ;;  %v2075_v62 = vpack.c.bf16 %v1720_v26, %v1720_v26  ;;  %v1642_v22 = vmax.f32 %v2911_v21, %v1617_v5  ;;  %v1618_v50 = vmax.f32 %v2195_v32, %v2748_v36  ;;  %v1388_v42 = vpop.f32.mrb[51].mxu0 }
 0x184   : > { %1845 = vst.msk [vmem:[%s2770_s22 + $0x4c] sm:$0xf] %vm1825_vm3, %v2073_v1  ;;  %v2074_v28 = vpack.c.bf16 %v1719_v43, %v1719_v43  ;;  %v1665_v40 = vmax.f32 %v1615_v34, %v1640_v6  ;;  %v1616_v12 = vmax.f32 %v2912_v11, %v1388_v42 }
 0x185   : > { %v2076_v39 = vpack.c.bf16 %v1721_v2, %v1721_v2  ;;  %1847 = vst.msk [vmem:[%s2770_s22 + $0x54] sm:$0xf] %vm1825_vm3, %v2075_v62  ;;  %v1674_v27 = vadd.f32 %v2760_v45, %v1642_v22  ;;  %v1643_v49 = vmax.f32 %v2915_v16, %v1618_v50 }
 0x186   : > { %1846 = vst.msk [vmem:[%s2770_s22 + $0x50] sm:$0xf] %vm1825_vm3, %v2074_v28  ;;  %v1697_v36 = vadd.f32 %v2760_v45, %v1665_v40  ;;  %v1666_v41 = vmax.f32 %v1616_v12, %v1641_v29 }
 0x187   : > { %1848 = vst.msk [vmem:[%s2770_s22 + $0x58] sm:$0xf] %vm1825_vm3, %v2076_v39  ;;  %v1699_v44 = vmax.f32 %v1674_v27, 0.0  ;;  %v1675_v46 = vadd.f32 %v2760_v45, %v1643_v49 }
 0x188   : > { %v1722_v47 = vmax.f32 %v1697_v36, 0.0  ;;  %v1698_v57 = vadd.f32 %v2760_v45, %v1666_v41 }
 0x189   : > { %v2054_v13 = vpack.c.bf16 %v1699_v44, %v1699_v44  ;;  %v1700_v17 = vmax.f32 %v1675_v46, 0.0 }
 0x18a   : > { %v2077_v14 = vpack.c.bf16 %v1722_v47, %v1722_v47  ;;  %v1723_v35 = vmax.f32 %v1698_v57, 0.0 }
 0x18b   : > { %1826 = vst.msk [vmem:[%s2770_s22] sm:$0xf] %vm1825_vm3, %v2054_v13  ;;  %v2055_v18 = vpack.c.bf16 %v1700_v17, %v1700_v17 }
 0x18c   : > { %1849 = vst.msk [vmem:[%s2770_s22 + $0x5c] sm:$0xf] %vm1825_vm3, %v2077_v14  ;;  %v2078_v6 = vpack.c.bf16 %v1723_v35, %v1723_v35 }
 0x18d   : > { %1827 = vst.msk [vmem:[%s2770_s22 + $0x4] sm:$0xf] %vm1825_vm3, %v2055_v18 }
 0x18e   : > { %1850 = vst.msk [vmem:[%s2770_s22 + $0x60] sm:$0xf] %vm1825_vm3, %v2078_v6 }
 0x18f PF: > { %p10_p9 = scmp.ge.s32.totalorder %s2398_s16, 4   ;;  %s2916_s12 = smov %s2354_s13 }
 0x190   : > { %s2917_s13 = smov %s2407_s19  ;;  %s2918_s14 = smov %s2398_s16 }
 0x191   :  { %12 = sbr.rel (!%p10_p9) target bundleno = 2 (0x2), region = 108 }

// kernel: lenet_forward.3
= control target key start
LH: loop header
LB: loop body
LE: loop exit
PB: predicated region body
PF: predicated region fallthrough
CT: control target
= control target key end

     0   :  { %v3828_v0 = vmov 0   ;;  %vm659_vm0 = vcmask 179200   ;;  %vm810_vm1 = vcmask 1042432   ;;  %vm3830_vm2 = vmmov 0   ;;  %s4895_s1 = inlined_call_operand.vmem [shape: bf16[150,16], index: 1, kind: input, shape index: {}]   ;;  %s4896_s0 = inlined_call_operand.vmem [shape: bf16[4,25,8,150], index: 0, kind: input, shape index: {}]   ;;  %s4897_s3 = inlined_call_operand.vmem [shape: bf16[25,16,128], index: 3, kind: input, shape index: {}]   ;;  %s4898_s2 = inlined_call_operand.vmem [shape: f32[1,16], index: 2, kind: input, shape index: {}]   ;;  %s4899_s5 = inlined_call_operand.vmem [shape: bf16[128,128], index: 5, kind: input, shape index: {}]   ;;  %s4900_s7 = inlined_call_operand.vmem [shape: bf16[128,16], index: 7, kind: input, shape index: {}]   ;;  %s4901_s4 = inlined_call_operand.vmem [shape: f32[1,128], index: 4, kind: input, shape index: {}]   ;;  %s4902_s6 = inlined_call_operand.vmem [shape: f32[1,128], index: 6, kind: input, shape index: {}]   ;;  %s4903_s8 = inlined_call_operand.vmem [shape: f32[1,16], index: 8, kind: input, shape index: {}]   ;;  %s4904_s9 = inlined_call_operand.vmem [shape: f32[8,16], index: 9, kind: output, shape index: {}]  }
   0x1   :  { %814 = vmatprep.subr.bf16.mxu0 %v3828_v0  ;;  %v3627_v1 = vld [vmem:[%s4895_s1] sm:$0xff]   ;;  %3604 = vmatprep.subr.bf16.mxu1 %v3828_v0  ;;  %v3628_v2 = vld [vmem:[%s4895_s1 + $0x8] sm:$0xff]   ;;  %v3629_v3 = vld [vmem:[%s4895_s1 + $0x10] sm:$0xff]   ;;  %vm1466_vm3 = vcmask 130048  }
   0x2   :  { %815 = vmatpush1.bf16.msra.mxu0 %v3627_v1  ;;  %3614 = vmatpush1.bf16.msra.mxu1 %v3627_v1  ;;  %v3630_v4 = vld [vmem:[%s4895_s1 + $0x18] sm:$0xff]   ;;  %v3639_v5 = vld [vmem:[%s4896_s0 + $0x4] ss:$8 sps:$4 sm:$0xff]   ;;  %v3633_v8 = vld [vmem:[%s4895_s1 + $0x30] sm:$0xff]  }
   0x3   :  { %816 = vmatprep.subr.bf16.mxu0 %v3828_v0  ;;  %3605 = vmatprep.subr.bf16.mxu1 %v3828_v0  ;;  %v3631_v6 = vld [vmem:[%s4895_s1 + $0x20] sm:$0xff]   ;;  %v3632_v7 = vld [vmem:[%s4895_s1 + $0x28] sm:$0xff]   ;;  %v3634_v9 = vld [vmem:[%s4895_s1 + $0x38] sm:$0xff]  }
   0x4   :  { %3128 = vmatprep.mubr.msk.bf16.mxu0 %vm659_vm0, %v3639_v5  ;;  %v3635_v10 = vld [vmem:[%s4895_s1 + $0x40] sm:$0xff]   ;;  %v3636_v11 = vld [vmem:[%s4895_s1 + $0x48] ss:$0 sps:$4 sm:$0x77]   ;;  %v3640_v14 = vld [vmem:[%s4896_s0 + $0x14] ss:$8 sps:$4 sm:$0xff]  }
   0x5   :  { %v812_v12 = vsel %vm810_vm1, %v3636_v11, 0  ;;  %v3637_v13 = vld [vmem:[%s4896_s0] ss:$8 sps:$4 sm:$0xff]   ;;  %v3642_v15 = vld [vmem:[%s4896_s0 + $0x10] ss:$8 sps:$4 sm:$0xff]  }
   0x6   :  { %817 = vmatpush1.bf16.msra.mxu0 %v3628_v2  ;;  %3615 = vmatpush1.bf16.msra.mxu1 %v3628_v2  ;;  %v3643_v16 = vld [vmem:[%s4896_s0 + $0x24] ss:$8 sps:$4 sm:$0xff]   ;;  %v3645_v17 = vld [vmem:[%s4896_s0 + $0x20] ss:$8 sps:$4 sm:$0xff]   ;;  %v3646_v18 = vld [vmem:[%s4896_s0 + $0x34] ss:$8 sps:$4 sm:$0xff]  }
   0x7   :  { %818 = vmatprep.subr.bf16.mxu0 %v3828_v0  ;;  %3606 = vmatprep.subr.bf16.mxu1 %v3828_v0  ;;  %v3648_v19 = vld [vmem:[%s4896_s0 + $0x30] ss:$8 sps:$4 sm:$0xff]   ;;  %v3649_v20 = vld [vmem:[%s4896_s0 + $0x44] ss:$8 sps:$4 sm:$0xff]   ;;  %v3651_v21 = vld [vmem:[%s4896_s0 + $0x40] ss:$8 sps:$4 sm:$0xff]  }
   0x8   :  { %v3652_v22 = vld [vmem:[%s4896_s0 + $0x54] ss:$8 sps:$4 sm:$0xff]   ;;  %v3654_v23 = vld [vmem:[%s4896_s0 + $0x50] ss:$8 sps:$4 sm:$0xff]   ;;  %v3655_v24 = vld [vmem:[%s4896_s0 + $0x64] ss:$8 sps:$4 sm:$0xff]  }
   0x9   :  { %v3657_v25 = vld [vmem:[%s4896_s0 + $0x60] ss:$8 sps:$4 sm:$0xff]   ;;  %v3658_v26 = vld [vmem:[%s4896_s0 + $0x74] ss:$8 sps:$4 sm:$0xff]   ;;  %v3660_v27 = vld [vmem:[%s4896_s0 + $0x70] ss:$8 sps:$4 sm:$0xff]  }
   0xa   :  { %819 = vmatpush1.bf16.msra.mxu0 %v3629_v3  ;;  %3616 = vmatpush1.bf16.msra.mxu1 %v3629_v3  ;;  %v3661_v28 = vld [vmem:[%s4896_s0 + $0x84] ss:$8 sps:$4 sm:$0xff]   ;;  %v3663_v29 = vld [vmem:[%s4896_s0 + $0x80] ss:$8 sps:$4 sm:$0xff]   ;;  %v3664_v30 = vld [vmem:[%s4896_s0 + $0x94] ss:$8 sps:$4 sm:$0xff]  }
   0xb   :  { %820 = vmatprep.subr.bf16.mxu0 %v3828_v0  ;;  %3607 = vmatprep.subr.bf16.mxu1 %v3828_v0  ;;  %v3666_v31 = vld [vmem:[%s4896_s0 + $0x90] ss:$8 sps:$4 sm:$0xff]   ;;  %v3667_v32 = vld [vmem:[%s4896_s0 + $0xa4] ss:$8 sps:$4 sm:$0xff]   ;;  %v3669_v33 = vld [vmem:[%s4896_s0 + $0xa0] ss:$8 sps:$4 sm:$0xff]  }
   0xc   :  { %v3670_v34 = vld [vmem:[%s4896_s0 + $0xb4] ss:$8 sps:$4 sm:$0xff]   ;;  %v3672_v35 = vld [vmem:[%s4896_s0 + $0xb0] ss:$8 sps:$4 sm:$0xff]   ;;  %v3673_v36 = vld [vmem:[%s4896_s0 + $0xc4] ss:$8 sps:$4 sm:$0xff]  }
   0xd   :  { %v3675_v37 = vld [vmem:[%s4896_s0 + $0xc0] ss:$8 sps:$4 sm:$0xff]   ;;  %v3676_v38 = vld [vmem:[%s4896_s0 + $0xd4] ss:$8 sps:$4 sm:$0xff]   ;;  %v3678_v39 = vld [vmem:[%s4896_s0 + $0xd0] ss:$8 sps:$4 sm:$0xff]  }
   0xe   :  { %821 = vmatpush1.bf16.msra.mxu0 %v3630_v4  ;;  %3617 = vmatpush1.bf16.msra.mxu1 %v3630_v4  ;;  %v3679_v40 = vld [vmem:[%s4896_s0 + $0xe4] ss:$8 sps:$4 sm:$0xff]   ;;  %v3727_v42 = vld [vmem:[%s4896_s0 + $0x2a0] ss:$8 sps:$4 sm:$0xff]   ;;  %v3682_v44 = vld [vmem:[%s4896_s0 + $0xf4] ss:$8 sps:$4 sm:$0xff]  }
   0xf   :  { %822 = vmatprep.subr.bf16.mxu0 %v3828_v0  ;;  %3608 = vmatprep.subr.bf16.mxu1 %v3828_v0  ;;  %v3729_v41 = vld [vmem:[%s4896_s0 + $0x2a4] ss:$8 sps:$4 sm:$0xff]   ;;  %v3681_v43 = vld [vmem:[%s4896_s0 + $0xe0] ss:$8 sps:$4 sm:$0xff]   ;;  %v3733_v45 = vld [vmem:[%s4896_s0 + $0x2b4] ss:$8 sps:$4 sm:$0xff]  }
  0x10   :  { %3170 = vmatprep.mubr.msk.bf16.mxu1 %vm659_vm0, %v3729_v41  ;;  %v3735_v46 = vld [vmem:[%s4896_s0 + $0x2b0] ss:$8 sps:$4 sm:$0xff]   ;;  %v3685_v48 = vld [vmem:[%s4896_s0 + $0x104] ss:$8 sps:$4 sm:$0xff]   ;;  %v3741_v50 = vld [vmem:[%s4896_s0 + $0x2c0] ss:$8 sps:$4 sm:$0xff]  }
  0x11   :  { %v3684_v47 = vld [vmem:[%s4896_s0 + $0xf0] ss:$8 sps:$4 sm:$0xff]   ;;  %v3739_v49 = vld [vmem:[%s4896_s0 + $0x2c4] ss:$8 sps:$4 sm:$0xff]   ;;  %v3687_v51 = vld [vmem:[%s4896_s0 + $0x100] ss:$8 sps:$4 sm:$0xff]  }
  0x12   :  { %823 = vmatpush1.bf16.msra.mxu0 %v3631_v6  ;;  %3618 = vmatpush1.bf16.msra.mxu1 %v3631_v6  ;;  %v3688_v52 = vld [vmem:[%s4896_s0 + $0x114] ss:$8 sps:$4 sm:$0xff]   ;;  %v3747_v54 = vld [vmem:[%s4896_s0 + $0x2d0] ss:$8 sps:$4 sm:$0xff]   ;;  %v3691_v56 = vld [vmem:[%s4896_s0 + $0x124] ss:$8 sps:$4 sm:$0xff]  }
  0x13   :  { %824 = vmatprep.subr.bf16.mxu0 %v3828_v0  ;;  %3609 = vmatprep.subr.bf16.mxu1 %v3828_v0  ;;  %v3745_v53 = vld [vmem:[%s4896_s0 + $0x2d4] ss:$8 sps:$4 sm:$0xff]   ;;  %v3690_v55 = vld [vmem:[%s4896_s0 + $0x110] ss:$8 sps:$4 sm:$0xff]   ;;  %v3751_v57 = vld [vmem:[%s4896_s0 + $0x2e4] ss:$8 sps:$4 sm:$0xff]  }
  0x14   :  { %v3753_v58 = vld [vmem:[%s4896_s0 + $0x2e0] ss:$8 sps:$4 sm:$0xff]   ;;  %v3694_v60 = vld [vmem:[%s4896_s0 + $0x134] ss:$8 sps:$4 sm:$0xff]   ;;  %v3759_v62 = vld [vmem:[%s4896_s0 + $0x2f0] ss:$8 sps:$4 sm:$0xff]  }
  0x15   :  { %v3693_v59 = vld [vmem:[%s4896_s0 + $0x120] ss:$8 sps:$4 sm:$0xff]   ;;  %v3757_v61 = vld [vmem:[%s4896_s0 + $0x2f4] ss:$8 sps:$4 sm:$0xff]   ;;  %v3696_v63 = vld [vmem:[%s4896_s0 + $0x130] ss:$8 sps:$4 sm:$0xff]  }
  0x16   :  { %825 = vmatpush1.bf16.msra.mxu0 %v3632_v7  ;;  %3619 = vmatpush1.bf16.msra.mxu1 %v3632_v7  ;;  %v3763_v1 = vld [vmem:[%s4896_s0 + $0x304] ss:$8 sps:$4 sm:$0xff]   ;;  %v3765_v2 = vld [vmem:[%s4896_s0 + $0x300] ss:$8 sps:$4 sm:$0xff]   ;;  %v3700_v4 = vld [vmem:[%s4896_s0 + $0x154] ss:$8 sps:$4 sm:$0xff]  }
  0x17   :  { %826 = vmatprep.subr.bf16.mxu0 %v3828_v0  ;;  %3610 = vmatprep.subr.bf16.mxu1 %v3828_v0  ;;  %v3699_v3 = vld [vmem:[%s4896_s0 + $0x140] ss:$8 sps:$4 sm:$0xff]   ;;  %v3769_v5 = vld [vmem:[%s4896_s0 + $0x314] ss:$8 sps:$4 sm:$0xff]   ;;  %v3771_v6 = vld [vmem:[%s4896_s0 + $0x310] ss:$8 sps:$4 sm:$0xff]  }
  0x18   :  { %v3702_v7 = vld [vmem:[%s4896_s0 + $0x150] ss:$8 sps:$4 sm:$0xff]   ;;  %v3736_v41 = vld [vmem:[%s4896_s0 + $0x1f4] ss:$8 sps:$4 sm:$0xff]  }
  0x19   :  { %v3708_v11 = vld [vmem:[%s4896_s0 + $0x170] ss:$8 sps:$4 sm:$0xff]  }
  0x1a   :  { %827 = vmatpush1.bf16.msra.mxu0 %v3633_v8  ;;  %3620 = vmatpush1.bf16.msra.mxu1 %v3633_v8  ;;  %v3703_v8 = vld [vmem:[%s4896_s0 + $0x164] ss:$8 sps:$4 sm:$0xff]  }
  0x1b   :  { %828 = vmatprep.subr.bf16.mxu0 %v3828_v0  ;;  %3611 = vmatprep.subr.bf16.mxu1 %v3828_v0 }
  0x1e   :  { %829 = vmatpush1.bf16.msra.mxu0 %v3634_v9  ;;  %3621 = vmatpush1.bf16.msra.mxu1 %v3634_v9  ;;  %v3705_v9 = vld [vmem:[%s4896_s0 + $0x160] ss:$8 sps:$4 sm:$0xff]  }
  0x1f   :  { %830 = vmatprep.subr.bf16.mxu0 %v3828_v0  ;;  %3612 = vmatprep.subr.bf16.mxu1 %v3828_v0 }
  0x22   :  { %831 = vmatpush1.bf16.msra.mxu0 %v3635_v10  ;;  %3622 = vmatpush1.bf16.msra.mxu1 %v3635_v10  ;;  %v3706_v10 = vld [vmem:[%s4896_s0 + $0x174] ss:$8 sps:$4 sm:$0xff]  }
  0x23   :  { %832 = vmatprep.subr.bf16.mxu0 %v3828_v0  ;;  %3613 = vmatprep.subr.bf16.mxu1 %v3828_v0  ;;  %v3697_v0 = vld [vmem:[%s4896_s0 + $0x144] ss:$8 sps:$4 sm:$0xff]  }
  0x26   :  { %833 = vmatpush1.bf16.msra.mxu0 %v812_v12  ;;  %3623 = vmatpush1.bf16.msra.mxu1 %v812_v12  ;;  %v3709_v12 = vld [vmem:[%s4896_s0 + $0x184] ss:$8 sps:$4 sm:$0xff]  }
  0x29   :  { %847 = vmatmul.mubr.bf16.vlgmr.msra.gmra.mrb[0].mxu0 %v3637_v13  ;;  %1183 = vmatmul.mubr.bf16.vlgmr.msra.gmra.mrb[0].mxu1 %v3727_v42  ;;  %v3711_v13 = vld [vmem:[%s4896_s0 + $0x180] ss:$8 sps:$4 sm:$0xff]  }
  0x2a   :  { %3129 = vmatprep.mubr.msk.bf16.mxu0 %vm659_vm0, %v3640_v14  ;;  %3171 = vmatprep.mubr.msk.bf16.mxu1 %vm659_vm0, %v3733_v45  ;;  %v3712_v14 = vld [vmem:[%s4896_s0 + $0x194] ss:$8 sps:$4 sm:$0xff]   ;;  %v3738_v45 = vld [vmem:[%s4896_s0 + $0x1f0] ss:$8 sps:$4 sm:$0xff]  }
  0x31   :  { %855 = vmatmul.mubr.bf16.gmra.mrb[4].mxu0 %v3642_v15  ;;  %1191 = vmatmul.mubr.bf16.gmra.mrb[4].mxu1 %v3735_v46  ;;  %v3714_v15 = vld [vmem:[%s4896_s0 + $0x190] ss:$8 sps:$4 sm:$0xff]  }
  0x32   :  { %3130 = vmatprep.mubr.msk.bf16.mxu0 %vm659_vm0, %v3643_v16  ;;  %3172 = vmatprep.mubr.msk.bf16.mxu1 %vm659_vm0, %v3739_v49  ;;  %v3715_v16 = vld [vmem:[%s4896_s0 + $0x1a4] ss:$8 sps:$4 sm:$0xff]  }
  0x39   :  { %863 = vmatmul.mubr.bf16.gmra.mrb[8].mxu0 %v3645_v17  ;;  %1199 = vmatmul.mubr.bf16.gmra.mrb[8].mxu1 %v3741_v50  ;;  %v3717_v17 = vld [vmem:[%s4896_s0 + $0x1a0] ss:$8 sps:$4 sm:$0xff]  }
  0x3a   :  { %3131 = vmatprep.mubr.msk.bf16.mxu0 %vm659_vm0, %v3646_v18  ;;  %3173 = vmatprep.mubr.msk.bf16.mxu1 %vm659_vm0, %v3745_v53  ;;  %v3718_v18 = vld [vmem:[%s4896_s0 + $0x1b4] ss:$8 sps:$4 sm:$0xff]  }
  0x3b   :  { %v3748_v53 = vld [vmem:[%s4896_s0 + $0x214] ss:$8 sps:$4 sm:$0xff]  }
  0x41   :  { %871 = vmatmul.mubr.bf16.gmra.mrb[12].mxu0 %v3648_v19  ;;  %1207 = vmatmul.mubr.bf16.gmra.mrb[12].mxu1 %v3747_v54 }
  0x42   :  { %3132 = vmatprep.mubr.msk.bf16.mxu0 %vm659_vm0, %v3649_v20  ;;  %3174 = vmatprep.mubr.msk.bf16.mxu1 %vm659_vm0, %v3751_v57  ;;  %v3750_v57 = vld [vmem:[%s4896_s0 + $0x210] ss:$8 sps:$4 sm:$0xff]  }
  0x49   :  { %879 = vmatmul.mubr.bf16.gmra.mrb[16].mxu0 %v3651_v21  ;;  %1215 = vmatmul.mubr.bf16.gmra.mrb[16].mxu1 %v3753_v58  ;;  %v3720_v21 = vld [vmem:[%s4896_s0 + $0x1b0] ss:$8 sps:$4 sm:$0xff]  }
  0x4a   :  { %3133 = vmatprep.mubr.msk.bf16.mxu0 %vm659_vm0, %v3652_v22  ;;  %3175 = vmatprep.mubr.msk.bf16.mxu1 %vm659_vm0, %v3757_v61 }
  0x51   :  { %887 = vmatmul.mubr.bf16.gmra.mrb[20].mxu0 %v3654_v23  ;;  %1223 = vmatmul.mubr.bf16.gmra.mrb[20].mxu1 %v3759_v62  ;;  %v3721_v23 = vld [vmem:[%s4896_s0 + $0x1c4] ss:$8 sps:$4 sm:$0xff]  }
  0x52   :  { %3134 = vmatprep.mubr.msk.bf16.mxu0 %vm659_vm0, %v3655_v24  ;;  %3176 = vmatprep.mubr.msk.bf16.mxu1 %vm659_vm0, %v3763_v1  ;;  %v3760_v1 = vld [vmem:[%s4896_s0 + $0x234] ss:$8 sps:$4 sm:$0xff]  }
  0x59   :  { %895 = vmatmul.mubr.bf16.gmra.mrb[24].mxu0 %v3657_v25  ;;  %1231 = vmatmul.mubr.bf16.gmra.mrb[24].mxu1 %v3765_v2 }
  0x5a   :  { %3135 = vmatprep.mubr.msk.bf16.mxu0 %vm659_vm0, %v3658_v26  ;;  %3177 = vmatprep.mubr.msk.bf16.mxu1 %vm659_vm0, %v3769_v5  ;;  %v3762_v5 = vld [vmem:[%s4896_s0 + $0x230] ss:$8 sps:$4 sm:$0xff]  }
  0x61   :  { %903 = vmatmul.mubr.bf16.gmra.mrb[28].mxu0 %v3660_v27  ;;  %1239 = vmatmul.mubr.bf16.gmra.mrb[28].mxu1 %v3771_v6  ;;  %v3723_v27 = vld [vmem:[%s4896_s0 + $0x1c0] ss:$8 sps:$4 sm:$0xff]  }
  0x62   :  { %3136 = vmatprep.mubr.msk.bf16.mxu0 %vm659_vm0, %v3661_v28 }
  0x69   :  { %911 = vmatmul.mubr.bf16.gmra.mrb[32].mxu0 %v3663_v29  ;;  %v3724_v29 = vld [vmem:[%s4896_s0 + $0x1d4] ss:$8 sps:$4 sm:$0xff]  }
  0x6a   :  { %3137 = vmatprep.mubr.msk.bf16.mxu0 %vm659_vm0, %v3664_v30 }
  0x71   :  { %919 = vmatmul.mubr.bf16.gmra.mrb[36].mxu0 %v3666_v31 }
  0x72   :  { %3138 = vmatprep.mubr.msk.bf16.mxu0 %vm659_vm0, %v3667_v32 }
  0x79   :  { %927 = vmatmul.mubr.bf16.gmra.mrb[40].mxu0 %v3669_v33  ;;  %v3726_v33 = vld [vmem:[%s4896_s0 + $0x1d0] ss:$8 sps:$4 sm:$0xff]  }
  0x7a   :  { %3139 = vmatprep.mubr.msk.bf16.mxu0 %vm659_vm0, %v3670_v34 }
  0x81   :  { %935 = vmatmul.mubr.bf16.gmra.mrb[44].mxu0 %v3672_v35  ;;  %v3730_v35 = vld [vmem:[%s4896_s0 + $0x1e4] ss:$8 sps:$4 sm:$0xff]  }
  0x82   :  { %3140 = vmatprep.mubr.msk.bf16.mxu0 %vm659_vm0, %v3673_v36 }
  0x89   :  { %943 = vmatmul.mubr.bf16.gmra.mrb[48].mxu0 %v3675_v37 }
  0x8a   :  { %3141 = vmatprep.mubr.msk.bf16.mxu0 %vm659_vm0, %v3676_v38 }
  0x91   :  { %951 = vmatmul.mubr.bf16.gmra.mrb[52].mxu0 %v3678_v39  ;;  %v3732_v39 = vld [vmem:[%s4896_s0 + $0x1e0] ss:$8 sps:$4 sm:$0xff]  }
  0x92   :  { %3142 = vmatprep.mubr.msk.bf16.mxu0 %vm659_vm0, %v3679_v40 }
  0x99   :  { %959 = vmatmul.mubr.bf16.gmra.mrb[56].mxu0 %v3681_v43 }
  0x9a   :  { %3143 = vmatprep.mubr.msk.bf16.mxu0 %vm659_vm0, %v3682_v44 }
  0xa1   :  { %967 = vmatmul.mubr.bf16.gmra.mrb[60].mxu0 %v3684_v47  ;;  %v3742_v47 = vld [vmem:[%s4896_s0 + $0x204] ss:$8 sps:$4 sm:$0xff]  }
  0xa2   :  { %3144 = vmatprep.mubr.msk.bf16.mxu0 %vm659_vm0, %v3685_v48 }
  0xa9   :  { %975 = vmatmul.mubr.bf16.gmra.mrb[64].mxu0 %v3687_v51  ;;  %v3744_v51 = vld [vmem:[%s4896_s0 + $0x200] ss:$8 sps:$4 sm:$0xff]  }
  0xaa   :  { %3145 = vmatprep.mubr.msk.bf16.mxu0 %vm659_vm0, %v3688_v52 }
  0xb1   :  { %983 = vmatmul.mubr.bf16.gmra.mrb[68].mxu0 %v3690_v55 }
  0xb2   :  { %3146 = vmatprep.mubr.msk.bf16.mxu0 %vm659_vm0, %v3691_v56 }
  0xb9   :  { %991 = vmatmul.mubr.bf16.gmra.mrb[72].mxu0 %v3693_v59  ;;  %v3754_v59 = vld [vmem:[%s4896_s0 + $0x224] ss:$8 sps:$4 sm:$0xff]  }
  0xba   :  { %3147 = vmatprep.mubr.msk.bf16.mxu0 %vm659_vm0, %v3694_v60 }
  0xc1   :  { %999 = vmatmul.mubr.bf16.gmra.mrb[76].mxu0 %v3696_v63  ;;  %v3756_v63 = vld [vmem:[%s4896_s0 + $0x220] ss:$8 sps:$4 sm:$0xff]  }
  0xc2   :  { %3148 = vmatprep.mubr.msk.bf16.mxu0 %vm659_vm0, %v3697_v0 }
  0xc9   :  { %1007 = vmatmul.mubr.bf16.gmra.mrb[80].mxu0 %v3699_v3 }
  0xca   :  { %3149 = vmatprep.mubr.msk.bf16.mxu0 %vm659_vm0, %v3700_v4 }
  0xd1   :  { %1015 = vmatmul.mubr.bf16.gmra.mrb[84].mxu0 %v3702_v7  ;;  %v3766_v7 = vld [vmem:[%s4896_s0 + $0x244] ss:$8 sps:$4 sm:$0xff]  }
  0xd2   :  { %3150 = vmatprep.mubr.msk.bf16.mxu0 %vm659_vm0, %v3703_v8 }
  0xd9   :  { %1023 = vmatmul.mubr.bf16.gmra.mrb[88].mxu0 %v3705_v9 }
  0xda   :  { %3151 = vmatprep.mubr.msk.bf16.mxu0 %vm659_vm0, %v3706_v10 }
  0xe1   :  { %1031 = vmatmul.mubr.bf16.gmra.mrb[92].mxu0 %v3708_v11  ;;  %v3768_v11 = vld [vmem:[%s4896_s0 + $0x240] ss:$8 sps:$4 sm:$0xff]  }
  0xe2   :  { %3152 = vmatprep.mubr.msk.bf16.mxu0 %vm659_vm0, %v3709_v12 }
  0xe9   :  { %1039 = vmatmul.mubr.bf16.gmra.mrb[96].mxu0 %v3711_v13  ;;  %v3772_v13 = vld [vmem:[%s4896_s0 + $0x254] ss:$8 sps:$4 sm:$0xff]  }
  0xea   :  { %3153 = vmatprep.mubr.msk.bf16.mxu0 %vm659_vm0, %v3712_v14 }
  0xf1   :  { %1047 = vmatmul.mubr.bf16.gmra.mrb[100].mxu0 %v3714_v15 }
  0xf2   :  { %3154 = vmatprep.mubr.msk.bf16.mxu0 %vm659_vm0, %v3715_v16 }
  0xf9   :  { %1055 = vmatmul.mubr.bf16.gmra.mrb[104].mxu0 %v3717_v17  ;;  %v3774_v17 = vld [vmem:[%s4896_s0 + $0x250] ss:$8 sps:$4 sm:$0xff]  }
  0xfa   :  { %3155 = vmatprep.mubr.msk.bf16.mxu0 %vm659_vm0, %v3718_v18 }
  0xfc   :  { %v4160_v19 = vpop.f32.mrb[0].mxu0 }
  0xfd   :  { %v850_v20 = vpop.f32.mrb[1].mxu0 }
  0xfe   :  { %v4165_v22 = vpop.f32.mrb[2].mxu0  ;;  %v3775_v20 = vld [vmem:[%s4896_s0 + $0x264] ss:$8 sps:$4 sm:$0xff]  }
  0xff   :  { %4924 = vst [vmem:[#allocation2_spill] sm:$0xff] %v4165_v22  ;;  %v853_v24 = vpop.f32.mrb[3].mxu0 }
 0x101   :  { %1063 = vmatmul.mubr.bf16.gmra.mrb[108].mxu0 %v3720_v21 }
 0x102   :  { %3156 = vmatprep.mubr.msk.bf16.mxu0 %vm659_vm0, %v3721_v23 }
 0x104   :  { %v4171_v25 = vpop.f32.mrb[4].mxu0 }
 0x105   :  { %4925 = vst [vmem:[#allocation3_spill] sm:$0xff] %v4171_v25  ;;  %v858_v26 = vpop.f32.mrb[5].mxu0 }
 0x106   :  { %v4176_v28 = vpop.f32.mrb[6].mxu0  ;;  %v3777_v26 = vld [vmem:[%s4896_s0 + $0x260] ss:$8 sps:$4 sm:$0xff]  }
 0x107   :  { %4926 = vst [vmem:[#allocation4_spill] sm:$0xff] %v4176_v28  ;;  %v861_v30 = vpop.f32.mrb[7].mxu0 }
 0x109   :  { %1071 = vmatmul.mubr.bf16.gmra.mrb[112].mxu0 %v3723_v27 }
 0x10a   :  { %3157 = vmatprep.mubr.msk.bf16.mxu0 %vm659_vm0, %v3724_v29  ;;  %v3778_v29 = vld [vmem:[%s4896_s0 + $0x274] ss:$8 sps:$4 sm:$0xff]  }
 0x10c   :  { %v4182_v31 = vpop.f32.mrb[8].mxu0 }
 0x10d   :  { %4927 = vst [vmem:[#allocation5_spill] sm:$0xff] %v4182_v31  ;;  %v866_v32 = vpop.f32.mrb[9].mxu0 }
 0x10e   :  { %v4187_v34 = vpop.f32.mrb[10].mxu0 }
 0x10f   :  { %4928 = vst [vmem:[#allocation6_spill] sm:$0xff] %v4187_v34  ;;  %v869_v36 = vpop.f32.mrb[11].mxu0 }
 0x111   :  { %1079 = vmatmul.mubr.bf16.gmra.mrb[116].mxu0 %v3726_v33 }
 0x112   :  { %3158 = vmatprep.mubr.msk.bf16.mxu0 %vm659_vm0, %v3730_v35  ;;  %v3780_v35 = vld [vmem:[%s4896_s0 + $0x270] ss:$8 sps:$4 sm:$0xff]  }
 0x114   :  { %v4193_v37 = vpop.f32.mrb[12].mxu0 }
 0x115   :  { %4929 = vst [vmem:[#allocation7_spill] sm:$0xff] %v4193_v37  ;;  %v874_v38 = vpop.f32.mrb[13].mxu0 }
 0x116   :  { %v4198_v40 = vpop.f32.mrb[14].mxu0  ;;  %v3781_v38 = vld [vmem:[%s4896_s0 + $0x284] ss:$8 sps:$4 sm:$0xff]  }
 0x117   :  { %4930 = vst [vmem:[#allocation8_spill] sm:$0xff] %v4198_v40  ;;  %v877_v42 = vpop.f32.mrb[15].mxu0 }
 0x119   :  { %1087 = vmatmul.mubr.bf16.gmra.mrb[120].mxu0 %v3732_v39 }
 0x11a   :  { %3159 = vmatprep.mubr.msk.bf16.mxu0 %vm659_vm0, %v3736_v41 }
 0x11c   :  { %v4204_v43 = vpop.f32.mrb[16].mxu0 }
 0x11d   :  { %4931 = vst [vmem:[#allocation9_spill] sm:$0xff] %v4204_v43  ;;  %v882_v44 = vpop.f32.mrb[17].mxu0 }
 0x11e   :  { %v4209_v46 = vpop.f32.mrb[18].mxu0 }
 0x11f   :  { %v885_v48 = vpop.f32.mrb[19].mxu0 }
 0x121   :  { %1095 = vmatmul.mubr.bf16.gmra.mrb[124].mxu0 %v3738_v45 }
 0x122   :  { %3160 = vmatprep.mubr.msk.bf16.mxu0 %vm659_vm0, %v3742_v47  ;;  %v3783_v47 = vld [vmem:[%s4896_s0 + $0x280] ss:$8 sps:$4 sm:$0xff]  }
 0x124   :  { %v4215_v49 = vpop.f32.mrb[20].mxu0 }
 0x125   :  { %v890_v50 = vpop.f32.mrb[21].mxu0 }
 0x126   :  { %v4220_v52 = vpop.f32.mrb[22].mxu0  ;;  %v3784_v50 = vld [vmem:[%s4896_s0 + $0x294] ss:$8 sps:$4 sm:$0xff]  }
 0x127   :  { %v893_v54 = vpop.f32.mrb[23].mxu0 }
 0x129   :  { %1103 = vmatmul.mubr.bf16.gmra.mrb[128].mxu0 %v3744_v51  ;;  %v4317_v51 = vpop.f32.mrb[0].mxu1 }
 0x12a   :  { %3161 = vmatprep.mubr.msk.bf16.mxu0 %vm659_vm0, %v3748_v53 }
 0x12c   :  { %v4226_v55 = vpop.f32.mrb[24].mxu0 }
 0x12d   :  { %v898_v56 = vpop.f32.mrb[25].mxu0 }
 0x12e   :  { %v4231_v58 = vpop.f32.mrb[26].mxu0  ;;  %v1186_v56 = vpop.f32.mrb[1].mxu1 }
 0x12f   :  { %v901_v60 = vpop.f32.mrb[27].mxu0  ;;  %v4905_v56 = vmov 0.0  }
 0x130   :  { %3414 = vmatprep.subr.bf16.mxu1 %v4905_v56 }
 0x131   :  { %1111 = vmatmul.mubr.bf16.gmra.mrb[132].mxu0 %v3750_v57 }
 0x132   :  { %3162 = vmatprep.mubr.msk.bf16.mxu0 %vm659_vm0, %v3754_v59  ;;  %v4324_v59 = vpop.f32.mrb[2].mxu1 }
 0x134   :  { %v4237_v61 = vpop.f32.mrb[28].mxu0 }
 0x135   :  { %v906_v62 = vpop.f32.mrb[29].mxu0 }
 0x136   :  { %v4242_v0 = vpop.f32.mrb[30].mxu0 }
 0x137   :  { %v909_v2 = vpop.f32.mrb[31].mxu0 }
 0x139   :  { %1119 = vmatmul.mubr.bf16.gmra.mrb[136].mxu0 %v3756_v63  ;;  %v3786_v63 = vld [vmem:[%s4896_s0 + $0x290] ss:$8 sps:$4 sm:$0xff]  }
 0x13a   :  { %3163 = vmatprep.mubr.msk.bf16.mxu0 %vm659_vm0, %v3760_v1  ;;  %v1189_v1 = vpop.f32.mrb[3].mxu1 }
 0x13c   :  { %v4248_v3 = vpop.f32.mrb[32].mxu0 }
 0x13d   :  { %v914_v4 = vpop.f32.mrb[33].mxu0 }
 0x13e   :  { %v4253_v6 = vpop.f32.mrb[34].mxu0  ;;  %v4333_v4 = vpop.f32.mrb[4].mxu1 }
 0x13f   :  { %v917_v8 = vpop.f32.mrb[35].mxu0 }
 0x140   :  { %v1194_v8 = vpop.f32.mrb[5].mxu1 }
 0x141   :  { %1127 = vmatmul.mubr.bf16.gmra.mrb[140].mxu0 %v3762_v5 }
 0x142   :  { %3164 = vmatprep.mubr.msk.bf16.mxu0 %vm659_vm0, %v3766_v7 }
 0x144   :  { %v4259_v9 = vpop.f32.mrb[36].mxu0 }
 0x145   :  { %v922_v10 = vpop.f32.mrb[37].mxu0 }
 0x146   :  { %v4264_v12 = vpop.f32.mrb[38].mxu0 }
 0x147   :  { %v925_v14 = vpop.f32.mrb[39].mxu0 }
 0x149   :  { %1135 = vmatmul.mubr.bf16.gmra.mrb[144].mxu0 %v3768_v11  ;;  %v4339_v11 = vpop.f32.mrb[6].mxu1 }
 0x14a   :  { %3165 = vmatprep.mubr.msk.bf16.mxu0 %vm659_vm0, %v3772_v13 }
 0x14c   :  { %v4270_v15 = vpop.f32.mrb[40].mxu0 }
 0x14d   :  { %v930_v16 = vpop.f32.mrb[41].mxu0 }
 0x14e   :  { %v4275_v18 = vpop.f32.mrb[42].mxu0  ;;  %v1197_v16 = vpop.f32.mrb[7].mxu1 }
 0x14f   :  { %v933_v21 = vpop.f32.mrb[43].mxu0 }
 0x151   :  { %1143 = vmatmul.mubr.bf16.gmra.mrb[148].mxu0 %v3774_v17 }
 0x152   :  { %3166 = vmatprep.mubr.msk.bf16.mxu0 %vm659_vm0, %v3775_v20  ;;  %v4345_v20 = vpop.f32.mrb[8].mxu1 }
 0x154   :  { %v4281_v23 = vpop.f32.mrb[44].mxu0 }
 0x155   :  { %v938_v24 = vpop.f32.mrb[45].mxu0 }
 0x156   :  { %v4286_v27 = vpop.f32.mrb[46].mxu0 }
 0x157   :  { %v941_v30 = vpop.f32.mrb[47].mxu0 }
 0x159   :  { %1151 = vmatmul.mubr.bf16.gmra.mrb[152].mxu0 %v3777_v26  ;;  %v1202_v26 = vpop.f32.mrb[9].mxu1 }
 0x15a   :  { %3167 = vmatprep.mubr.msk.bf16.mxu0 %vm659_vm0, %v3778_v29  ;;  %v4351_v30 = vpop.f32.mrb[10].mxu1 }
 0x15c   :  { %v4292_v32 = vpop.f32.mrb[48].mxu0 }
 0x15d   :  { %v946_v33 = vpop.f32.mrb[49].mxu0 }
 0x15e   :  { %v4297_v36 = vpop.f32.mrb[50].mxu0 }
 0x15f   :  { %4932 = vst [vmem:[#allocation10_spill] sm:$0xff] %v4297_v36  ;;  %v949_v41 = vpop.f32.mrb[51].mxu0 }
 0x161   :  { %1159 = vmatmul.mubr.bf16.gmra.mrb[156].mxu0 %v3780_v35 }
 0x162   :  { %3168 = vmatprep.mubr.msk.bf16.mxu0 %vm659_vm0, %v3781_v38  ;;  %v1205_v38 = vpop.f32.mrb[11].mxu1 }
 0x164   :  { %v4305_v42 = vpop.f32.mrb[52].mxu0 }
 0x165   :  { %4933 = vst [vmem:[#allocation11_spill] sm:$0xff] %v4305_v42  ;;  %v954_v45 = vpop.f32.mrb[53].mxu0 }
 0x166   :  { %v4312_v48 = vpop.f32.mrb[54].mxu0  ;;  %v4357_v45 = vpop.f32.mrb[12].mxu1 }
 0x167   :  { %4934 = vst [vmem:[#allocation12_spill] sm:$0xff] %v4312_v48  ;;  %v957_v54 = vpop.f32.mrb[55].mxu0 }
 0x168   :  { %v1210_v54 = vpop.f32.mrb[13].mxu1 }
 0x169   :  { %1167 = vmatmul.mubr.bf16.gmra.mrb[160].mxu0 %v3783_v47  ;;  %v4368_v1 = vpop.f32.mrb[14].mxu1 }
 0x16a   :  { %3169 = vmatprep.mubr.msk.bf16.mxu0 %vm659_vm0, %v3784_v50 }
 0x16c   :  { %v4322_v57 = vpop.f32.mrb[56].mxu0 }
 0x16d   :  { %4935 = vst [vmem:[#allocation13_spill] sm:$0xff] %v4322_v57  ;;  %v962_v62 = vpop.f32.mrb[57].mxu0 }
 0x16e   :  { %v4331_v2 = vpop.f32.mrb[58].mxu0  ;;  %v3787_v62 = vld [vmem:[%s4897_s3 + $0x8] sm:$0xff]  }
 0x16f   :  { %4936 = vst [vmem:[#allocation14_spill] sm:$0xff] %v4331_v2  ;;  %v965_v7 = vpop.f32.mrb[59].mxu0  ;;  %3415 = vmatpush3.bf16.msra.mxu1 %v3787_v62 }
 0x170   :  { %3420 = vmatprep.subr.bf16.mxu1 %v4905_v56 }
 0x171   :  { %1175 = vmatmul.mubr.bf16.gmra.mrb[164].mxu0 %v3786_v63 }
 0x174   :  { %v4337_v10 = vpop.f32.mrb[60].mxu0 }
 0x175   :  { %4937 = vst [vmem:[#allocation15_spill] sm:$0xff] %v4337_v10  ;;  %v970_v14 = vpop.f32.mrb[61].mxu0 }
 0x176   :  { %v4343_v17 = vpop.f32.mrb[62].mxu0  ;;  %v1213_v14 = vpop.f32.mrb[15].mxu1 }
 0x177   :  { %4938 = vst [vmem:[#allocation16_spill] sm:$0xff] %v4343_v17  ;;  %v973_v24 = vpop.f32.mrb[63].mxu0 }
 0x178   :  { %v4374_v24 = vpop.f32.mrb[16].mxu1 }
 0x179   :  { %v1218_v38 = vpop.f32.mrb[17].mxu1 }
 0x17a   :  { %v4380_v54 = vpop.f32.mrb[18].mxu1 }
 0x17b   :  { %v1221_v33 = vpop.f32.mrb[19].mxu1 }
 0x17c   :  { %v4349_v29 = vpop.f32.mrb[64].mxu0  ;;  %v4386_v14 = vpop.f32.mrb[20].mxu1 }
 0x17d   :  { %4939 = vst [vmem:[#allocation17_spill] sm:$0xff] %v4349_v29  ;;  %v978_v35 = vpop.f32.mrb[65].mxu0  ;;  %v1226_v5 = vpop.f32.mrb[21].mxu1 }
 0x17e   :  { %v4355_v41 = vpop.f32.mrb[66].mxu0  ;;  %v4392_v38 = vpop.f32.mrb[22].mxu1 }
 0x17f   :  { %4940 = vst [vmem:[#allocation18_spill] sm:$0xff] %v4355_v41  ;;  %v981_v50 = vpop.f32.mrb[67].mxu0  ;;  %v1229_v44 = vpop.f32.mrb[23].mxu1 }
 0x180   :  { %v4398_v33 = vpop.f32.mrb[24].mxu1 }
 0x181   :  { %v1234_v21 = vpop.f32.mrb[25].mxu1 }
 0x182   :  { %v4404_v5 = vpop.f32.mrb[26].mxu1 }
 0x183   :  { %v1237_v60 = vpop.f32.mrb[27].mxu1 }
 0x184   :  { %v4366_v63 = vpop.f32.mrb[68].mxu0  ;;  %v4410_v44 = vpop.f32.mrb[28].mxu1 }
 0x185   :  { %v986_v8 = vpop.f32.mrb[69].mxu0  ;;  %v1242_v39 = vpop.f32.mrb[29].mxu1 }
 0x186   :  { %v4372_v16 = vpop.f32.mrb[70].mxu0  ;;  %v4416_v21 = vpop.f32.mrb[30].mxu1 }
 0x187   :  { %v989_v35 = vpop.f32.mrb[71].mxu0  ;;  %v1245_v26 = vpop.f32.mrb[31].mxu1 }
 0x18c   :  { %v4378_v50 = vpop.f32.mrb[72].mxu0 }
 0x18d   :  { %v994_v47 = vpop.f32.mrb[73].mxu0 }
 0x18e   :  { %v4384_v8 = vpop.f32.mrb[74].mxu0 }
 0x18f   :  { %v997_v13 = vpop.f32.mrb[75].mxu0 }
 0x194   :  { %v4390_v35 = vpop.f32.mrb[76].mxu0 }
 0x195   :  { %v1002_v53 = vpop.f32.mrb[77].mxu0 }
 0x196   :  { %v4396_v47 = vpop.f32.mrb[78].mxu0 }
 0x197   :  { %v1005_v62 = vpop.f32.mrb[79].mxu0 }
 0x19c   :  { %v4402_v13 = vpop.f32.mrb[80].mxu0 }
 0x19d   :  { %v1010_v7 = vpop.f32.mrb[81].mxu0 }
 0x19e   :  { %v4408_v53 = vpop.f32.mrb[82].mxu0 }
 0x19f   :  { %v1013_v41 = vpop.f32.mrb[83].mxu0 }
 0x1a4   :  { %v4414_v62 = vpop.f32.mrb[84].mxu0 }
 0x1a5   :  { %v1018_v29 = vpop.f32.mrb[85].mxu0 }
 0x1a6   :  { %v4420_v7 = vpop.f32.mrb[86].mxu0 }
 0x1a7   :  { %v1021_v40 = vpop.f32.mrb[87].mxu0 }
 0x1a8   :  { %v4941_v40 = vmov 0.0  }
 0x1a9   :  { %3416 = vmatprep.mubr.msk.bf16.mxu1 %vm3830_vm2, %v4941_v40 }
 0x1ac   :  { %v4424_v17 = vpop.f32.mrb[88].mxu0 }
 0x1ad   :  { %v1026_v41 = vpop.f32.mrb[89].mxu0 }
 0x1ae   :  { %v4428_v56 = vpop.f32.mrb[90].mxu0 }
 0x1af   :  { %v1029_v43 = vpop.f32.mrb[91].mxu0 }
 0x1b4   :  { %v4432_v29 = vpop.f32.mrb[92].mxu0 }
 0x1b5   :  { %v1034_v10 = vpop.f32.mrb[93].mxu0 }
 0x1b6   :  { %v4436_v60 = vpop.f32.mrb[94].mxu0 }
 0x1b7   :  { %v1037_v39 = vpop.f32.mrb[95].mxu0 }
 0x1bc   :  { %v4442_v34 = vpop.f32.mrb[96].mxu0 }
 0x1bd   :  { %v1042_v37 = vpop.f32.mrb[97].mxu0 }
 0x1be   :  { %v4446_v2 = vpop.f32.mrb[98].mxu0 }
 0x1bf   :  { %v1045_v26 = vpop.f32.mrb[99].mxu0 }
 0x1c4   :  { %v4450_v31 = vpop.f32.mrb[100].mxu0 }
 0x1c5   :  { %v1050_v57 = vpop.f32.mrb[101].mxu0 }
 0x1c6   :  { %v4452_v40 = vpop.f32.mrb[102].mxu0 }
 0x1c7   :  { %4942 = vst [vmem:[#allocation19_spill] sm:$0xff] %v4452_v40  ;;  %v1053_v28 = vpop.f32.mrb[103].mxu0 }
 0x1cc   :  { %v4454_v41 = vpop.f32.mrb[104].mxu0 }
 0x1cd   :  { %4943 = vst [vmem:[#allocation20_spill] sm:$0xff] %v4454_v41  ;;  %v1058_v39 = vpop.f32.mrb[105].mxu0 }
 0x1ce   :  { %v4456_v48 = vpop.f32.mrb[106].mxu0 }
 0x1cf   :  { %4944 = vst [vmem:[#allocation21_spill] sm:$0xff] %v4456_v48  ;;  %v1061_v25 = vpop.f32.mrb[107].mxu0 }
 0x1d0   :  { %v4949_v25 = vmax.f32 %v4209_v46, %v4366_v63 }
 0x1d4   :  { %v4458_v43 = vpop.f32.mrb[108].mxu0 }
 0x1d5   :  { %v1066_v37 = vpop.f32.mrb[109].mxu0 }
 0x1d6   :  { %v4460_v42 = vpop.f32.mrb[110].mxu0 }
 0x1d7   :  { %4945 = vst [vmem:[#allocation22_spill] sm:$0xff] %v4460_v42  ;;  %v1069_v22 = vpop.f32.mrb[111].mxu0 }
 0x1dc   :  { %v4462_v10 = vpop.f32.mrb[112].mxu0 }
 0x1dd   :  { %4946 = vst [vmem:[#allocation23_spill] sm:$0xff] %v4462_v10  ;;  %v1074_v26 = vpop.f32.mrb[113].mxu0 }
 0x1de   :  { %v4464_v36 = vpop.f32.mrb[114].mxu0 }
 0x1df   :  { %4947 = vst [vmem:[#allocation24_spill] sm:$0xff] %v4464_v36  ;;  %v1077_v57 = vpop.f32.mrb[115].mxu0 }
 0x1e0   :  { %v4950_v57 = vmax.f32 %v4215_v49, %v4372_v16 }
 0x1e4   :  { %v4466_v40 = vpop.f32.mrb[116].mxu0 }
 0x1e5   :  { %4948 = vst [vmem:[#allocation25_spill] sm:$0xff] %v4466_v40  ;;  %v1082_v28 = vpop.f32.mrb[117].mxu0 }
 0x1e6   :  { %v1083_v41 = vpop.f32.mrb[118].mxu0 }
 0x1e7   :  { %v1281_v39 = vmax.f32 %v1083_v41, %v4317_v51  ;;  %v1085_v48 = vpop.f32.mrb[119].mxu0 }
 0x1e8   :  { %v4951_v48 = vmax.f32 %v4220_v52, %v4378_v50 }
 0x1e9   :  { %v4472_v37 = vmax.f32 %v4949_v25, %v1281_v39  ;;  %v4954_v25 = vmax.f32 %v4237_v61, %v4396_v47 }
 0x1ec   :  { %v1088_v42 = vpop.f32.mrb[120].mxu0 }
 0x1ed   :  { %v1282_v22 = vmax.f32 %v1088_v42, %v4324_v59  ;;  %v1090_v10 = vpop.f32.mrb[121].mxu0  ;;  %v4952_v59 = vmax.f32 %v4226_v55, %v4384_v8 }
 0x1ee   :  { %v1091_v26 = vpop.f32.mrb[122].mxu0 }
 0x1ef   :  { %v4478_v36 = vmax.f32 %v4950_v57, %v1282_v22  ;;  %v1283_v28 = vmax.f32 %v1091_v26, %v4333_v4  ;;  %v1093_v40 = vpop.f32.mrb[123].mxu0  ;;  %v4953_v4 = vmax.f32 %v4231_v58, %v4390_v35 }
 0x1f1   :  { %v4484_v51 = vmax.f32 %v4951_v48, %v1283_v28  ;;  %v4956_v28 = vmax.f32 %v4248_v3, %v4408_v53 }
 0x1f4   :  { %v1096_v46 = vpop.f32.mrb[124].mxu0 }
 0x1f5   :  { %v1284_v63 = vmax.f32 %v1096_v46, %v4339_v11  ;;  %v1098_v41 = vpop.f32.mrb[125].mxu0 }
 0x1f6   :  { %v1099_v42 = vpop.f32.mrb[126].mxu0  ;;  %v4958_v41 = vmax.f32 %v4259_v9, %v4420_v7 }
 0x1f7   :  { %v4490_v10 = vmax.f32 %v4952_v59, %v1284_v63  ;;  %v1285_v49 = vmax.f32 %v1099_v42, %v4345_v20  ;;  %v1101_v16 = vpop.f32.mrb[127].mxu0  ;;  %v4955_v20 = vmax.f32 %v4242_v0, %v4402_v13 }
 0x1f8   :  { %v4960_v16 = vmax.f32 %v4270_v15, %v4428_v56 }
 0x1f9   :  { %v4496_v40 = vmax.f32 %v4953_v4, %v1285_v49 }
 0x1fc   :  { %v1104_v52 = vpop.f32.mrb[128].mxu0 }
 0x1fd   :  { %v1286_v50 = vmax.f32 %v1104_v52, %v4351_v30  ;;  %v1106_v39 = vpop.f32.mrb[129].mxu0 }
 0x1fe   :  { %v1107_v11 = vpop.f32.mrb[130].mxu0  ;;  %v4962_v39 = vmax.f32 %v4281_v23, %v4436_v60 }
 0x1ff   :  { %v4502_v22 = vmax.f32 %v4954_v25, %v1286_v50  ;;  %v1287_v55 = vmax.f32 %v1107_v11, %v4357_v45  ;;  %v1109_v8 = vpop.f32.mrb[131].mxu0  ;;  %v4957_v45 = vmax.f32 %v4253_v6, %v4414_v62 }
 0x200   :  { %v4964_v8 = vmax.f32 %v4292_v32, %v4446_v2 }
 0x201   :  { %v4508_v26 = vmax.f32 %v4955_v20, %v1287_v55 }
 0x204   :  { %v1112_v58 = vpop.f32.mrb[132].mxu0 }
 0x205   :  { %v1288_v35 = vmax.f32 %v1112_v58, %v4368_v1  ;;  %v1114_v57 = vpop.f32.mrb[133].mxu0 }
 0x206   :  { %v1115_v30 = vpop.f32.mrb[134].mxu0 }
 0x207   :  { %v4514_v48 = vmax.f32 %v4956_v28, %v1288_v35  ;;  %v1289_v61 = vmax.f32 %v1115_v30, %v4374_v24  ;;  %v1117_v47 = vpop.f32.mrb[135].mxu0  ;;  %v4959_v24 = vmax.f32 %v4264_v12, %v4424_v17 }
 0x209   :  { %v4520_v46 = vmax.f32 %v4957_v45, %v1289_v61  ;;  %v4969_v61 = vld [vmem:[#allocation11_spill] sm:$0xff] }
 0x20c   :  { %v1120_v0 = vpop.f32.mrb[136].mxu0 }
 0x20d   :  { %v1290_v13 = vmax.f32 %v1120_v0, %v4380_v54  ;;  %v1122_v63 = vpop.f32.mrb[137].mxu0  ;;  %v4971_v0 = vld [vmem:[#allocation20_spill] sm:$0xff] }
 0x20e   :  { %v1123_v1 = vpop.f32.mrb[138].mxu0  ;;  %v4973_v63 = vld [vmem:[#allocation12_spill] sm:$0xff] }
 0x20f   :  { %v4526_v42 = vmax.f32 %v4958_v41, %v1290_v13  ;;  %v1291_v3 = vmax.f32 %v1123_v1, %v4386_v14  ;;  %v1125_v53 = vpop.f32.mrb[139].mxu0  ;;  %v4961_v14 = vmax.f32 %v4275_v18, %v4432_v29  ;;  %v4972_v13 = vld [vmem:[#allocation3_spill] sm:$0xff] }
 0x210   :  { %v4974_v1 = vmax.f32 %v4972_v13, %v4973_v63 }
 0x211   :  { %v4532_v59 = vmax.f32 %v4959_v24, %v1291_v3  ;;  %v3788_v24 = vld [vmem:[%s4897_s3] sm:$0xff]  }
 0x214   :  { %v1128_v6 = vpop.f32.mrb[140].mxu0 }
 0x215   :  { %v1292_v62 = vmax.f32 %v1128_v6, %v4392_v38  ;;  %v1130_v49 = vpop.f32.mrb[141].mxu0 }
 0x216   :  { %v1131_v54 = vpop.f32.mrb[142].mxu0  ;;  %v4975_v49 = vld [vmem:[#allocation21_spill] sm:$0xff] }
 0x217   :  { %v4538_v4 = vmax.f32 %v4960_v16, %v1292_v62  ;;  %v1293_v9 = vmax.f32 %v1131_v54, %v4398_v33  ;;  %v1133_v7 = vpop.f32.mrb[143].mxu0  ;;  %v4963_v33 = vmax.f32 %v4286_v27, %v4442_v34  ;;  %v4967_v27 = vld [vmem:[#allocation19_spill] sm:$0xff] }
 0x218   :  { %v4976_v7 = vld [vmem:[#allocation4_spill] sm:$0xff] }
 0x219   :  { %v4544_v52 = vmax.f32 %v4961_v14, %v1293_v9  ;;  %v4977_v14 = vld [vmem:[#allocation13_spill] sm:$0xff] }
 0x21c   :  { %v1136_v12 = vpop.f32.mrb[144].mxu0 }
 0x21d   :  { %v1294_v17 = vmax.f32 %v1136_v12, %v4404_v5  ;;  %v1138_v50 = vpop.f32.mrb[145].mxu0  ;;  %v4978_v12 = vmax.f32 %v4976_v7, %v4977_v14  ;;  %v4996_v14 = vld [vmem:[#allocation9_spill] sm:$0xff] }
 0x21e   :  { %v1139_v38 = vpop.f32.mrb[146].mxu0 }
 0x21f   :  { %v4550_v11 = vmax.f32 %v4962_v39, %v1294_v17  ;;  %v1295_v15 = vmax.f32 %v1139_v38, %v4410_v44  ;;  %v1141_v56 = vpop.f32.mrb[147].mxu0  ;;  %v4965_v44 = vld [vmem:[#allocation10_spill] sm:$0xff]  ;;  %v4979_v39 = vmov 0.0  }
 0x220   :  { %v4966_v58 = vmax.f32 %v4160_v19, %v4965_v44  ;;  %v4980_v56 = vld [vmem:[#allocation5_spill] sm:$0xff] }
 0x221   :  { %v4556_v25 = vmax.f32 %v4963_v33, %v1295_v15  ;;  %v4981_v33 = vld [vmem:[#allocation14_spill] sm:$0xff] }
 0x224   :  { %v1144_v18 = vpop.f32.mrb[148].mxu0 }
 0x225   :  { %v1296_v29 = vmax.f32 %v1144_v18, %v4416_v21  ;;  %v1146_v55 = vpop.f32.mrb[149].mxu0  ;;  %v4968_v21 = vld [vmem:[#allocation2_spill] sm:$0xff]  ;;  %v4982_v18 = vmax.f32 %v4980_v56, %v4981_v33 }
 0x226   :  { %v1147_v5 = vpop.f32.mrb[150].mxu0  ;;  %v4970_v47 = vmax.f32 %v4968_v21, %v4969_v61 }
 0x227   :  { %v4562_v20 = vmax.f32 %v4964_v8, %v1296_v29  ;;  %v1272_v23 = vmax.f32 %v4450_v31, %v1147_v5  ;;  %v1149_v60 = vpop.f32.mrb[151].mxu0  ;;  %v4576_v31 = vld [vmem:[%s4898_s2] ss:$0 sm:$0xff]  ;;  %v3789_v5 = vld [vmem:[%s4897_s3 + $0x10] sm:$0xff]  }
 0x229   :  { %v1297_v35 = vmax.f32 %v4966_v58, %v1272_v23  ;;  %v4983_v23 = vld [vmem:[#allocation22_spill] sm:$0xff] }
 0x22b   :  { %v1329_v6 = vadd.f32 %v4576_v31, %v1297_v35  ;;  %v4984_v35 = vld [vmem:[#allocation6_spill] sm:$0xff] }
 0x22c   :  { %v1152_v34 = vpop.f32.mrb[152].mxu0 }
 0x22d   :  { %v1273_v57 = vmax.f32 %v4967_v27, %v1152_v34  ;;  %v1154_v30 = vpop.f32.mrb[153].mxu0  ;;  %v1354_v15 = vmax.f32 %v1329_v6, 0.0  ;;  %v4985_v34 = vld [vmem:[#allocation15_spill] sm:$0xff]  ;;  %v4993_v6 = vld [vmem:[#allocation17_spill] sm:$0xff] }
 0x22e   :  { %v1155_v28 = vpop.f32.mrb[154].mxu0  ;;  %v4986_v27 = vmax.f32 %v4984_v35, %v4985_v34  ;;  %v4987_v30 = vld [vmem:[#allocation23_spill] sm:$0xff] }
 0x22f   :  { %v1298_v45 = vmax.f32 %v4970_v47, %v1273_v57  ;;  %v1274_v32 = vmax.f32 %v4971_v0, %v1155_v28  ;;  %v1157_v2 = vpop.f32.mrb[155].mxu0  ;;  %v4988_v47 = vld [vmem:[#allocation7_spill] sm:$0xff] }
 0x231   :  { %v1330_v19 = vadd.f32 %v4576_v31, %v1298_v45  ;;  %v1299_v41 = vmax.f32 %v4974_v1, %v1274_v32  ;;  %v4989_v45 = vld [vmem:[#allocation16_spill] sm:$0xff] }
 0x232   :  { %v4990_v0 = vmax.f32 %v4988_v47, %v4989_v45  ;;  %v4991_v1 = vld [vmem:[#allocation24_spill] sm:$0xff] }
 0x233   :  { %v1355_v3 = vmax.f32 %v1330_v19, 0.0  ;;  %v1331_v8 = vadd.f32 %v4576_v31, %v1299_v41  ;;  %v3790_v19 = vld [vmem:[%s4897_s3 + $0x18] sm:$0xff]  }
 0x234   :  { %v1160_v53 = vpop.f32.mrb[156].mxu0 }
 0x235   :  { %v3322_v62 = vpack.c.bf16 %v1355_v3, %v1355_v3  ;;  %v1275_v54 = vmax.f32 %v4975_v49, %v1160_v53  ;;  %v1162_v16 = vpop.f32.mrb[157].mxu0  ;;  %v1356_v61 = vmax.f32 %v1331_v8, 0.0 }
 0x236   :  { %v1163_v9 = vpop.f32.mrb[158].mxu0 }
 0x237   :  { %v1300_v17 = vmax.f32 %v4978_v12, %v1275_v54  ;;  %v1276_v50 = vmax.f32 %v4458_v43, %v1163_v9  ;;  %3417 = vmatmul.mubr.msk.bf16.vlgmr.msra.gmra.mrb[32].mxu1 %vm1466_vm3, %v3322_v62  ;;  %v1165_v38 = vpop.f32.mrb[159].mxu0  ;;  %v3321_v43 = vpack.c.bf16 %v1354_v15, %v1354_v15  ;;  %v3323_v13 = vpack.c.bf16 %v1356_v61, %v1356_v61  ;;  %v4995_v54 = vld [vmem:[#allocation25_spill] sm:$0xff]  ;;  %v4997_v12 = vld [vmem:[#allocation18_spill] sm:$0xff] }
 0x238   :  { %3421 = vmatpush3.bf16.msra.mxu1 %v3788_v24  ;;  %3422 = vmatprep.mubr.msk.bf16.mxu1 %vm3830_vm2, %v4979_v39  ;;  %v4992_v24 = vld [vmem:[#allocation8_spill] sm:$0xff]  ;;  %v3791_v38 = vld [vmem:[%s4897_s3 + $0x20] sm:$0xff]   ;;  %v1338_v61 = vadd.f32 %v4576_v31, %v4472_v37 }
 0x239   :  { %v1301_v29 = vmax.f32 %v4982_v18, %v1276_v50  ;;  %3426 = vmatprep.subr.bf16.mxu1 %v4979_v39  ;;  %v1332_v63 = vadd.f32 %v4576_v31, %v1300_v17  ;;  %v4994_v62 = vmax.f32 %v4992_v24, %v4993_v6  ;;  %v4998_v17 = vmax.f32 %v4996_v14, %v4997_v12  ;;  %v3792_v18 = vld [vmem:[%s4897_s3 + $0x28] sm:$0xff]   ;;  %v3803_v14 = vld [vmem:[%s4897_s3 + $0x80] sm:$0xff]  }
 0x23a   :  { %v1363_v45 = vmax.f32 %v1338_v61, 0.0  ;;  %v1342_v6 = vadd.f32 %v4576_v31, %v4496_v40 }
 0x23b   :  { %v1357_v7 = vmax.f32 %v1332_v63, 0.0  ;;  %v1333_v56 = vadd.f32 %v4576_v31, %v1301_v29  ;;  %v1340_v63 = vadd.f32 %v4576_v31, %v4484_v51 }
 0x23c   :  { %v1168_v55 = vpop.f32.mrb[160].mxu0 }
 0x23d   :  { %v1277_v60 = vmax.f32 %v4983_v23, %v1168_v55  ;;  %v1170_v44 = vpop.f32.mrb[161].mxu0  ;;  %v3324_v15 = vpack.c.bf16 %v1357_v7, %v1357_v7  ;;  %v1358_v33 = vmax.f32 %v1333_v56, 0.0  ;;  %v1344_v7 = vadd.f32 %v4576_v31, %v4508_v26  ;;  %v3805_v56 = vld [vmem:[%s4897_s3 + $0x90] sm:$0xff]  }
 0x23e   :  { %v1171_v58 = vpop.f32.mrb[162].mxu0  ;;  %v3794_v44 = vld [vmem:[%s4897_s3 + $0x38] sm:$0xff]  }
 0x23f   :  { %v1302_v57 = vmax.f32 %v4986_v27, %v1277_v60  ;;  %v1278_v28 = vmax.f32 %v4987_v30, %v1171_v58  ;;  %3423 = vmatmul.mubr.msk.bf16.vlgmr.msra.gmra.mrb[36].mxu1 %vm1466_vm3, %v3321_v43  ;;  %v1173_v21 = vpop.f32.mrb[163].mxu0  ;;  %v3325_v55 = vpack.c.bf16 %v1358_v33, %v1358_v33  ;;  %v3793_v43 = vld [vmem:[%s4897_s3 + $0x30] sm:$0xff]   ;;  %v3795_v27 = vld [vmem:[%s4897_s3 + $0x40] sm:$0xff]  }
 0x240   :  { %3427 = vmatpush3.bf16.msra.mxu1 %v3789_v5  ;;  %3428 = vmatprep.mubr.msk.bf16.mxu1 %vm3830_vm2, %v4979_v39  ;;  %v3796_v21 = vld [vmem:[%s4897_s3 + $0x48] sm:$0xff]  }
 0x241   :  { %v1303_v32 = vmax.f32 %v4990_v0, %v1278_v28  ;;  %3432 = vmatprep.subr.bf16.mxu1 %v4979_v39  ;;  %v1334_v5 = vadd.f32 %v4576_v31, %v1302_v57  ;;  %v3797_v0 = vld [vmem:[%s4897_s3 + $0x50] sm:$0xff]  }
 0x243   :  { %v1359_v29 = vmax.f32 %v1334_v5, 0.0  ;;  %v1335_v23 = vadd.f32 %v4576_v31, %v1303_v32  ;;  %v3330_v32 = vpack.c.bf16 %v1363_v45, %v1363_v45 }
 0x244   :  { %v1176_v2 = vpop.f32.mrb[164].mxu0 }
 0x245   :  { %v1279_v41 = vmax.f32 %v4991_v1, %v1176_v2  ;;  %v1178_v3 = vpop.f32.mrb[165].mxu0  ;;  %v3326_v8 = vpack.c.bf16 %v1359_v29, %v1359_v29  ;;  %v1360_v60 = vmax.f32 %v1335_v23, 0.0  ;;  %v1339_v2 = vadd.f32 %v4576_v31, %v4478_v36  ;;  %v3799_v1 = vld [vmem:[%s4897_s3 + $0x60] sm:$0xff]  }
 0x246   :  { %v1179_v53 = vpop.f32.mrb[166].mxu0  ;;  %v1365_v36 = vmax.f32 %v1340_v63, 0.0  ;;  %v1341_v3 = vadd.f32 %v4576_v31, %v4490_v10  ;;  %v1367_v10 = vmax.f32 %v1342_v6, 0.0  ;;  %v1348_v29 = vadd.f32 %v4576_v31, %v4532_v59 }
 0x247   :  { %v1304_v49 = vmax.f32 %v4994_v62, %v1279_v41  ;;  %v1280_v16 = vmax.f32 %v4995_v54, %v1179_v53  ;;  %3429 = vmatmul.mubr.msk.bf16.vlgmr.msra.gmra.mrb[40].mxu1 %vm1466_vm3, %v3323_v13  ;;  %v1181_v9 = vpop.f32.mrb[167].mxu0  ;;  %v3327_v58 = vpack.c.bf16 %v1360_v60, %v1360_v60  ;;  %v1364_v37 = vmax.f32 %v1339_v2, 0.0  ;;  %v3800_v53 = vld [vmem:[%s4897_s3 + $0x68] sm:$0xff]   ;;  %v3801_v62 = vld [vmem:[%s4897_s3 + $0x70] sm:$0xff]  }
 0x248   :  { %3433 = vmatpush3.bf16.msra.mxu1 %v3790_v19  ;;  %3434 = vmatprep.mubr.msk.bf16.mxu1 %vm3830_vm2, %v4979_v39  ;;  %v3798_v19 = vld [vmem:[%s4897_s3 + $0x58] sm:$0xff]   ;;  %v3332_v41 = vpack.c.bf16 %v1365_v36, %v1365_v36  ;;  %v1366_v51 = vmax.f32 %v1341_v3, 0.0  ;;  %v1343_v54 = vadd.f32 %v4576_v31, %v4502_v22  ;;  %v1369_v22 = vmax.f32 %v1344_v7, 0.0  ;;  %v3808_v60 = vld [vmem:[%s4897_s3 + $0xa8] sm:$0xff]  }
 0x249   :  { %v1305_v50 = vmax.f32 %v4998_v17, %v1280_v16  ;;  %3438 = vmatprep.subr.bf16.mxu1 %v4979_v39  ;;  %v1336_v35 = vadd.f32 %v4576_v31, %v1304_v49  ;;  %v3331_v13 = vpack.c.bf16 %v1364_v37, %v1364_v37  ;;  %v3334_v49 = vpack.c.bf16 %v1367_v10, %v1367_v10  ;;  %v3802_v16 = vld [vmem:[%s4897_s3 + $0x78] sm:$0xff]  }
 0x24a   :  { %v3333_v24 = vpack.c.bf16 %v1366_v51, %v1366_v51  ;;  %v1368_v40 = vmax.f32 %v1343_v54, 0.0  ;;  %v3336_v12 = vpack.c.bf16 %v1369_v22, %v1369_v22  ;;  %v1345_v17 = vadd.f32 %v4576_v31, %v4514_v48  ;;  %v3812_v22 = vld [vmem:[%s4899_s5] sm:$0xff]  }
 0x24b   :  { %v1361_v34 = vmax.f32 %v1336_v35, 0.0  ;;  %v1337_v30 = vadd.f32 %v4576_v31, %v1305_v50  ;;  %v3804_v50 = vld [vmem:[%s4897_s3 + $0x88] sm:$0xff]   ;;  %v1349_v23 = vadd.f32 %v4576_v31, %v4538_v4  ;;  %v3809_v35 = vld [vmem:[%s4897_s3 + $0xb0] sm:$0xff]  }
 0x24c   :  { %v3335_v9 = vpack.c.bf16 %v1368_v40, %v1368_v40  ;;  %v1370_v26 = vmax.f32 %v1345_v17, 0.0 }
 0x24d   :  { %v3328_v57 = vpack.c.bf16 %v1361_v34, %v1361_v34  ;;  %v1362_v28 = vmax.f32 %v1337_v30, 0.0  ;;  %v1374_v59 = vmax.f32 %v1349_v23, 0.0  ;;  %v3817_v23 = vld [vmem:[%s4899_s5 + $0x28] sm:$0xff]  }
 0x24f   :  { %3435 = vmatmul.mubr.msk.bf16.vlgmr.msra.gmra.mrb[44].mxu1 %vm1466_vm3, %v3324_v15  ;;  %v3329_v47 = vpack.c.bf16 %v1362_v28, %v1362_v28  ;;  %v1346_v15 = vadd.f32 %v4576_v31, %v4520_v46  ;;  %v1352_v28 = vadd.f32 %v4576_v31, %v4556_v25 }
 0x250   :  { %3439 = vmatpush3.bf16.msra.mxu1 %v3791_v38  ;;  %3440 = vmatprep.mubr.msk.bf16.mxu1 %vm3830_vm2, %v4979_v39  ;;  %v3337_v38 = vpack.c.bf16 %v1370_v26, %v1370_v26 }
 0x251   :  { %3444 = vmatprep.subr.bf16.mxu1 %v4979_v39  ;;  %v1371_v48 = vmax.f32 %v1346_v15, 0.0  ;;  %v3814_v15 = vld [vmem:[%s4899_s5 + $0x10] sm:$0xff]  }
 0x253   :  { %v3338_v33 = vpack.c.bf16 %v1371_v48, %v1371_v48 }
 0x257   :  { %3441 = vmatmul.mubr.msk.bf16.vlgmr.msra.gmra.mrb[48].mxu1 %vm1466_vm3, %v3325_v55  ;;  %v3806_v55 = vld [vmem:[%s4897_s3 + $0x98] sm:$0xff]  }
 0x258   :  { %3445 = vmatpush3.bf16.msra.mxu1 %v3792_v18  ;;  %3446 = vmatprep.mubr.msk.bf16.mxu1 %vm3830_vm2, %v4979_v39  ;;  %v1347_v18 = vadd.f32 %v4576_v31, %v4526_v42  ;;  %v1373_v42 = vmax.f32 %v1348_v29, 0.0 }
 0x259   :  { %3450 = vmatprep.subr.bf16.mxu1 %v4979_v39 }
 0x25a   :  { %v1372_v46 = vmax.f32 %v1347_v18, 0.0 }
 0x25c   :  { %v3339_v5 = vpack.c.bf16 %v1372_v46, %v1372_v46  ;;  %v3815_v46 = vld [vmem:[%s4899_s5 + $0x18] sm:$0xff]  }
 0x25f   :  { %3447 = vmatmul.mubr.msk.bf16.vlgmr.msra.gmra.mrb[52].mxu1 %vm1466_vm3, %v3326_v8  ;;  %v3340_v8 = vpack.c.bf16 %v1373_v42, %v1373_v42 }
 0x260   :  { %3451 = vmatpush3.bf16.msra.mxu1 %v3793_v43  ;;  %3452 = vmatprep.mubr.msk.bf16.mxu1 %vm3830_vm2, %v4979_v39  ;;  %v3807_v43 = vld [vmem:[%s4897_s3 + $0xa0] sm:$0xff]  }
 0x261   :  { %3456 = vmatprep.subr.bf16.mxu1 %v4979_v39 }
 0x267   :  { %3453 = vmatmul.mubr.msk.bf16.vlgmr.msra.gmra.mrb[56].mxu1 %vm1466_vm3, %v3327_v58  ;;  %v1350_v58 = vadd.f32 %v4576_v31, %v4544_v52 }
 0x268   :  { %3457 = vmatpush3.bf16.msra.mxu1 %v3794_v44  ;;  %3458 = vmatprep.mubr.msk.bf16.mxu1 %vm3830_vm2, %v4979_v39  ;;  %v3341_v44 = vpack.c.bf16 %v1374_v59, %v1374_v59 }
 0x269   :  { %3462 = vmatprep.subr.bf16.mxu1 %v4979_v39  ;;  %v1375_v4 = vmax.f32 %v1350_v58, 0.0 }
 0x26b   :  { %v3342_v34 = vpack.c.bf16 %v1375_v4, %v1375_v4 }
 0x26f   :  { %3459 = vmatmul.mubr.msk.bf16.vlgmr.msra.gmra.mrb[60].mxu1 %vm1466_vm3, %v3328_v57  ;;  %v3810_v57 = vld [vmem:[%s4897_s3 + $0xb8] sm:$0xff]  }
 0x270   :  { %3463 = vmatpush3.bf16.msra.mxu1 %v3795_v27  ;;  %3464 = vmatprep.mubr.msk.bf16.mxu1 %vm3830_vm2, %v4979_v39  ;;  %v1351_v27 = vadd.f32 %v4576_v31, %v4550_v11  ;;  %v1377_v11 = vmax.f32 %v1352_v28, 0.0 }
 0x271   :  { %3468 = vmatprep.subr.bf16.mxu1 %v4979_v39 }
 0x272   :  { %v1376_v52 = vmax.f32 %v1351_v27, 0.0  ;;  %v3344_v61 = vpack.c.bf16 %v1377_v11, %v1377_v11 }
 0x274   :  { %v3343_v30 = vpack.c.bf16 %v1376_v52, %v1376_v52 }
 0x277   :  { %3465 = vmatmul.mubr.msk.bf16.vlgmr.msra.gmra.mrb[64].mxu1 %vm1466_vm3, %v3329_v47  ;;  %v1353_v47 = vadd.f32 %v4576_v31, %v4562_v20 }
 0x278   :  { %3469 = vmatpush3.bf16.msra.mxu1 %v3796_v21  ;;  %3470 = vmatprep.mubr.msk.bf16.mxu1 %vm3830_vm2, %v4979_v39  ;;  %v3811_v21 = vld [vmem:[%s4897_s3 + $0xc0] sm:$0xff]  }
 0x279   :  { %3474 = vmatprep.subr.bf16.mxu1 %v4979_v39  ;;  %v1378_v25 = vmax.f32 %v1353_v47, 0.0 }
 0x27b   :  { %v3345_v45 = vpack.c.bf16 %v1378_v25, %v1378_v25 }
 0x27f   :  { %3471 = vmatmul.mubr.msk.bf16.vlgmr.msra.gmra.mrb[68].mxu1 %vm1466_vm3, %v3330_v32 }
 0x280   :  { %3475 = vmatpush3.bf16.msra.mxu1 %v3797_v0  ;;  %3476 = vmatprep.mubr.msk.bf16.mxu1 %vm3830_vm2, %v4979_v39 }
 0x281   :  { %3480 = vmatprep.subr.bf16.mxu1 %v4979_v39 }
 0x287   :  { %3477 = vmatmul.mubr.msk.bf16.vlgmr.msra.gmra.mrb[72].mxu1 %vm1466_vm3, %v3331_v13 }
 0x288   :  { %3481 = vmatpush3.bf16.msra.mxu1 %v3798_v19  ;;  %3482 = vmatprep.mubr.msk.bf16.mxu1 %vm3830_vm2, %v4979_v39 }
 0x289   :  { %3486 = vmatprep.subr.bf16.mxu1 %v4979_v39 }
 0x28f   :  { %3483 = vmatmul.mubr.msk.bf16.vlgmr.msra.gmra.mrb[76].mxu1 %vm1466_vm3, %v3332_v41 }
 0x290   :  { %3487 = vmatpush3.bf16.msra.mxu1 %v3799_v1  ;;  %3488 = vmatprep.mubr.msk.bf16.mxu1 %vm3830_vm2, %v4979_v39 }
 0x291   :  { %3492 = vmatprep.subr.bf16.mxu1 %v4979_v39 }
 0x297   :  { %3489 = vmatmul.mubr.msk.bf16.vlgmr.msra.gmra.mrb[80].mxu1 %vm1466_vm3, %v3333_v24 }
 0x298   :  { %3493 = vmatpush3.bf16.msra.mxu1 %v3800_v53  ;;  %3494 = vmatprep.mubr.msk.bf16.mxu1 %vm3830_vm2, %v4979_v39 }
 0x299   :  { %3498 = vmatprep.subr.bf16.mxu1 %v4979_v39 }
 0x29f   :  { %3495 = vmatmul.mubr.msk.bf16.vlgmr.msra.gmra.mrb[84].mxu1 %vm1466_vm3, %v3334_v49 }
 0x2a0   :  { %3499 = vmatpush3.bf16.msra.mxu1 %v3801_v62  ;;  %3500 = vmatprep.mubr.msk.bf16.mxu1 %vm3830_vm2, %v4979_v39 }
 0x2a1   :  { %3504 = vmatprep.subr.bf16.mxu1 %v4979_v39 }
 0x2a7   :  { %3501 = vmatmul.mubr.msk.bf16.vlgmr.msra.gmra.mrb[88].mxu1 %vm1466_vm3, %v3335_v9 }
 0x2a8   :  { %3505 = vmatpush3.bf16.msra.mxu1 %v3802_v16  ;;  %3506 = vmatprep.mubr.msk.bf16.mxu1 %vm3830_vm2, %v4979_v39 }
 0x2a9   :  { %3510 = vmatprep.subr.bf16.mxu1 %v4979_v39 }
 0x2af   :  { %3507 = vmatmul.mubr.msk.bf16.vlgmr.msra.gmra.mrb[92].mxu1 %vm1466_vm3, %v3336_v12 }
 0x2b0   :  { %3511 = vmatpush3.bf16.msra.mxu1 %v3803_v14  ;;  %3512 = vmatprep.mubr.msk.bf16.mxu1 %vm3830_vm2, %v4979_v39 }
 0x2b1   :  { %3516 = vmatprep.subr.bf16.mxu1 %v4979_v39 }
 0x2b7   :  { %3513 = vmatmul.mubr.msk.bf16.vlgmr.msra.gmra.mrb[96].mxu1 %vm1466_vm3, %v3337_v38 }
 0x2b8   :  { %3517 = vmatpush3.bf16.msra.mxu1 %v3804_v50  ;;  %3518 = vmatprep.mubr.msk.bf16.mxu1 %vm3830_vm2, %v4979_v39  ;;  %v3813_v50 = vld [vmem:[%s4899_s5 + $0x8] sm:$0xff]  }
 0x2b9   :  { %3522 = vmatprep.subr.bf16.mxu1 %v4979_v39 }
 0x2bf   :  { %3519 = vmatmul.mubr.msk.bf16.vlgmr.msra.gmra.mrb[100].mxu1 %vm1466_vm3, %v3338_v33 }
 0x2c0   :  { %3523 = vmatpush3.bf16.msra.mxu1 %v3805_v56  ;;  %3524 = vmatprep.mubr.msk.bf16.mxu1 %vm3830_vm2, %v4979_v39 }
 0x2c1   :  { %3528 = vmatprep.subr.bf16.mxu1 %v4979_v39 }
 0x2c7   :  { %3525 = vmatmul.mubr.msk.bf16.vlgmr.msra.gmra.mrb[104].mxu1 %vm1466_vm3, %v3339_v5  ;;  %v3816_v5 = vld [vmem:[%s4899_s5 + $0x20] sm:$0xff]  }
 0x2c8   :  { %3529 = vmatpush3.bf16.msra.mxu1 %v3806_v55  ;;  %3530 = vmatprep.mubr.msk.bf16.mxu1 %vm3830_vm2, %v4979_v39 }
 0x2c9   :  { %3534 = vmatprep.subr.bf16.mxu1 %v4979_v39 }
 0x2cf   :  { %3531 = vmatmul.mubr.msk.bf16.vlgmr.msra.gmra.mrb[108].mxu1 %vm1466_vm3, %v3340_v8 }
 0x2d0   :  { %3535 = vmatpush3.bf16.msra.mxu1 %v3807_v43  ;;  %3536 = vmatprep.mubr.msk.bf16.mxu1 %vm3830_vm2, %v4979_v39 }
 0x2d1   :  { %3540 = vmatprep.subr.bf16.mxu1 %v4979_v39 }
 0x2d7   :  { %3537 = vmatmul.mubr.msk.bf16.vlgmr.msra.gmra.mrb[112].mxu1 %vm1466_vm3, %v3341_v44 }
 0x2d8   :  { %3541 = vmatpush3.bf16.msra.mxu1 %v3808_v60  ;;  %3542 = vmatprep.mubr.msk.bf16.mxu1 %vm3830_vm2, %v4979_v39  ;;  %v3818_v60 = vld [vmem:[%s4899_s5 + $0x30] sm:$0xff]  }
 0x2d9   :  { %3546 = vmatprep.subr.bf16.mxu1 %v4979_v39 }
 0x2df   :  { %3543 = vmatmul.mubr.msk.bf16.vlgmr.msra.gmra.mrb[116].mxu1 %vm1466_vm3, %v3342_v34  ;;  %v3819_v34 = vld [vmem:[%s4899_s5 + $0x38] sm:$0xff]  }
 0x2e0   :  { %3547 = vmatpush3.bf16.msra.mxu1 %v3809_v35  ;;  %3548 = vmatprep.mubr.msk.bf16.mxu1 %vm3830_vm2, %v4979_v39 }
 0x2e1   :  { %3552 = vmatprep.subr.bf16.mxu1 %v4979_v39 }
 0x2e7   :  { %3549 = vmatmul.mubr.msk.bf16.vlgmr.msra.gmra.mrb[120].mxu1 %vm1466_vm3, %v3343_v30 }
 0x2e8   :  { %3553 = vmatpush3.bf16.msra.mxu1 %v3810_v57  ;;  %3554 = vmatprep.mubr.msk.bf16.mxu1 %vm3830_vm2, %v4979_v39 }
 0x2e9   :  { %3558 = vmatprep.subr.bf16.mxu1 %v4979_v39 }
 0x2ef   :  { %3555 = vmatmul.mubr.msk.bf16.vlgmr.msra.gmra.mrb[124].mxu1 %vm1466_vm3, %v3344_v61 }
 0x2f0   :  { %3559 = vmatpush3.bf16.msra.mxu1 %v3811_v21  ;;  %3560 = vmatprep.mubr.msk.bf16.mxu1 %vm3830_vm2, %v4979_v39 }
 0x2f1   :  { %3564 = vmatprep.subr.bf16.mxu1 %v4979_v39 }
 0x2f7   :  { %3561 = vmatmul.mubr.msk.bf16.vlgmr.msra.gmra.mrb[128].mxu1 %vm1466_vm3, %v3345_v45 }
 0x2f8   :  { %3580 = vmatprep.mubr.msk.bf16.mxu1 %vm3830_vm2, %v4979_v39  ;;  %3565 = vmatpush3.bf16.msra.mxu1 %v3812_v22 }
 0x2f9   :  { %3566 = vmatprep.subr.bf16.mxu1 %v4979_v39 }
 0x2fc   :  { %3567 = vmatpush3.bf16.msra.mxu1 %v3813_v50 }
 0x2fd   :  { %3568 = vmatprep.subr.bf16.mxu1 %v4979_v39 }
 0x300   :  { %3569 = vmatpush3.bf16.msra.mxu1 %v3814_v15 }
 0x301   :  { %3570 = vmatprep.subr.bf16.mxu1 %v4979_v39 }
 0x304   :  { %3571 = vmatpush3.bf16.msra.mxu1 %v3815_v46 }
 0x305   :  { %3572 = vmatprep.subr.bf16.mxu1 %v4979_v39 }
 0x308   :  { %3573 = vmatpush3.bf16.msra.mxu1 %v3816_v5 }
 0x309   :  { %3574 = vmatprep.subr.bf16.mxu1 %v4979_v39 }
 0x30a   :  { %v1504_v0 = vpop.f32.mrb[32].mxu1 }
 0x30b   :  { %v3418_v32 = vpop.f32.mrb[33].mxu1 }
 0x30c   :  { %v1507_v2 = vpop.f32.mrb[34].mxu1  ;;  %3575 = vmatpush3.bf16.msra.mxu1 %v3817_v23 }
 0x30d   :  { %v3419_v37 = vpop.f32.mrb[35].mxu1  ;;  %3576 = vmatprep.subr.bf16.mxu1 %v4979_v39 }
 0x310   :  { %3577 = vmatpush3.bf16.msra.mxu1 %v3818_v60 }
 0x311   :  { %3578 = vmatprep.subr.bf16.mxu1 %v4979_v39 }
 0x312   :  { %v1553_v20 = vpop.f32.mrb[36].mxu1 }
 0x313   :  { %v1554_v31 = vadd.f32 %v1553_v20, %v1504_v0  ;;  %v3424_v19 = vpop.f32.mrb[37].mxu1 }
 0x314   :  { %v1556_v13 = vpop.f32.mrb[38].mxu1  ;;  %3579 = vmatpush3.bf16.msra.mxu1 %v3819_v34 }
 0x315   :  { %v3425_v63 = vpop.f32.mrb[39].mxu1  ;;  %3584 = vmatprep.subr.bf16.mxu1 %v4979_v39 }
 0x31a   :  { %v1605_v36 = vpop.f32.mrb[40].mxu1 }
 0x31b   :  { %v1611_v1 = vadd.f32 %v1605_v36, %v1554_v31  ;;  %v3430_v41 = vpop.f32.mrb[41].mxu1 }
 0x31c   :  { %v1608_v3 = vpop.f32.mrb[42].mxu1 }
 0x31d   :  { %v3431_v51 = vpop.f32.mrb[43].mxu1 }
 0x322   :  { %v1658_v53 = vpop.f32.mrb[44].mxu1 }
 0x323   :  { %v1664_v24 = vadd.f32 %v1658_v53, %v1611_v1  ;;  %v3436_v6 = vpop.f32.mrb[45].mxu1 }
 0x324   :  { %v1661_v10 = vpop.f32.mrb[46].mxu1 }
 0x325   :  { %v3437_v62 = vpop.f32.mrb[47].mxu1 }
 0x32a   :  { %v1711_v49 = vpop.f32.mrb[48].mxu1 }
 0x32b   :  { %v1717_v54 = vadd.f32 %v1711_v49, %v1664_v24  ;;  %v3442_v40 = vpop.f32.mrb[49].mxu1 }
 0x32c   :  { %v1714_v16 = vpop.f32.mrb[50].mxu1 }
 0x32d   :  { %v3443_v9 = vpop.f32.mrb[51].mxu1 }
 0x332   :  { %v1764_v7 = vpop.f32.mrb[52].mxu1 }
 0x333   :  { %v1770_v14 = vadd.f32 %v1764_v7, %v1717_v54  ;;  %v3448_v12 = vpop.f32.mrb[53].mxu1 }
 0x334   :  { %v1767_v17 = vpop.f32.mrb[54].mxu1 }
 0x335   :  { %v3449_v26 = vpop.f32.mrb[55].mxu1 }
 0x33a   :  { %v1817_v38 = vpop.f32.mrb[56].mxu1 }
 0x33b   :  { %v1823_v48 = vadd.f32 %v1817_v38, %v1770_v14  ;;  %v3454_v56 = vpop.f32.mrb[57].mxu1 }
 0x33c   :  { %v1820_v33 = vpop.f32.mrb[58].mxu1 }
 0x33d   :  { %v3455_v18 = vpop.f32.mrb[59].mxu1 }
 0x342   :  { %v1870_v55 = vpop.f32.mrb[60].mxu1 }
 0x343   :  { %v1876_v29 = vadd.f32 %v1870_v55, %v1823_v48  ;;  %v3460_v42 = vpop.f32.mrb[61].mxu1 }
 0x344   :  { %v1873_v43 = vpop.f32.mrb[62].mxu1 }
 0x345   :  { %v3461_v8 = vpop.f32.mrb[63].mxu1 }
 0x34a   :  { %v1923_v59 = vpop.f32.mrb[64].mxu1 }
 0x34b   :  { %v1929_v44 = vadd.f32 %v1923_v59, %v1876_v29  ;;  %v3466_v58 = vpop.f32.mrb[65].mxu1 }
 0x34c   :  { %v1926_v4 = vpop.f32.mrb[66].mxu1 }
 0x34d   :  { %v3467_v35 = vpop.f32.mrb[67].mxu1 }
 0x352   :  { %v1976_v27 = vpop.f32.mrb[68].mxu1 }
 0x353   :  { %v1982_v52 = vadd.f32 %v1976_v27, %v1929_v44  ;;  %v3472_v57 = vpop.f32.mrb[69].mxu1 }
 0x354   :  { %v1979_v30 = vpop.f32.mrb[70].mxu1 }
 0x355   :  { %v3473_v28 = vpop.f32.mrb[71].mxu1 }
 0x35a   :  { %v2029_v11 = vpop.f32.mrb[72].mxu1 }
 0x35b   :  { %v2035_v21 = vadd.f32 %v2029_v11, %v1982_v52  ;;  %v3478_v61 = vpop.f32.mrb[73].mxu1 }
 0x35c   :  { %v2032_v47 = vpop.f32.mrb[74].mxu1 }
 0x35d   :  { %v3479_v25 = vpop.f32.mrb[75].mxu1 }
 0x362   :  { %v2082_v45 = vpop.f32.mrb[76].mxu1 }
 0x363   :  { %v2088_v0 = vadd.f32 %v2082_v45, %v2035_v21  ;;  %v3484_v32 = vpop.f32.mrb[77].mxu1 }
 0x364   :  { %v2085_v2 = vpop.f32.mrb[78].mxu1 }
 0x365   :  { %v3485_v37 = vpop.f32.mrb[79].mxu1  ;;  %v3302_v2 = vld [vmem:[%s4901_s4] ss:$0 sm:$0xff] }
 0x36a   :  { %v2135_v20 = vpop.f32.mrb[80].mxu1 }
 0x36b   :  { %v2141_v31 = vadd.f32 %v2135_v20, %v2088_v0  ;;  %v3490_v19 = vpop.f32.mrb[81].mxu1 }
 0x36c   :  { %v2138_v13 = vpop.f32.mrb[82].mxu1 }
 0x36d   :  { %v3491_v63 = vpop.f32.mrb[83].mxu1 }
 0x372   :  { %v2188_v36 = vpop.f32.mrb[84].mxu1 }
 0x373   :  { %v2194_v1 = vadd.f32 %v2188_v36, %v2141_v31  ;;  %v3496_v41 = vpop.f32.mrb[85].mxu1  ;;  %v3820_v36 = vld [vmem:[%s4900_s7] sm:$0xff]  }
 0x374   :  { %v2191_v3 = vpop.f32.mrb[86].mxu1  ;;  %v3821_v41 = vld [vmem:[%s4900_s7 + $0x8] sm:$0xff]  }
 0x375   :  { %v3497_v51 = vpop.f32.mrb[87].mxu1  ;;  %v3822_v3 = vld [vmem:[%s4900_s7 + $0x10] sm:$0xff]  }
 0x376   :  { %v3823_v51 = vld [vmem:[%s4900_s7 + $0x18] sm:$0xff]  }
 0x37a   :  { %v2241_v53 = vpop.f32.mrb[88].mxu1 }
 0x37b   :  { %v2247_v24 = vadd.f32 %v2241_v53, %v2194_v1  ;;  %v3502_v6 = vpop.f32.mrb[89].mxu1  ;;  %v3824_v53 = vld [vmem:[%s4900_s7 + $0x20] sm:$0xff]  }
 0x37c   :  { %v2244_v10 = vpop.f32.mrb[90].mxu1  ;;  %v3826_v6 = vld [vmem:[%s4900_s7 + $0x30] sm:$0xff]  }
 0x37d   :  { %v3503_v62 = vpop.f32.mrb[91].mxu1  ;;  %v3827_v10 = vld [vmem:[%s4900_s7 + $0x38] sm:$0xff]  }
 0x37e   :  { %v3303_v62 = vld [vmem:[%s4902_s6] ss:$0 sm:$0xff] }
 0x382   :  { %v2294_v49 = vpop.f32.mrb[92].mxu1 }
 0x383   :  { %v2300_v54 = vadd.f32 %v2294_v49, %v2247_v24  ;;  %v3508_v40 = vpop.f32.mrb[93].mxu1  ;;  %v3825_v24 = vld [vmem:[%s4900_s7 + $0x28] sm:$0xff]  }
 0x384   :  { %v2297_v16 = vpop.f32.mrb[94].mxu1 }
 0x385   :  { %v3509_v9 = vpop.f32.mrb[95].mxu1 }
 0x38a   :  { %v2347_v7 = vpop.f32.mrb[96].mxu1 }
 0x38b   :  { %v2353_v22 = vadd.f32 %v2347_v7, %v2300_v54  ;;  %v3514_v14 = vpop.f32.mrb[97].mxu1 }
 0x38c   :  { %v2350_v12 = vpop.f32.mrb[98].mxu1 }
 0x38d   :  { %v3515_v17 = vpop.f32.mrb[99].mxu1 }
 0x392   :  { %v2400_v26 = vpop.f32.mrb[100].mxu1 }
 0x393   :  { %v2406_v50 = vadd.f32 %v2400_v26, %v2353_v22  ;;  %v3520_v38 = vpop.f32.mrb[101].mxu1 }
 0x394   :  { %v2403_v15 = vpop.f32.mrb[102].mxu1 }
 0x395   :  { %v3521_v48 = vpop.f32.mrb[103].mxu1 }
 0x39a   :  { %v2453_v56 = vpop.f32.mrb[104].mxu1 }
 0x39b   :  { %v2459_v33 = vadd.f32 %v2453_v56, %v2406_v50  ;;  %v3526_v18 = vpop.f32.mrb[105].mxu1 }
 0x39c   :  { %v2456_v46 = vpop.f32.mrb[106].mxu1 }
 0x39d   :  { %v3527_v55 = vpop.f32.mrb[107].mxu1 }
 0x3a2   :  { %v2506_v5 = vpop.f32.mrb[108].mxu1 }
 0x3a3   :  { %v2512_v29 = vadd.f32 %v2506_v5, %v2459_v33  ;;  %v3532_v42 = vpop.f32.mrb[109].mxu1 }
 0x3a4   :  { %v2509_v43 = vpop.f32.mrb[110].mxu1 }
 0x3a5   :  { %v3533_v8 = vpop.f32.mrb[111].mxu1 }
 0x3aa   :  { %v2559_v23 = vpop.f32.mrb[112].mxu1 }
 0x3ab   :  { %v2565_v59 = vadd.f32 %v2559_v23, %v2512_v29  ;;  %v3538_v60 = vpop.f32.mrb[113].mxu1 }
 0x3ac   :  { %v2562_v44 = vpop.f32.mrb[114].mxu1 }
 0x3ad   :  { %v3539_v58 = vpop.f32.mrb[115].mxu1 }
 0x3b2   :  { %v2612_v4 = vpop.f32.mrb[116].mxu1 }
 0x3b3   :  { %v2618_v35 = vadd.f32 %v2612_v4, %v2565_v59  ;;  %v3544_v34 = vpop.f32.mrb[117].mxu1 }
 0x3b4   :  { %v2615_v27 = vpop.f32.mrb[118].mxu1 }
 0x3b5   :  { %v3545_v52 = vpop.f32.mrb[119].mxu1 }
 0x3ba   :  { %v2665_v57 = vpop.f32.mrb[120].mxu1 }
 0x3bb   :  { %v2671_v30 = vadd.f32 %v2665_v57, %v2618_v35  ;;  %v3550_v28 = vpop.f32.mrb[121].mxu1 }
 0x3bc   :  { %v2668_v11 = vpop.f32.mrb[122].mxu1 }
 0x3bd   :  { %v3551_v21 = vpop.f32.mrb[123].mxu1 }
 0x3c2   :  { %v2718_v61 = vpop.f32.mrb[124].mxu1 }
 0x3c3   :  { %v2724_v47 = vadd.f32 %v2718_v61, %v2671_v30  ;;  %v3556_v25 = vpop.f32.mrb[125].mxu1 }
 0x3c4   :  { %v2721_v45 = vpop.f32.mrb[126].mxu1 }
 0x3c5   :  { %v3557_v0 = vpop.f32.mrb[127].mxu1 }
 0x3ca   :  { %v2771_v32 = vpop.f32.mrb[128].mxu1 }
 0x3cb   :  { %v2777_v37 = vadd.f32 %v2771_v32, %v2724_v47  ;;  %v3562_v20 = vpop.f32.mrb[129].mxu1 }
 0x3cc   :  { %v2774_v31 = vpop.f32.mrb[130].mxu1 }
 0x3cd   :  { %v2785_v19 = vadd.f32 %v3302_v2, %v2777_v37  ;;  %v3563_v13 = vpop.f32.mrb[131].mxu1 }
 0x3cf   :  { %v2786_v63 = vmax.f32 %v2785_v19, 0.0 }
 0x3d1   :  { %v2787_v1 = vpack.c.bf16 %v2786_v63, %v2786_v63 }
 0x3d3   :  { %3581 = vmatmul.mubr.bf16.vlgmr.msra.gmra.mrb[132].mxu1 %v2787_v1 }
 0x3d4   :  { %3585 = vmatpush3.bf16.msra.mxu1 %v3820_v36  ;;  %3600 = vmatprep.mubr.msk.bf16.mxu1 %vm3830_vm2, %v4979_v39 }
 0x3d5   :  { %3586 = vmatprep.subr.bf16.mxu1 %v4979_v39 }
 0x3d8   :  { %3587 = vmatpush3.bf16.msra.mxu1 %v3821_v41 }
 0x3d9   :  { %3588 = vmatprep.subr.bf16.mxu1 %v4979_v39 }
 0x3dc   :  { %3589 = vmatpush3.bf16.msra.mxu1 %v3822_v3 }
 0x3dd   :  { %3590 = vmatprep.subr.bf16.mxu1 %v4979_v39 }
 0x3e0   :  { %3591 = vmatpush3.bf16.msra.mxu1 %v3823_v51 }
 0x3e1   :  { %3592 = vmatprep.subr.bf16.mxu1 %v4979_v39 }
 0x3e4   :  { %3593 = vmatpush3.bf16.msra.mxu1 %v3824_v53 }
 0x3e5   :  { %3594 = vmatprep.subr.bf16.mxu1 %v4979_v39 }
 0x3e8   :  { %3595 = vmatpush3.bf16.msra.mxu1 %v3825_v24 }
 0x3e9   :  { %3596 = vmatprep.subr.bf16.mxu1 %v4979_v39 }
 0x3ec   :  { %3597 = vmatpush3.bf16.msra.mxu1 %v3826_v6 }
 0x3ed   :  { %3598 = vmatprep.subr.bf16.mxu1 %v4979_v39  ;;  %v3312_v39 = vld [vmem:[%s4903_s8] ss:$0 sm:$0xff] }
 0x3f0   :  { %3599 = vmatpush3.bf16.msra.mxu1 %v3827_v10 }
 0x4a6   :  { %v2893_v49 = vpop.f32.mrb[132].mxu1 }
 0x4a7   :  { %v2894_v54 = vadd.f32 %v3303_v62, %v2893_v49  ;;  %v3582_v40 = vpop.f32.mrb[133].mxu1 }
 0x4a8   :  { %v2896_v16 = vpop.f32.mrb[134].mxu1 }
 0x4a9   :  { %v2899_v9 = vmax.f32 %v2894_v54, 0.0  ;;  %v3583_v7 = vpop.f32.mrb[135].mxu1 }
 0x4ab   :  { %v2900_v22 = vpack.c.bf16 %v2899_v9, %v2899_v9 }
 0x4ad   :  { %3601 = vmatmul.mubr.bf16.vlgmr.msra.gmra.mrb[136].mxu1 %v2900_v22 }
 0x580   :  { %v3006_v14 = vpop.f32.mrb[136].mxu1 }
 0x581   :  { %v3007_v12 = vadd.f32 %v3312_v39, %v3006_v14  ;;  %v3602_v17 = vpop.f32.mrb[137].mxu1 }
 0x582   :  { %v3009_v26 = vpop.f32.mrb[138].mxu1 }
 0x583   :  { %v3012_v50 = vmax.f32 %v3007_v12, 0.0  ;;  %v3603_v38 = vpop.f32.mrb[139].mxu1 }
 0x585   :  { %3013 = vst.msk [vmem:[%s4904_s9] sm:$0xff] %vm1466_vm3, %v3012_v50 }

</bundles_post_ra>
